<compile_context>
chip_gen: v7x
topology: tpu7x:2x2x1
jax: 0.10.0
libtpu: 0.0.40
codegen_flags: <defaults>
</compile_context>

<pallas_src>
import functools

import numpy as np
import jax
import jax.numpy as jnp
from jax import lax
from jax.experimental import pallas as pl
from jax.experimental.pallas import tpu as pltpu

NEG_INF = float("-inf")          # python float -> jaxpr literal (never captured)


def _round_up(x, m):
    return ((x + m - 1) // m) * m


def _inside_kernel(lens_ref, s_ref, out_ref, sc_ref, scT_ref, si_ref, *, multiroot):
    """Eisner inside recursion for one sentence (one grid step).

    lens_ref : SMEM (B,)      int32  scalar-prefetch sentence lengths (mask.sum(1))
    s_ref    : VMEM (1, L, L) f32    permuted scores, S[h, d] = scores[b, d, h]
    out_ref  : VMEM (1, 1, L) f32    row 0 of the complete-span chart s_c
    sc_ref   : VMEM (2L, L)   f32    s_c chart; rows [L, 2L) are -inf padding
    scT_ref  : VMEM (2L, L)   f32    transpose mirror of s_c (same padding)
    si_ref   : VMEM (2L, L)   f32    s_i chart; rows [L, 2L) are -inf padding
    """
    L = s_ref.shape[1]
    b = pl.program_id(0)
    length = lens_ref[b]

    S = s_ref[0]                                           # (L, L)

    row = lax.broadcasted_iota(jnp.int32, (L, L), 0)
    col = lax.broadcasted_iota(jnp.int32, (L, L), 1)
    d = col - row                                          # hoisted diagonal offsets
    r2 = lax.broadcasted_iota(jnp.int32, (2 * L, L), 0)
    c2 = lax.broadcasted_iota(jnp.int32, (2 * L, L), 1)

    # (Re)initialize the charts for this sentence.  Rows >= L stay -inf forever
    # and serve as padding for the width-shifted dynamic-slice loads below.
    diag0 = jnp.where(r2 == c2, 0.0, NEG_INF).astype(jnp.float32)
    sc_ref[...] = diag0
    scT_ref[...] = diag0                                   # diag matrix == its transpose
    si_ref[...] = jnp.full((2 * L, L), NEG_INF, dtype=jnp.float32)

    ones_col = jnp.ones((L, 1), dtype=jnp.float32)         # hoisted MXU row-sum rhs

    def lse_rows(x, mask):
        """logsumexp over axis=1 restricted to `mask`; -inf safe (torch semantics).
        The exp row-sum runs on the otherwise idle MXU; only the max uses the XLU."""
        xm = jnp.where(mask, x, NEG_INF)
        m = jnp.max(xm, axis=1, keepdims=True)             # (L, 1) XLU reduce
        finite = m > NEG_INF
        safe_m = jnp.where(finite, m, 0.0)
        e = jnp.exp(xm - safe_m)                           # EUP; masked entries -> 0
        s = jnp.dot(e, ones_col, preferred_element_type=jnp.float32)   # MXU matvec
        return jnp.where(finite, safe_m + jnp.log(s), NEG_INF)         # (L, 1)

    def width_step(w, carry):
        valid_i = row + w <= L - 1                         # i < L - w
        span = (d >= 0) & (d <= w - 1) & valid_i           # k in [i, i+w-1]
        span_r = (d >= 1) & (d <= w) & valid_i             # k in [i+1, i+w]

        # ----- incomplete spans --------------------------------------------
        # il[i] = ir[i] = lse_k { s_c[i, k] + s_c[i+w, k+1] }
        C = sc_ref[pl.ds(0, L), :]
        Cw = sc_ref[pl.ds(w, L), :]            # [i, k] -> s_c[i+w, k]  (-inf padded)
        c_shift = jnp.roll(Cw, -1, axis=1)     # [i, k] -> s_c[i+w, k+1]
        il = lse_rows(C + c_shift, span)       # (L, 1)
        il_row = jnp.transpose(il)             # (1, L)

        # s_i[i+w, i] = il[i] + S[i+w, i];  s_i[i, i+w] = il[i] + S[i, i+w]
        Si = si_ref[pl.ds(0, L), :]
        si_new = jnp.where(d == -w, il_row + S, Si)
        si_new = jnp.where(d == w, il + S, si_new)
        si_ref[pl.ds(0, L), :] = si_new

        # ----- complete spans ----------------------------------------------
        # cl[i] = lse_k { s_c[k, i] + s_i[i+w, k] },  k in [i, i+w-1]
        CT = scT_ref[pl.ds(0, L), :]           # [i, k] -> s_c[k, i]
        Siw = si_ref[pl.ds(w, L), :]           # updated s_i, [i, k] -> s_i[i+w, k]
        cl = lse_rows(CT + Siw, span)          # (L, 1)

        # cr[i] = lse_k { s_i[i, k] + s_c[k, i+w] },  k in [i+1, i+w]
        CTw = scT_ref[pl.ds(w, L), :]          # [i, k] -> s_c[k, i+w]
        cr = lse_rows(si_new + CTw, span_r)    # (L, 1)

        # s_c[i+w, i] = cl[i];  s_c[i, i+w] = cr[i]   (mirrored into scT)
        sc_new = jnp.where(d == -w, jnp.transpose(cl), C)
        sc_new = jnp.where(d == w, cr, sc_new)
        scT_new = jnp.where(d == w, cl, CT)
        scT_new = jnp.where(d == -w, jnp.transpose(cr), scT_new)

        if not multiroot:
            # single-root constraint: s_c[0, w] = -inf unless w == sentence length
            bad = length != w
            sc_new = jnp.where((row == 0) & (col == w) & bad, NEG_INF, sc_new)
            scT_new = jnp.where((row == w) & (col == 0) & bad, NEG_INF, scT_new)

        sc_ref[pl.ds(0, L), :] = sc_new
        scT_ref[pl.ds(0, L), :] = scT_new
        return carry

    # Widths > lens[b] never feed s_c[0, lens[b]]; bound the loop per sentence.
    lax.fori_loop(1, length + 1, width_step, 0)

    out_ref[0] = sc_ref[pl.ds(0, 1), :]        # row 0 of s_c, lane-dense (1, L)


def inside_row0_pallas(scores, lens, multiroot=False):
    """Returns row 0 of the permuted complete-span chart: out[b, j] = s_c[b, 0, j],
    so logZ_b = out[b, lens[b]]."""
    B, L0, _ = scores.shape
    L = _round_up(max(L0, 128), 128)           # lane-dense padding

    # Pre-transpose (supar's permute(2,1,0)) outside the kernel; pad with finite
    # zeros (padded rows/cols never reach s_c[0, lens[b]] because the width loop
    # is bounded by lens[b]).
    scores_t = jnp.transpose(scores.astype(jnp.float32), (0, 2, 1))
    if L != L0:
        scores_t = jnp.pad(scores_t, ((0, 0), (0, L - L0), (0, L - L0)))

    kernel = functools.partial(_inside_kernel, multiroot=multiroot)
    grid_spec = pltpu.PrefetchScalarGridSpec(
        num_scalar_prefetch=1,
        grid=(B,),
        in_specs=[pl.BlockSpec((1, L, L), lambda b, lens_ref: (b, 0, 0))],
        out_specs=pl.BlockSpec((1, 1, L), lambda b, lens_ref: (b, 0, 0)),
        scratch_shapes=[
            pltpu.VMEM((2 * L, L), jnp.float32),   # s_c   (padded)
            pltpu.VMEM((2 * L, L), jnp.float32),   # s_c^T (padded)
            pltpu.VMEM((2 * L, L), jnp.float32),   # s_i   (padded)
        ],
    )

    # Explicit VMEM budget (keeps v7x's 64 MiB happy) + cost hint for XLA.
    vmem_limit = int(min(max(40 * L * L + (8 << 20), 32 << 20), 64 << 20))
    cost = pl.CostEstimate(flops=int(12 * B * L ** 3),
                           transcendentals=int(3 * B * L ** 3),
                           bytes_accessed=int(8 * B * L * L))

    row0 = pl.pallas_call(
        kernel,
        out_shape=jax.ShapeDtypeStruct((B, 1, L), jnp.float32),
        grid_spec=grid_spec,
        compiler_params=pltpu.CompilerParams(
            dimension_semantics=("parallel",),     # batches independent -> both v7x TCs
            vmem_limit_bytes=vmem_limit),
        cost_estimate=cost,
    )(lens.astype(jnp.int32), scores_t)
    return row0[:, 0, :]                           # (B, L_padded)


def crf_dependency_forward(scores, mask, target=None, mbr=False, partial=False,
                           multiroot=False):
    """Mirrors CRFDependency.forward (mbr=False, partial=False paths)."""
    if mbr:
        # TODO(synk): mbr=True marginals need d(logZ)/d(scores) (outside pass);
        # not implemented as a Pallas kernel here.
        raise NotImplementedError("mbr=True not supported")
    if partial:
        # TODO(synk): partial=True needs the candidate-constrained inside pass.
        raise NotImplementedError("partial=True not supported")

    B, L, _ = scores.shape
    lens = mask.astype(jnp.int32).sum(axis=1)
    row0 = inside_row0_pallas(scores, lens, multiroot=multiroot)   # (B, L_pad)
    logZ = jnp.sum(row0[jnp.arange(B), lens])

    marginals = scores                      # mbr=False -> original scores
    if target is None:
        return marginals

    gold = jnp.take_along_axis(scores, target[..., None].astype(jnp.int32),
                               axis=-1)[..., 0]
    gold_score = jnp.sum(jnp.where(mask, gold, 0.0))
    loss = (logZ - gold_score) / mask.sum()
    return loss, marginals


# ----------------------------------------------------------------------------
# pure-numpy reference of the inside algorithm (float64) for validation
# ----------------------------------------------------------------------------
def _inside_reference_np(scores, lens, multiroot=False):
    scores = np.asarray(scores, dtype=np.float64)
    B, L, _ = scores.shape

    def lse(v):
        m = np.max(v)
        if not np.isfinite(m):
            return -np.inf
        return m + np.log(np.sum(np.exp(v - m)))

    logZ = 0.0
    for b in range(B):
        S = scores[b].T                           # permuted s_arc
        s_i = np.full((L, L), -np.inf)
        s_c = np.full((L, L), -np.inf)
        np.fill_diagonal(s_c, 0.0)
        for w in range(1, L):
            n = L - w
            il = np.empty(n)
            for i in range(n):
                il[i] = lse(np.array(
                    [s_c[i, i + j] + s_c[i + w, i + j + 1] for j in range(w)]))
            for i in range(n):
                s_i[i + w, i] = il[i] + S[i + w, i]
                s_i[i, i + w] = il[i] + S[i, i + w]
            for i in range(n):
                cl = [s_c[i + j, i] + s_i[i + w, i + j] for j in range(w)]
                cr = [s_i[i, i + 1 + j] + s_c[i + 1 + j, i + w] for j in range(w)]
                s_c[i + w, i] = lse(np.array(cl))
                s_c[i, i + w] = lse(np.array(cr))
            if (not multiroot) and lens[b] != w:
                s_c[0, w] = -np.inf
        logZ += s_c[0, lens[b]]
    return logZ


if __name__ == "__main__":
    B, L = 2, 8
    key = jax.random.PRNGKey(0)
    k1, k2 = jax.random.split(key)

    scores = jax.random.normal(k1, (B, L, L), dtype=jnp.float32)
    lens_np = np.array([7, 5], dtype=np.int32)           # first column is root pseudo word
    pos = jnp.arange(L)[None, :]
    mask = (pos >= 1) & (pos <= jnp.asarray(lens_np)[:, None])   # [B, L] bool
    target = jax.random.randint(k2, (B, L), 0, L, dtype=jnp.int32)

    loss, marginals = crf_dependency_forward(scores, mask, target)
    loss = jax.block_until_ready(loss)
    marginals = jax.block_until_ready(marginals)

    # validate against the float64 numpy reference
    scores_np = np.asarray(scores, dtype=np.float64)
    mask_np = np.asarray(mask)
    target_np = np.asarray(target)
    ref_logZ = _inside_reference_np(scores_np, lens_np, multiroot=False)
    gold = scores_np[np.arange(B)[:, None], np.arange(L)[None, :], target_np]
    ref_score = gold[mask_np].sum()
    ref_loss = (ref_logZ - ref_score) / mask_np.sum()

    assert np.allclose(float(loss), ref_loss, rtol=2e-3, atol=2e-3), (float(loss), ref_loss)
    assert np.allclose(np.asarray(marginals), np.asarray(scores))
    print("KERNEL_OK")
</pallas_src>

<mosaic_0001>
module attributes {stable_mosaic.version = 11 : i64} {
  func.func @_inside_kernel(%arg0: i32, %arg1: memref<2xi32, #tpu.memory_space<smem>>, %arg2: memref<1x128x128xf32, #tpu.memory_space<vmem>>, %arg3: memref<1x1x128xf32, #tpu.memory_space<vmem>>, %arg4: memref<256x128xf32, #tpu.memory_space<vmem>>, %arg5: memref<256x128xf32, #tpu.memory_space<vmem>>, %arg6: memref<256x128xf32, #tpu.memory_space<vmem>>) attributes {dimension_semantics = [#tpu.dimension_semantics<parallel>], iteration_bounds = array<i64: 2>, scalar_prefetch = 1 : i64, scratch_operands = 3 : i64, tpu.core_type = #tpu.core_type<tc>, window_params = [{transform_indices = @transform_0, window_bounds = array<i64: 1, 128, 128>}, {transform_indices = @transform_1, window_bounds = array<i64: 1, 1, 128>}]} {
    %0 = arith.index_cast %arg0 : i32 to index
    %1 = memref.load %arg1[%0] : memref<2xi32, #tpu.memory_space<smem>>
    %c0 = arith.constant 0 : index
    %c0_0 = arith.constant 0 : index
    %c0_1 = arith.constant 0 : index
    %2 = vector.load %arg2[%c0, %c0_0, %c0_1] : memref<1x128x128xf32, #tpu.memory_space<vmem>>, vector<1x128x128xf32>
    %3 = vector.shape_cast %2 : vector<1x128x128xf32> to vector<128x128xf32>
    %4 = tpu.iota {dimensions = array<i32: 0>} : vector<128x128xi32>
    %5 = tpu.iota {dimensions = array<i32: 1>} : vector<128x128xi32>
    %6 = arith.subi %5, %4 : vector<128x128xi32>
    %7 = tpu.iota {dimensions = array<i32: 0>} : vector<256x128xi32>
    %8 = tpu.iota {dimensions = array<i32: 1>} : vector<256x128xi32>
    %9 = arith.cmpi eq, %7, %8 : vector<256x128xi32>
    %cst = arith.constant 0.000000e+00 : f32
    %cst_2 = arith.constant 0xFF800000 : f32
    %10 = vector.broadcast %cst : f32 to vector<256x128xf32>
    %11 = vector.broadcast %cst_2 : f32 to vector<256x128xf32>
    %12 = arith.select %9, %10, %11 : vector<256x128xi1>, vector<256x128xf32>
    %c0_3 = arith.constant 0 : index
    %c0_4 = arith.constant 0 : index
    %13 = vector.load %arg4[%c0_3, %c0_4] : memref<256x128xf32, #tpu.memory_space<vmem>>, vector<256x128xf32>
    tpu.vector_store %arg4[%c0_3, %c0_4], %12 {strides = array<i32>} : memref<256x128xf32, #tpu.memory_space<vmem>>, vector<256x128xf32>,
    %c0_5 = arith.constant 0 : index
    %c0_6 = arith.constant 0 : index
    %14 = vector.load %arg5[%c0_5, %c0_6] : memref<256x128xf32, #tpu.memory_space<vmem>>, vector<256x128xf32>
    tpu.vector_store %arg5[%c0_5, %c0_6], %12 {strides = array<i32>} : memref<256x128xf32, #tpu.memory_space<vmem>>, vector<256x128xf32>,
    %cst_7 = arith.constant 0xFF800000 : f32
    %15 = vector.broadcast %cst_7 : f32 to vector<256x128xf32>
    %c0_8 = arith.constant 0 : index
    %c0_9 = arith.constant 0 : index
    %16 = vector.load %arg6[%c0_8, %c0_9] : memref<256x128xf32, #tpu.memory_space<vmem>>, vector<256x128xf32>
    tpu.vector_store %arg6[%c0_8, %c0_9], %15 {strides = array<i32>} : memref<256x128xf32, #tpu.memory_space<vmem>>, vector<256x128xf32>,
    %cst_10 = arith.constant 1.000000e+00 : f32
    %17 = vector.broadcast %cst_10 : f32 to vector<128x1xf32>
    %c1_i32 = arith.constant 1 : i32
    %18 = arith.addi %1, %c1_i32 : i32
    %c0_i32 = arith.constant 0 : i32
    %c1_i32_11 = arith.constant 1 : i32
    %19 = arith.subi %18, %c1_i32_11 : i32
    %20 = arith.addi %c1_i32_11, %19 : i32
    %c1_i32_12 = arith.constant 1 : i32
    scf.for %arg7 = %c1_i32_11 to %20 step %c1_i32_12  : i32 {
      %25 = vector.broadcast %arg7 : i32 to vector<128x128xi32>
      %26 = arith.addi %4, %25 : vector<128x128xi32>
      %c127_i32 = arith.constant 127 : i32
      %27 = vector.broadcast %c127_i32 : i32 to vector<128x128xi32>
      %28 = arith.cmpi sle, %26, %27 : vector<128x128xi32>
      %c0_i32_18 = arith.constant 0 : i32
      %29 = vector.broadcast %c0_i32_18 : i32 to vector<128x128xi32>
      %30 = arith.cmpi sge, %6, %29 : vector<128x128xi32>
      %c1_i32_19 = arith.constant 1 : i32
      %31 = arith.subi %arg7, %c1_i32_19 : i32
      %32 = vector.broadcast %31 : i32 to vector<128x128xi32>
      %33 = arith.cmpi sle, %6, %32 : vector<128x128xi32>
      %34 = arith.andi %30, %33 : vector<128x128xi1>
      %35 = arith.andi %34, %28 : vector<128x128xi1>
      %c1_i32_20 = arith.constant 1 : i32
      %36 = vector.broadcast %c1_i32_20 : i32 to vector<128x128xi32>
      %37 = arith.cmpi sge, %6, %36 : vector<128x128xi32>
      %38 = vector.broadcast %arg7 : i32 to vector<128x128xi32>
      %39 = arith.cmpi sle, %6, %38 : vector<128x128xi32>
      %40 = arith.andi %37, %39 : vector<128x128xi1>
      %41 = arith.andi %40, %28 : vector<128x128xi1>
      %c0_21 = arith.constant 0 : index
      %c0_22 = arith.constant 0 : index
      %42 = vector.load %arg4[%c0_21, %c0_22] : memref<256x128xf32, #tpu.memory_space<vmem>>, vector<128x128xf32>
      %43 = arith.index_cast %arg7 : i32 to index
      %c0_23 = arith.constant 0 : index
      %44 = vector.load %arg4[%43, %c0_23] : memref<256x128xf32, #tpu.memory_space<vmem>>, vector<128x128xf32>
      %45 = vector.extract_strided_slice %44 {offsets = [0, 1], sizes = [128, 127], strides = [1, 1]} : vector<128x128xf32> to vector<128x127xf32>
      %46 = vector.extract_strided_slice %44 {offsets = [0, 0], sizes = [128, 1], strides = [1, 1]} : vector<128x128xf32> to vector<128x1xf32>
      %47 = tpu.concatenate %45, %46 in 1 : vector<128x127xf32>, vector<128x1xf32> -> vector<128x128xf32>
      %48 = arith.addf %42, %47 : vector<128x128xf32>
      %cst_24 = arith.constant 0xFF800000 : f32
      %49 = vector.broadcast %cst_24 : f32 to vector<128x128xf32>
      %50 = arith.select %35, %48, %49 : vector<128x128xi1>, vector<128x128xf32>
      %cst_25 = arith.constant dense<0xFF800000> : vector<128xf32>
      %51 = vector.multi_reduction <maximumf>, %50, %cst_25 [1] : vector<128x128xf32> to vector<128xf32>
      %52 = vector.shape_cast %51 : vector<128xf32> to vector<128x1xf32>
      %cst_26 = arith.constant 0xFF800000 : f32
      %53 = vector.broadcast %cst_26 : f32 to vector<128x1xf32>
      %54 = arith.cmpf ogt, %52, %53 : vector<128x1xf32>
      %cst_27 = arith.constant 0.000000e+00 : f32
      %55 = vector.broadcast %cst_27 : f32 to vector<128x1xf32>
      %56 = arith.select %54, %52, %55 : vector<128x1xi1>, vector<128x1xf32>
      %57 = vector.broadcast %56 : vector<128x1xf32> to vector<128x128xf32>
      %58 = arith.subf %50, %57 : vector<128x128xf32>
      %59 = math.exp %58 : vector<128x128xf32>
      %cst_28 = arith.constant dense<0.000000e+00> : vector<128x1xf32>
      %60 = tpu.matmul %59, %17, %cst_28 {dimension_numbers = #tpu.dot_dimension_numbers<[1], [0], [0], [1], [0, 0, 1, 1], [], []>} : vector<128x128xf32>, vector<128x1xf32>, vector<128x1xf32> -> vector<128x1xf32>
      %61 = math.log %60 : vector<128x1xf32>
      %62 = arith.addf %56, %61 : vector<128x1xf32>
      %cst_29 = arith.constant 0xFF800000 : f32
      %63 = vector.broadcast %cst_29 : f32 to vector<128x1xf32>
      %64 = arith.select %54, %62, %63 : vector<128x1xi1>, vector<128x1xf32>
      %65 = tpu.transpose %64, [1, 0] : vector<128x1xf32> -> vector<1x128xf32>
      %c0_30 = arith.constant 0 : index
      %c0_31 = arith.constant 0 : index
      %66 = vector.load %arg6[%c0_30, %c0_31] : memref<256x128xf32, #tpu.memory_space<vmem>>, vector<128x128xf32>
      %c0_i32_32 = arith.constant 0 : i32
      %67 = arith.subi %c0_i32_32, %arg7 : i32
      %68 = vector.broadcast %67 : i32 to vector<128x128xi32>
      %69 = arith.cmpi eq, %6, %68 : vector<128x128xi32>
      %70 = vector.broadcast %65 : vector<1x128xf32> to vector<128x128xf32>
      %71 = arith.addf %70, %3 : vector<128x128xf32>
      %72 = arith.select %69, %71, %66 : vector<128x128xi1>, vector<128x128xf32>
      %73 = vector.broadcast %arg7 : i32 to vector<128x128xi32>
      %74 = arith.cmpi eq, %6, %73 : vector<128x128xi32>
      %75 = vector.broadcast %64 : vector<128x1xf32> to vector<128x128xf32>
      %76 = arith.addf %75, %3 : vector<128x128xf32>
      %77 = arith.select %74, %76, %72 : vector<128x128xi1>, vector<128x128xf32>
      %c0_33 = arith.constant 0 : index
      %c0_34 = arith.constant 0 : index
      %78 = vector.load %arg6[%c0_33, %c0_34] : memref<256x128xf32, #tpu.memory_space<vmem>>, vector<128x128xf32>
      tpu.vector_store %arg6[%c0_33, %c0_34], %77 {strides = array<i32>} : memref<256x128xf32, #tpu.memory_space<vmem>>, vector<128x128xf32>,
      %c0_35 = arith.constant 0 : index
      %c0_36 = arith.constant 0 : index
      %79 = vector.load %arg5[%c0_35, %c0_36] : memref<256x128xf32, #tpu.memory_space<vmem>>, vector<128x128xf32>
      %80 = arith.index_cast %arg7 : i32 to index
      %c0_37 = arith.constant 0 : index
      %81 = vector.load %arg6[%80, %c0_37] : memref<256x128xf32, #tpu.memory_space<vmem>>, vector<128x128xf32>
      %82 = arith.addf %79, %81 : vector<128x128xf32>
      %cst_38 = arith.constant 0xFF800000 : f32
      %83 = vector.broadcast %cst_38 : f32 to vector<128x128xf32>
      %84 = arith.select %35, %82, %83 : vector<128x128xi1>, vector<128x128xf32>
      %cst_39 = arith.constant dense<0xFF800000> : vector<128xf32>
      %85 = vector.multi_reduction <maximumf>, %84, %cst_39 [1] : vector<128x128xf32> to vector<128xf32>
      %86 = vector.shape_cast %85 : vector<128xf32> to vector<128x1xf32>
      %cst_40 = arith.constant 0xFF800000 : f32
      %87 = vector.broadcast %cst_40 : f32 to vector<128x1xf32>
      %88 = arith.cmpf ogt, %86, %87 : vector<128x1xf32>
      %cst_41 = arith.constant 0.000000e+00 : f32
      %89 = vector.broadcast %cst_41 : f32 to vector<128x1xf32>
      %90 = arith.select %88, %86, %89 : vector<128x1xi1>, vector<128x1xf32>
      %91 = vector.broadcast %90 : vector<128x1xf32> to vector<128x128xf32>
      %92 = arith.subf %84, %91 : vector<128x128xf32>
      %93 = math.exp %92 : vector<128x128xf32>
      %cst_42 = arith.constant dense<0.000000e+00> : vector<128x1xf32>
      %94 = tpu.matmul %93, %17, %cst_42 {dimension_numbers = #tpu.dot_dimension_numbers<[1], [0], [0], [1], [0, 0, 1, 1], [], []>} : vector<128x128xf32>, vector<128x1xf32>, vector<128x1xf32> -> vector<128x1xf32>
      %95 = math.log %94 : vector<128x1xf32>
      %96 = arith.addf %90, %95 : vector<128x1xf32>
      %cst_43 = arith.constant 0xFF800000 : f32
      %97 = vector.broadcast %cst_43 : f32 to vector<128x1xf32>
      %98 = arith.select %88, %96, %97 : vector<128x1xi1>, vector<128x1xf32>
      %99 = arith.index_cast %arg7 : i32 to index
      %c0_44 = arith.constant 0 : index
      %100 = vector.load %arg5[%99, %c0_44] : memref<256x128xf32, #tpu.memory_space<vmem>>, vector<128x128xf32>
      %101 = arith.addf %77, %100 : vector<128x128xf32>
      %cst_45 = arith.constant 0xFF800000 : f32
      %102 = vector.broadcast %cst_45 : f32 to vector<128x128xf32>
      %103 = arith.select %41, %101, %102 : vector<128x128xi1>, vector<128x128xf32>
      %cst_46 = arith.constant dense<0xFF800000> : vector<128xf32>
      %104 = vector.multi_reduction <maximumf>, %103, %cst_46 [1] : vector<128x128xf32> to vector<128xf32>
      %105 = vector.shape_cast %104 : vector<128xf32> to vector<128x1xf32>
      %cst_47 = arith.constant 0xFF800000 : f32
      %106 = vector.broadcast %cst_47 : f32 to vector<128x1xf32>
      %107 = arith.cmpf ogt, %105, %106 : vector<128x1xf32>
      %cst_48 = arith.constant 0.000000e+00 : f32
      %108 = vector.broadcast %cst_48 : f32 to vector<128x1xf32>
      %109 = arith.select %107, %105, %108 : vector<128x1xi1>, vector<128x1xf32>
      %110 = vector.broadcast %109 : vector<128x1xf32> to vector<128x128xf32>
      %111 = arith.subf %103, %110 : vector<128x128xf32>
      %112 = math.exp %111 : vector<128x128xf32>
      %cst_49 = arith.constant dense<0.000000e+00> : vector<128x1xf32>
      %113 = tpu.matmul %112, %17, %cst_49 {dimension_numbers = #tpu.dot_dimension_numbers<[1], [0], [0], [1], [0, 0, 1, 1], [], []>} : vector<128x128xf32>, vector<128x1xf32>, vector<128x1xf32> -> vector<128x1xf32>
      %114 = math.log %113 : vector<128x1xf32>
      %115 = arith.addf %109, %114 : vector<128x1xf32>
      %cst_50 = arith.constant 0xFF800000 : f32
      %116 = vector.broadcast %cst_50 : f32 to vector<128x1xf32>
      %117 = arith.select %107, %115, %116 : vector<128x1xi1>, vector<128x1xf32>
      %c0_i32_51 = arith.constant 0 : i32
      %118 = arith.subi %c0_i32_51, %arg7 : i32
      %119 = vector.broadcast %118 : i32 to vector<128x128xi32>
      %120 = arith.cmpi eq, %6, %119 : vector<128x128xi32>
      %121 = tpu.transpose %98, [1, 0] : vector<128x1xf32> -> vector<1x128xf32>
      %122 = vector.shape_cast %121 : vector<1x128xf32> to vector<1x128xf32>
      %123 = vector.broadcast %122 : vector<1x128xf32> to vector<128x128xf32>
      %124 = arith.select %120, %123, %42 : vector<128x128xi1>, vector<128x128xf32>
      %125 = vector.broadcast %arg7 : i32 to vector<128x128xi32>
      %126 = arith.cmpi eq, %6, %125 : vector<128x128xi32>
      %127 = vector.shape_cast %117 : vector<128x1xf32> to vector<128x1xf32>
      %128 = vector.broadcast %127 : vector<128x1xf32> to vector<128x128xf32>
      %129 = arith.select %126, %128, %124 : vector<128x128xi1>, vector<128x128xf32>
      %130 = vector.broadcast %arg7 : i32 to vector<128x128xi32>
      %131 = arith.cmpi eq, %6, %130 : vector<128x128xi32>
      %132 = vector.shape_cast %98 : vector<128x1xf32> to vector<128x1xf32>
      %133 = vector.broadcast %132 : vector<128x1xf32> to vector<128x128xf32>
      %134 = arith.select %131, %133, %79 : vector<128x128xi1>, vector<128x128xf32>
      %c0_i32_52 = arith.constant 0 : i32
      %135 = arith.subi %c0_i32_52, %arg7 : i32
      %136 = vector.broadcast %135 : i32 to vector<128x128xi32>
      %137 = arith.cmpi eq, %6, %136 : vector<128x128xi32>
      %138 = tpu.transpose %117, [1, 0] : vector<128x1xf32> -> vector<1x128xf32>
      %139 = vector.shape_cast %138 : vector<1x128xf32> to vector<1x128xf32>
      %140 = vector.broadcast %139 : vector<1x128xf32> to vector<128x128xf32>
      %141 = arith.select %137, %140, %134 : vector<128x128xi1>, vector<128x128xf32>
      %142 = arith.cmpi ne, %1, %arg7 : i32
      %c0_i32_53 = arith.constant 0 : i32
      %143 = vector.broadcast %c0_i32_53 : i32 to vector<128x128xi32>
      %144 = arith.cmpi eq, %4, %143 : vector<128x128xi32>
      %145 = vector.broadcast %arg7 : i32 to vector<128x128xi32>
      %146 = arith.cmpi eq, %5, %145 : vector<128x128xi32>
      %147 = arith.andi %144, %146 : vector<128x128xi1>
      %148 = vector.broadcast %142 : i1 to vector<128x128xi1>
      %149 = arith.andi %147, %148 : vector<128x128xi1>
      %cst_54 = arith.constant 0xFF800000 : f32
      %150 = vector.broadcast %cst_54 : f32 to vector<128x128xf32>
      %151 = arith.select %149, %150, %129 : vector<128x128xi1>, vector<128x128xf32>
      %152 = vector.broadcast %arg7 : i32 to vector<128x128xi32>
      %153 = arith.cmpi eq, %4, %152 : vector<128x128xi32>
      %c0_i32_55 = arith.constant 0 : i32
      %154 = vector.broadcast %c0_i32_55 : i32 to vector<128x128xi32>
      %155 = arith.cmpi eq, %5, %154 : vector<128x128xi32>
      %156 = arith.andi %153, %155 : vector<128x128xi1>
      %157 = vector.broadcast %142 : i1 to vector<128x128xi1>
      %158 = arith.andi %156, %157 : vector<128x128xi1>
      %cst_56 = arith.constant 0xFF800000 : f32
      %159 = vector.broadcast %cst_56 : f32 to vector<128x128xf32>
      %160 = arith.select %158, %159, %141 : vector<128x128xi1>, vector<128x128xf32>
      %c0_57 = arith.constant 0 : index
      %c0_58 = arith.constant 0 : index
      %161 = vector.load %arg4[%c0_57, %c0_58] : memref<256x128xf32, #tpu.memory_space<vmem>>, vector<128x128xf32>
      tpu.vector_store %arg4[%c0_57, %c0_58], %151 {strides = array<i32>} : memref<256x128xf32, #tpu.memory_space<vmem>>, vector<128x128xf32>,
      %c0_59 = arith.constant 0 : index
      %c0_60 = arith.constant 0 : index
      %162 = vector.load %arg5[%c0_59, %c0_60] : memref<256x128xf32, #tpu.memory_space<vmem>>, vector<128x128xf32>
      tpu.vector_store %arg5[%c0_59, %c0_60], %160 {strides = array<i32>} : memref<256x128xf32, #tpu.memory_space<vmem>>, vector<128x128xf32>,
    }
    %c0_13 = arith.constant 0 : index
    %c0_14 = arith.constant 0 : index
    %21 = vector.load %arg4[%c0_13, %c0_14] : memref<256x128xf32, #tpu.memory_space<vmem>>, vector<1x128xf32>
    %c0_15 = arith.constant 0 : index
    %c0_16 = arith.constant 0 : index
    %c0_17 = arith.constant 0 : index
    %22 = vector.load %arg3[%c0_15, %c0_16, %c0_17] : memref<1x1x128xf32, #tpu.memory_space<vmem>>, vector<1x1x128xf32>
    %23 = vector.shape_cast %22 : vector<1x1x128xf32> to vector<1x128xf32>
    %24 = vector.shape_cast %21 : vector<1x128xf32> to vector<1x1x128xf32>
    tpu.vector_store %arg3[%c0_15, %c0_16, %c0_17], %24 {strides = array<i32>} : memref<1x1x128xf32, #tpu.memory_space<vmem>>, vector<1x1x128xf32>,
    return
  }
  func.func @transform_0(%arg0: i32, %arg1: memref<2xi32, #tpu.memory_space<smem>>) -> (i32, i32, i32) {
    %c0_i32 = arith.constant 0 : i32
    %c0_i32_0 = arith.constant 0 : i32
    %c0_i32_1 = arith.constant 0 : i32
    return %arg0, %c0_i32, %c0_i32_0 : i32, i32, i32
  }
  func.func @transform_1(%arg0: i32, %arg1: memref<2xi32, #tpu.memory_space<smem>>) -> (i32, i32, i32) {
    %c0_i32 = arith.constant 0 : i32
    %c0_i32_0 = arith.constant 0 : i32
    %c0_i32_1 = arith.constant 0 : i32
    return %arg0, %c0_i32, %c0_i32_0 : i32, i32, i32
  }
}

</mosaic_0001>

<bundles_post_ra>
// kernel: tpu_custom_call.1
= control target key start
LH: loop header
LB: loop body
LE: loop exit
PB: predicated region body
PF: predicated region fallthrough
CT: control target
= control target key end

     0   :  { %s6024_s0 = inlined_call_operand.hbm [shape: s32[2], index: 0, kind: input, shape index: {}]   ;;  %s6025_s1 = inlined_call_operand.hbm [shape: f32[2,128,128], index: 1, kind: input, shape index: {}]   ;;  %s6026_s2 = inlined_call_operand.hbm [shape: f32[2,1,128], index: 2, kind: output, shape index: {}]  }
   0x1   :  { %s3169_s11 = scalar_lea.hbm %s6024_s0, 16 }
   0x2   :  { %p3170_p0 = scmp.ne.s32.totalorder %s6024_s0, %s3169_s11  ;;  %p3173_p1 = scmp.lt.u32.totalorder %s3169_s11, %s6024_s0 }
   0x4   :  { %p3175_p2 = pnand %p3173_p1, %p3170_p0 }
   0x6   :  { %3178 = shalt.err (!%p3175_p2)  }
   0x7   :  { %s3287_s16 = smov [#allocation6]  }
   0x8   :  { %8 = dma.hbm_to_smem %s6024_s0, 16, %s3287_s16, [#allocation5] }
   0x9   :  { %3257 = dma.done.wait [#allocation5], 16 }
   0xa   :  { %3258 = vsyncadd [#allocation5], 4294967280 }
   0xb   :  { %10 = sfence }
   0xc   :  { %11 = vsyncpa [#allocation8], 0 }
   0xd   :  { %13 = vsyncpa [#allocation8 + $0x1], 0 }
   0xe   :  { %14 = vsyncpa [#allocation9], 0 }
   0xf   :  { %16 = vsyncpa [#allocation9 + $0x1], 0  ;;  %s3323_s19 = smov 0   ;;  %s3325_s20 = smov 0  }
  0x10   :  { %s3327_s21 = smov 0   ;;  %s3329_s22 = smov 0  }
  0x11 LB: > { %s3344_s0 = sadd.s32 4294967295, %s3281_s22   ;;  %s2540_s23 = sadd.s32 4294967294, %s3281_s22   ;;  %s3281_s22 = sphi %s3329_s22, %s6740_s22   ;;  %s3277_s21 = sphi %s3327_s21, %s6739_s21   ;;  %s3273_s20 = sphi %s3325_s20, %s6738_s20   ;;  %s3269_s19 = sphi %s3323_s19, %s6737_s19  }
  0x12   : > { %s3348_s24 = sadd.s32 1, %s3281_s22   ;;  %s29_s25 = sadd.s32 1, %s3277_s21 }
  0x13   : > { %s26_s26 = ssub.s32 %s3281_s22, %s3348_s24  ;;  %p36_p3 = scmp.ne.s32.totalorder %s3277_s21, %s3273_s20 }
  0x14   : > { %p27_p4 = scmp.eq.s32.totalorder %s26_s26, 0  ;;  %p37_p5 = scmp.eq.s32.totalorder %s3281_s22, 0 }
  0x15   : > { %p42_p6 = scmp.ne.s32.totalorder %s3273_s20, %s3269_s19  ;;  %p43_p7 = scmp.eq.s32.totalorder %s3344_s0, 0 }
  0x16   : > { %s3360_s27 = scalar_select %p27_p4, %s3277_s21, %s29_s25  }
  0x17   : > { %p3362_p8 = por %p37_p5, %p36_p3  ;;  %p3366_p9 = por %p43_p7, %p42_p6 }
  0x18   : > { %p66_p10 = scmp.eq.s32.totalorder %s3344_s0, 1  ;;  %p72_p11 = scmp.eq.s32.totalorder %s2540_s23, 1 }
  0x19   : > { %p2894_p13 = scmp.lt.s32.totalorder %s3281_s22, 2  ;;  %s92_s4 = sand.u32 1, %s3277_s21  }
  0x1a   : > { %p3373_p0 = por %p66_p10, %p36_p3  ;;  %p3377_p1 = por %p72_p11, %p42_p6 }
  0x1b   : > { %s2553_s5 = sshll.u32 %s3281_s22, 11  ;;  %s2543_s6 = sshll.u32 %s92_s4, 7 }
  0x1c   : > { %s6224_s30 = scalar_select %p3373_p0, 1, 0 }
  0x1d   : > { %s6225_s3 = scalar_select %p3377_p1, 1, 0 }
  0x1e   : > { %s3386_s9 = scalar_lea.hbm %s6025_s1, %s2553_s5  ;;  %s96_s10 = scalar_lea.vmem [#allocation7], %s2543_s6 }
  0x1f   : > { %s103_s11 = sshll.u32 %s96_s10, 4  ;;  %p3390_p2 = pnand %p2894_p13, %p3362_p8  ;;  %s3394_s11 = int_to_ptr.vmem [resolvable:$true] %s103_s11 }
  0x20   : > { %s3396_s13 = scalar_lea.sflag [#allocation8], %s92_s4  ;;  %s3179_s14 = scalar_lea.hbm %s3386_s9, 2048 }
  0x21   : > { %p3180_p3 = scmp.ne.s32.totalorder %s3386_s9, %s3179_s14  ;;  %p3181_p4 = pneg %p3390_p2 }
  0x22   : > { %s3184_s17 = scalar_lea.hbm %s6025_s1, 4096  ;;  %p3185_p7 = scmp.lt.u32.totalorder %s3386_s9, %s6025_s1 }
  0x23   : > { %p3182_p5 = pnand %p3181_p4, %p3180_p3  ;;  %p3186_p8 = scmp.lt.u32.totalorder %s3184_s17, %s3179_s14 }
  0x24   : > { %p3188_p11 = scmp.lt.u32.totalorder %s3179_s14, %s3386_s9 }
  0x25   : > { %p3183_p6 = pneg %p3182_p5  ;;  %p3187_p10 = por %p3186_p8, %p3185_p7 }
  0x27   : > { %p3189_p13 = por %p3188_p11, %p3187_p10 }
  0x29   : > { %p3190_p12 = pnand %p3189_p13, %p3183_p6 }
  0x2b   : > { %3193 = shalt.err (!%p3190_p12)
}
  0x2c   : > { %s3194_s25 = scalar_lea.vmem %s3394_s11, 2048  ;;  %s3288_s26 = smov [#allocation7]  }
  0x2d   : > { %p3195_p3 = scmp.ne.s32.totalorder %s3394_s11, %s3194_s25  ;;  %s3199_s28 = sshll.u32 %s3288_s26, 4  ;;  %s3200_s28 = int_to_ptr.vmem [resolvable:$false] %s3199_s28 }
  0x2e   : > { %s3201_s4 = scalar_lea.vmem %s3200_s28, 4096  ;;  %p3202_p0 = scmp.lt.s32.totalorder %s3394_s11, %s3200_s28 }
  0x2f   : > { %p3197_p5 = pnand %p3195_p3, %p3181_p4  ;;  %p3203_p7 = scmp.lt.s32.totalorder %s3201_s4, %s3194_s25 }
  0x31   : > { %p3198_p1 = pneg %p3197_p5  ;;  %p3204_p8 = por %p3203_p7, %p3202_p0 }
  0x33   : > { %p3205_p10 = pnand %p3204_p8, %p3198_p1 }
  0x35   : > { %3208 = shalt.err (!%p3205_p10)
}
  0x36   : > { %s3289_s5 = smov 128   ;;  %s3290_s6 = smov 8  }
  0x37   : > { %2889 = dma.hbm_to_vmem [thread:$0]  (!%p3390_p2), %s3386_s9, 2048, %s3394_s11, %s3396_s13, %s3289_s5, %s3289_s5, %s3290_s6  }
  0x38   : > { %p2546_p12 = scmp.ge.s32.totalorder %s3281_s22, 1  ;;  %p111_p4 = scmp.lt.s32.totalorder %s3281_s22, 3 }
  0x3a   : > { %p112_p6 = pnand %p2546_p12, %p111_p4 }
  0x3c   : > { %115 = sbr.rel (%p112_p6) target bundleno = 1634 (0x662), region = 24 }
  0x43   : > { %s3427_s7 = sand.u32 1, %s3273_s20  }
  0x44   : > { %s2547_s8 = sshll.u32 %s3427_s7, 7  ;;  %s118_s10 = scalar_lea.sflag [#allocation8], %s3427_s7 }
  0x45   : > { %s3431_s14 = scalar_lea.vmem [#allocation7], %s2547_s8 }
  0x46   : > { %3260 = dma.done.wait (%p3366_p9), %s118_s10, 2048  }
  0x47   : > { %3262 = vsyncadd (%p3366_p9), %s118_s10, 4294965248  ;;  %v156_v0 = vlaneseq  ;;  %s3438_s9 = sld [smem:[#allocation6 + %s3344_s0]]  ;;  %v3291_v1 = vmov -inf   ;;  %v3545_v13 = vld [vmem:[%s3431_s14] sm:$0xff]  ;;  %v3548_v14 = vld [vmem:[%s3431_s14 + $0x8] sm:$0xff]  ;;  %s138_s11 = scalar_lea.vmem [#allocation10], %s3427_s7 }
  0x48   : > { %287 = vst [vmem:[#allocation2 + $0x80] sm:$0xff] %v3291_v1  ;;  %288 = vst [vmem:[#allocation2 + $0x88] sm:$0xff] %v3291_v1  ;;  %v3551_v15 = vld [vmem:[%s3431_s14 + $0x10] sm:$0xff]  ;;  %v3563_v19 = vld [vmem:[%s3431_s14 + $0x18] sm:$0xff] }
  0x49   : > { %289 = vst [vmem:[#allocation2 + $0x90] sm:$0xff] %v3291_v1  ;;  %290 = vst [vmem:[#allocation2 + $0x98] sm:$0xff] %v3291_v1  ;;  %v3505_v2 = vshrl.u32 %v156_v0, 7  ;;  %v3508_v3 = vand.u32 127, %v156_v0  ;;  %v3566_v20 = vld [vmem:[%s3431_s14 + $0x20] sm:$0xff]  ;;  %v3569_v21 = vld [vmem:[%s3431_s14 + $0x28] sm:$0xff] }
  0x4a   : > { %291 = vst [vmem:[#allocation2 + $0xa0] sm:$0xff] %v3291_v1  ;;  %292 = vst [vmem:[#allocation2 + $0xa8] sm:$0xff] %v3291_v1  ;;  %v3583_v25 = vld [vmem:[%s3431_s14 + $0x30] sm:$0xff]  ;;  %v3586_v26 = vld [vmem:[%s3431_s14 + $0x38] sm:$0xff] }
  0x4b   : > { %293 = vst [vmem:[#allocation2 + $0xb0] sm:$0xff] %v3291_v1  ;;  %294 = vst [vmem:[#allocation2 + $0xb8] sm:$0xff] %v3291_v1  ;;  %v3512_v4 = vsub.s32 %v3508_v3, %v3505_v2  ;;  %vm207_vm0 = vcmp.eq.s32.totalorder %v3505_v2, %v3508_v3  ;;  %v3517_v5 = vadd.s32 8, %v3505_v2  ;;  %v3520_v6 = vadd.s32 16, %v3505_v2  ;;  %v3589_v27 = vld [vmem:[%s3431_s14 + $0x40] sm:$0xff]  ;;  %v3601_v31 = vld [vmem:[%s3431_s14 + $0x48] sm:$0xff] }
  0x4c   : > { %295 = vst [vmem:[#allocation2 + $0xc0] sm:$0xff] %v3291_v1  ;;  %296 = vst [vmem:[#allocation2 + $0xc8] sm:$0xff] %v3291_v1  ;;  %v239_v7 = vsel %vm207_vm0, 0.0, %v3291_v1  ;;  %v3524_v8 = vadd.s32 24, %v3505_v2  ;;  %v3527_v9 = vadd.s32 32, %v3505_v2  ;;  %v3530_v10 = vadd.s32 40, %v3505_v2 }
  0x4d   : > { %297 = vst [vmem:[#allocation2 + $0xd0] sm:$0xff] %v3291_v1  ;;  %298 = vst [vmem:[#allocation2 + $0xd8] sm:$0xff] %v3291_v1  ;;  %v3534_v11 = vsub.s32 %v3508_v3, %v3517_v5  ;;  %vm208_vm1 = vcmp.eq.s32.totalorder %v3517_v5, %v3508_v3  ;;  %v3540_v12 = vsub.s32 %v3508_v3, %v3520_v6  ;;  %s367_s29 = sadd.s32 1, %s3438_s9  ;;  %v3595_v29 = vadd.s32 48, %v3505_v2  ;;  %v3604_v32 = vld [vmem:[%s3431_s14 + $0x50] sm:$0xff]  ;;  %v3607_v33 = vld [vmem:[%s3431_s14 + $0x58] sm:$0xff] }
  0x4e   : > { %299 = vst [vmem:[#allocation2 + $0xe0] sm:$0xff] %v3291_v1  ;;  %300 = vst [vmem:[#allocation2 + $0xe8] sm:$0xff] %v3291_v1  ;;  %vm209_vm2 = vcmp.eq.s32.totalorder %v3520_v6, %v3508_v3  ;;  %v240_v16 = vsel %vm208_vm1, 0.0, %v3291_v1  ;;  %v3558_v18 = vsub.s32 %v3508_v3, %v3524_v8  ;;  %vm210_vm3 = vcmp.eq.s32.totalorder %v3524_v8, %v3508_v3  ;;  %v3617_v37 = vld [vmem:[%s3431_s14 + $0x60] sm:$0xff]  ;;  %v3620_v38 = vld [vmem:[%s3431_s14 + $0x68] sm:$0xff]  ;;  %p2548_p9 = scmp.le.s32.totalorder %s367_s29, 1 }
  0x4f   : > { %301 = vst [vmem:[#allocation2 + $0xf0] sm:$0xff] %v3291_v1  ;;  %302 = vst [vmem:[#allocation2 + $0xf8] sm:$0xff] %v3291_v1  ;;  %v241_v17 = vsel %vm209_vm2, 0.0, %v3291_v1  ;;  %v242_v22 = vsel %vm210_vm3, 0.0, %v3291_v1  ;;  %v3574_v23 = vsub.s32 %v3508_v3, %v3527_v9  ;;  %vm211_vm4 = vcmp.eq.s32.totalorder %v3527_v9, %v3508_v3  ;;  %v3623_v39 = vld [vmem:[%s3431_s14 + $0x70] sm:$0xff]  ;;  %v3638_v42 = vld [vmem:[%s3431_s14 + $0x78] sm:$0xff] }
  0x50   : > { %319 = vst [vmem:[#allocation3 + $0x80] sm:$0xff] %v3291_v1  ;;  %320 = vst [vmem:[#allocation3 + $0x88] sm:$0xff] %v3291_v1  ;;  %v3580_v24 = vsub.s32 %v3508_v3, %v3530_v10  ;;  %v243_v28 = vsel %vm211_vm4, 0.0, %v3291_v1  ;;  %vm212_vm5 = vcmp.eq.s32.totalorder %v3530_v10, %v3508_v3  ;;  %v3598_v30 = vadd.s32 56, %v3505_v2  ;;  %s3719_s12 = smov (!%p2548_p9), 1  }
  0x51   : > { %321 = vst [vmem:[#allocation3 + $0x90] sm:$0xff] %v3291_v1  ;;  %322 = vst [vmem:[#allocation3 + $0x98] sm:$0xff] %v3291_v1  ;;  %v244_v34 = vsel %vm212_vm5, 0.0, %v3291_v1  ;;  %v3611_v35 = vadd.s32 64, %v3505_v2  ;;  %v3614_v36 = vadd.s32 72, %v3505_v2  ;;  %v3627_v40 = vsub.s32 %v3508_v3, %v3595_v29 }
  0x52   : > { %323 = vst [vmem:[#allocation3 + $0xa0] sm:$0xff] %v3291_v1  ;;  %324 = vst [vmem:[#allocation3 + $0xa8] sm:$0xff] %v3291_v1  ;;  %vm213_vm6 = vcmp.eq.s32.totalorder %v3595_v29, %v3508_v3  ;;  %v3633_v41 = vsub.s32 %v3508_v3, %v3598_v30  ;;  %vm214_vm7 = vcmp.eq.s32.totalorder %v3598_v30, %v3508_v3  ;;  %v3656_v48 = vadd.s32 80, %v3505_v2 }
  0x53   : > { %325 = vst [vmem:[#allocation3 + $0xb0] sm:$0xff] %v3291_v1  ;;  %326 = vst [vmem:[#allocation3 + $0xb8] sm:$0xff] %v3291_v1  ;;  %v245_v43 = vsel %vm213_vm6, 0.0, %v3291_v1  ;;  %v246_v44 = vsel %vm214_vm7, 0.0, %v3291_v1  ;;  %v3644_v45 = vsub.s32 %v3508_v3, %v3611_v35  ;;  %vm215_vm8 = vcmp.eq.s32.totalorder %v3611_v35, %v3508_v3 }
  0x54   : > { %327 = vst [vmem:[#allocation3 + $0xc0] sm:$0xff] %v3291_v1  ;;  %328 = vst [vmem:[#allocation3 + $0xc8] sm:$0xff] %v3291_v1  ;;  %v247_v46 = vsel %vm215_vm8, 0.0, %v3291_v1  ;;  %v3651_v47 = vsub.s32 %v3508_v3, %v3614_v36  ;;  %vm216_vm9 = vcmp.eq.s32.totalorder %v3614_v36, %v3508_v3  ;;  %v3660_v50 = vadd.s32 88, %v3505_v2 }
  0x55   : > { %329 = vst [vmem:[#allocation3 + $0xd0] sm:$0xff] %v3291_v1  ;;  %330 = vst [vmem:[#allocation3 + $0xd8] sm:$0xff] %v3291_v1  ;;  %v248_v49 = vsel %vm216_vm9, 0.0, %v3291_v1  ;;  %v3663_v51 = vadd.s32 96, %v3505_v2  ;;  %v3666_v52 = vadd.s32 104, %v3505_v2  ;;  %v3670_v53 = vsub.s32 %v3508_v3, %v3656_v48 }
  0x56   : > { %331 = vst [vmem:[#allocation3 + $0xe0] sm:$0xff] %v3291_v1  ;;  %332 = vst [vmem:[#allocation3 + $0xe8] sm:$0xff] %v3291_v1  ;;  %vm217_vm10 = vcmp.eq.s32.totalorder %v3656_v48, %v3508_v3  ;;  %v3675_v54 = vadd.s32 112, %v3505_v2  ;;  %v3678_v55 = vadd.s32 120, %v3505_v2  ;;  %v3683_v57 = vsub.s32 %v3508_v3, %v3660_v50 }
  0x57   : > { %333 = vst [vmem:[#allocation3 + $0xf0] sm:$0xff] %v3291_v1  ;;  %334 = vst [vmem:[#allocation3 + $0xf8] sm:$0xff] %v3291_v1  ;;  %v249_v56 = vsel %vm217_vm10, 0.0, %v3291_v1  ;;  %vm218_vm11 = vcmp.eq.s32.totalorder %v3660_v50, %v3508_v3  ;;  %v3689_v58 = vsub.s32 %v3508_v3, %v3663_v51  ;;  %vm219_vm12 = vcmp.eq.s32.totalorder %v3663_v51, %v3508_v3 }
  0x58   : > { %335 = vst [vmem:[#allocation4] sm:$0xff] %v3291_v1  ;;  %336 = vst [vmem:[#allocation4 + $0x8] sm:$0xff] %v3291_v1  ;;  %v250_v59 = vsel %vm218_vm11, 0.0, %v3291_v1  ;;  %v3696_v60 = vsub.s32 %v3508_v3, %v3666_v52  ;;  %vm220_vm13 = vcmp.eq.s32.totalorder %v3666_v52, %v3508_v3  ;;  %v251_v61 = vsel %vm219_vm12, 0.0, %v3291_v1 }
  0x59   : > { %337 = vst [vmem:[#allocation4 + $0x10] sm:$0xff] %v3291_v1  ;;  %338 = vst [vmem:[#allocation4 + $0x18] sm:$0xff] %v3291_v1  ;;  %v252_v62 = vsel %vm220_vm13, 0.0, %v3291_v1  ;;  %v3704_v63 = vsub.s32 %v3508_v3, %v3675_v54  ;;  %vm221_vm14 = vcmp.eq.s32.totalorder %v3675_v54, %v3508_v3  ;;  %vm222_vm15 = vcmp.eq.s32.totalorder %v3678_v55, %v3508_v3 }
  0x5a   : > { %339 = vst [vmem:[#allocation4 + $0x20] sm:$0xff] %v3291_v1  ;;  %340 = vst [vmem:[#allocation4 + $0x28] sm:$0xff] %v3291_v1  ;;  %v253_v0 = vsel %vm221_vm14, 0.0, %v3291_v1 }
  0x5b   : > { %341 = vst [vmem:[#allocation4 + $0x30] sm:$0xff] %v3291_v1  ;;  %342 = vst [vmem:[#allocation4 + $0x38] sm:$0xff] %v3291_v1 }
  0x5c   : > { %343 = vst [vmem:[#allocation4 + $0x40] sm:$0xff] %v3291_v1  ;;  %344 = vst [vmem:[#allocation4 + $0x48] sm:$0xff] %v3291_v1 }
  0x5d   : > { %345 = vst [vmem:[#allocation4 + $0x50] sm:$0xff] %v3291_v1  ;;  %346 = vst [vmem:[#allocation4 + $0x58] sm:$0xff] %v3291_v1 }
  0x5e   : > { %347 = vst [vmem:[#allocation4 + $0x60] sm:$0xff] %v3291_v1  ;;  %348 = vst [vmem:[#allocation4 + $0x68] sm:$0xff] %v3291_v1 }
  0x5f   : > { %349 = vst [vmem:[#allocation4 + $0x70] sm:$0xff] %v3291_v1  ;;  %350 = vst [vmem:[#allocation4 + $0x78] sm:$0xff] %v3291_v1 }
  0x60   : > { %351 = vst [vmem:[#allocation4 + $0x80] sm:$0xff] %v3291_v1  ;;  %352 = vst [vmem:[#allocation4 + $0x88] sm:$0xff] %v3291_v1 }
  0x61   : > { %353 = vst [vmem:[#allocation4 + $0x90] sm:$0xff] %v3291_v1  ;;  %354 = vst [vmem:[#allocation4 + $0x98] sm:$0xff] %v3291_v1 }
  0x62   : > { %355 = vst [vmem:[#allocation4 + $0xa0] sm:$0xff] %v3291_v1  ;;  %356 = vst [vmem:[#allocation4 + $0xa8] sm:$0xff] %v3291_v1 }
  0x63   : > { %357 = vst [vmem:[#allocation4 + $0xb0] sm:$0xff] %v3291_v1  ;;  %358 = vst [vmem:[#allocation4 + $0xb8] sm:$0xff] %v3291_v1 }
  0x64   : > { %359 = vst [vmem:[#allocation4 + $0xc0] sm:$0xff] %v3291_v1  ;;  %360 = vst [vmem:[#allocation4 + $0xc8] sm:$0xff] %v3291_v1 }
  0x65   : > { %361 = vst [vmem:[#allocation4 + $0xd0] sm:$0xff] %v3291_v1  ;;  %362 = vst [vmem:[#allocation4 + $0xd8] sm:$0xff] %v3291_v1 }
  0x66   : > { %363 = vst [vmem:[#allocation4 + $0xe0] sm:$0xff] %v3291_v1  ;;  %364 = vst [vmem:[#allocation4 + $0xe8] sm:$0xff] %v3291_v1 }
  0x67   : > { %365 = vst [vmem:[#allocation4 + $0xf0] sm:$0xff] %v3291_v1  ;;  %366 = vst [vmem:[#allocation4 + $0xf8] sm:$0xff] %v3291_v1 }
  0x68   : > { %6227 = vst [vmem:[#allocation14_spill] sm:$0xff] %v3505_v2  ;;  %6228 = vst [vmem:[#allocation15_spill] sm:$0xff] %v3508_v3 }
  0x69   : > { %6229 = vst [vmem:[#allocation16_spill] sm:$0xff] %v3512_v4  ;;  %6230 = vst [vmem:[#allocation17_spill] sm:$0xff] %v3517_v5 }
  0x6a   : > { %6231 = vst [vmem:[#allocation18_spill] sm:$0xff] %v3520_v6  ;;  %6232 = vst [vmem:[#allocation19_spill] sm:$0xff] %v3524_v8 }
  0x6b   : > { %6233 = vst [vmem:[#allocation20_spill] sm:$0xff] %v3527_v9  ;;  %6234 = vst [vmem:[#allocation21_spill] sm:$0xff] %v3530_v10 }
  0x6c   : > { %271 = vst [vmem:[#allocation2] sm:$0xff] %v239_v7  ;;  %303 = vst [vmem:[#allocation3] sm:$0xff] %v239_v7  ;;  %v3711_v7 = vsub.s32 %v3508_v3, %v3678_v55 }
  0x6d   : > { %6235 = vst [vmem:[#allocation22_spill] sm:$0xff] %v3534_v11  ;;  %6236 = vst [vmem:[#allocation23_spill] sm:$0xff] %v3540_v12 }
  0x6e   : > { %6237 = vst [vmem:[#allocation24_spill] sm:$0xff] %v3545_v13  ;;  %6238 = vst [vmem:[#allocation25_spill] sm:$0xff] %v3548_v14 }
  0x6f   : > { %6239 = vst [vmem:[#allocation26_spill] sm:$0xff] %v3551_v15  ;;  %6240 = vst [vmem:[#allocation27_spill] sm:$0xff] %v3558_v18 }
  0x70   : > { %6241 = vst [vmem:[#allocation28_spill] sm:$0xff] %v3563_v19  ;;  %6242 = vst [vmem:[#allocation29_spill] sm:$0xff] %v3566_v20 }
  0x71   : > { %6243 = vst [vmem:[#allocation30_spill] sm:$0xff] %v3569_v21  ;;  %272 = vst [vmem:[#allocation2 + $0x8] sm:$0xff] %v240_v16 }
  0x72   : > { %304 = vst [vmem:[#allocation3 + $0x8] sm:$0xff] %v240_v16  ;;  %273 = vst [vmem:[#allocation2 + $0x10] sm:$0xff] %v241_v17  ;;  %v254_v16 = vsel %vm222_vm15, 0.0, %v3291_v1 }
  0x73   : > { %305 = vst [vmem:[#allocation3 + $0x10] sm:$0xff] %v241_v17  ;;  %6244 = vst [vmem:[#allocation31_spill] sm:$0xff] %v3574_v23 }
  0x74   : > { %6245 = vst [vmem:[#allocation32_spill] sm:$0xff] %v3580_v24  ;;  %6246 = vst [vmem:[#allocation33_spill] sm:$0xff] %v3583_v25 }
  0x75   : > { %6247 = vst [vmem:[#allocation34_spill] sm:$0xff] %v3586_v26  ;;  %6248 = vst [vmem:[#allocation35_spill] sm:$0xff] %v3589_v27 }
  0x76   : > { %274 = vst [vmem:[#allocation2 + $0x18] sm:$0xff] %v242_v22  ;;  %306 = vst [vmem:[#allocation3 + $0x18] sm:$0xff] %v242_v22 }
  0x77   : > { %6249 = vst [vmem:[#allocation36_spill] sm:$0xff] %v3595_v29  ;;  %6250 = vst [vmem:[#allocation37_spill] sm:$0xff] %v3598_v30 }
  0x78   : > { %6251 = vst [vmem:[#allocation38_spill] sm:$0xff] %v3601_v31  ;;  %6252 = vst [vmem:[#allocation39_spill] sm:$0xff] %v3604_v32 }
  0x79   : > { %6253 = vst [vmem:[#allocation40_spill] sm:$0xff] %v3607_v33  ;;  %275 = vst [vmem:[#allocation2 + $0x20] sm:$0xff] %v243_v28 }
  0x7a   : > { %307 = vst [vmem:[#allocation3 + $0x20] sm:$0xff] %v243_v28  ;;  %6254 = vst [vmem:[#allocation41_spill] sm:$0xff] %v3611_v35 }
  0x7b   : > { %6255 = vst [vmem:[#allocation42_spill] sm:$0xff] %v3614_v36  ;;  %6256 = vst [vmem:[#allocation43_spill] sm:$0xff] %v3617_v37 }
  0x7c   : > { %6257 = vst [vmem:[#allocation44_spill] sm:$0xff] %v3620_v38  ;;  %6258 = vst [vmem:[#allocation45_spill] sm:$0xff] %v3623_v39 }
  0x7d   : > { %276 = vst [vmem:[#allocation2 + $0x28] sm:$0xff] %v244_v34  ;;  %308 = vst [vmem:[#allocation3 + $0x28] sm:$0xff] %v244_v34 }
  0x7e   : > { %6259 = vst [vmem:[#allocation46_spill] sm:$0xff] %v3627_v40  ;;  %6260 = vst [vmem:[#allocation47_spill] sm:$0xff] %v3633_v41 }
  0x7f   : > { %6261 = vst [vmem:[#allocation48_spill] sm:$0xff] %v3638_v42  ;;  %6262 = vst [vmem:[#allocation49_spill] sm:$0xff] %v3644_v45 }
  0x80   : > { %277 = vst [vmem:[#allocation2 + $0x30] sm:$0xff] %v245_v43  ;;  %309 = vst [vmem:[#allocation3 + $0x30] sm:$0xff] %v245_v43 }
  0x81   : > { %278 = vst [vmem:[#allocation2 + $0x38] sm:$0xff] %v246_v44  ;;  %310 = vst [vmem:[#allocation3 + $0x38] sm:$0xff] %v246_v44 }
  0x82   : > { %6263 = vst [vmem:[#allocation50_spill] sm:$0xff] %v3651_v47  ;;  %6264 = vst [vmem:[#allocation51_spill] sm:$0xff] %v3656_v48 }
  0x83   : > { %279 = vst [vmem:[#allocation2 + $0x40] sm:$0xff] %v247_v46  ;;  %311 = vst [vmem:[#allocation3 + $0x40] sm:$0xff] %v247_v46 }
  0x84   : > { %6265 = vst [vmem:[#allocation52_spill] sm:$0xff] %v3660_v50  ;;  %6266 = vst [vmem:[#allocation53_spill] sm:$0xff] %v3663_v51 }
  0x85   : > { %6267 = vst [vmem:[#allocation54_spill] sm:$0xff] %v3666_v52  ;;  %280 = vst [vmem:[#allocation2 + $0x48] sm:$0xff] %v248_v49 }
  0x86   : > { %312 = vst [vmem:[#allocation3 + $0x48] sm:$0xff] %v248_v49  ;;  %6268 = vst [vmem:[#allocation55_spill] sm:$0xff] %v3670_v53 }
  0x87   : > { %6269 = vst [vmem:[#allocation56_spill] sm:$0xff] %v3675_v54  ;;  %6270 = vst [vmem:[#allocation57_spill] sm:$0xff] %v3678_v55 }
  0x88   : > { %6271 = vst [vmem:[#allocation58_spill] sm:$0xff] %v3683_v57  ;;  %6272 = vst [vmem:[#allocation59_spill] sm:$0xff] %v3689_v58 }
  0x89   : > { %281 = vst [vmem:[#allocation2 + $0x50] sm:$0xff] %v249_v56  ;;  %313 = vst [vmem:[#allocation3 + $0x50] sm:$0xff] %v249_v56 }
  0x8a   : > { %6273 = vst [vmem:[#allocation60_spill] sm:$0xff] %v3696_v60  ;;  %282 = vst [vmem:[#allocation2 + $0x58] sm:$0xff] %v250_v59  ;;  %2513 = sbr.rel (%p2548_p9) target bundleno = 1609 (0x649), region = 73 }
  0x8b   : > { %314 = vst [vmem:[#allocation3 + $0x58] sm:$0xff] %v250_v59  ;;  %6274 = vst [vmem:[#allocation61_spill] sm:$0xff] %v3704_v63 }
  0x8c   : > { %283 = vst [vmem:[#allocation2 + $0x60] sm:$0xff] %v251_v61  ;;  %315 = vst [vmem:[#allocation3 + $0x60] sm:$0xff] %v251_v61 }
  0x8d   : > { %284 = vst [vmem:[#allocation2 + $0x68] sm:$0xff] %v252_v62  ;;  %316 = vst [vmem:[#allocation3 + $0x68] sm:$0xff] %v252_v62 }
  0x8e   : > { %6275 = vst [vmem:[#allocation62_spill] sm:$0xff] %v3711_v7  ;;  %285 = vst [vmem:[#allocation2 + $0x70] sm:$0xff] %v253_v0 }
  0x8f   : > { %317 = vst [vmem:[#allocation3 + $0x70] sm:$0xff] %v253_v0  ;;  %286 = vst [vmem:[#allocation2 + $0x78] sm:$0xff] %v254_v16 }
  0x90   : > { %318 = vst [vmem:[#allocation3 + $0x78] sm:$0xff] %v254_v16 }
  0x91 LB: >> { %v6276_v4 = vld [vmem:[#allocation16_spill] sm:$0xff]  ;;  %v6277_v11 = vld [vmem:[#allocation22_spill] sm:$0xff]  ;;  %v6278_v18 = vld [vmem:[#allocation27_spill] sm:$0xff]  ;;  %s3725_s13 = scalar_lea.vmem [#allocation2], %s3285_s12  ;;  %s3292_s15 = smov 127   ;;  %s3285_s12 = sphi %s3719_s12, %s371_s12  }
  0x92   : >> { %v6279_v12 = vld [vmem:[#allocation23_spill] sm:$0xff]  ;;  %v6280_v24 = vld [vmem:[#allocation32_spill] sm:$0xff]  ;;  %v6283_v40 = vld [vmem:[#allocation46_spill] sm:$0xff]  ;;  %v6028_v16 = vmov 1.0|1.0   ;;  %s2549_s16 = sadd.s32 4294967295, %s3285_s12  ;;  %p2285_p0 = scmp.ne.s32.totalorder %s3438_s9, %s3285_s12 }
  0x93   : >> { %v6281_v23 = vld [vmem:[#allocation31_spill] sm:$0xff]  ;;  %v6284_v45 = vld [vmem:[#allocation49_spill] sm:$0xff]  ;;  %v6285_v47 = vld [vmem:[#allocation50_spill] sm:$0xff]  ;;  %2818 = vmatprep.subr.bf16.mxu0 %v6028_v16  ;;  %2834 = vmatprep.subr.bf16.mxu1 %v6028_v16  ;;  %vm407_vm0 = vcmp.ge.s32.totalorder %v6276_v4, 0  ;;  %vm409_vm2 = vcmp.ge.s32.totalorder %v6279_v12, 0  ;;  %vm408_vm6 = vcmp.ge.s32.totalorder %v6277_v11, 0 }
  0x94   : >> { %v6282_v41 = vld [vmem:[#allocation47_spill] sm:$0xff]  ;;  %v6286_v57 = vld [vmem:[#allocation58_spill] sm:$0xff]  ;;  %v6290_v19 = vld [vmem:[#allocation28_spill] sm:$0xff]  ;;  %2819 = vmatpush3.bf16.msra.mxu0 %v6028_v16  ;;  %2835 = vmatpush3.bf16.msra.mxu1 %v6028_v16  ;;  %vm410_vm11 = vcmp.ge.s32.totalorder %v6278_v18, 0  ;;  %s1035_s17 = ssub.s32 0, %s3285_s12  ;;  %s4710_s18 = scalar_lea.vmem [#allocation3], %s3285_s12 }
  0x95   : >> { %v6287_v53 = vld [vmem:[#allocation55_spill] sm:$0xff]  ;;  %v6288_v21 = vld [vmem:[#allocation30_spill] sm:$0xff]  ;;  %v6292_v14 = vld [vmem:[#allocation25_spill] sm:$0xff]  ;;  %2820 = vmatprep.subr.bf16.mxu0 %v6028_v16  ;;  %2836 = vmatprep.subr.bf16.mxu1 %v6028_v16  ;;  %s4714_s23 = scalar_lea.vmem [#allocation4], %s3285_s12 }
  0x96   : >> { %v6289_v2 = vld [vmem:[#allocation14_spill] sm:$0xff]  ;;  %v6293_v13 = vld [vmem:[#allocation24_spill] sm:$0xff]  ;;  %v6294_v58 = vld [vmem:[#allocation59_spill] sm:$0xff]  ;;  %s2319_s25 = scalar_select %p2285_p0, 1, 0 }
  0x97   : >> { %v6291_v15 = vld [vmem:[#allocation26_spill] sm:$0xff]  ;;  %v6295_v60 = vld [vmem:[#allocation60_spill] sm:$0xff]  ;;  %v6296_v63 = vld [vmem:[#allocation61_spill] sm:$0xff] }
  0x98   : >> { %v6297_v7 = vld [vmem:[#allocation62_spill] sm:$0xff]  ;;  %v556_v17 = vld [vmem:[%s3725_s13 + $0x10] sm:$0xff]  ;;  %v557_v28 = vld [vmem:[%s3725_s13 + $0x18] sm:$0xff]  ;;  %2821 = vmatpush3.bf16.msra.mxu0 %v6028_v16  ;;  %2837 = vmatpush3.bf16.msra.mxu1 %v6028_v16 }
  0x99   : >> { %v554_v1 = vld [vmem:[%s3725_s13] sm:$0xff]  ;;  %590 = vrot.lane.b32.xlu1 %v556_v17, %s3292_s15  ;;  %v555_v22 = vld [vmem:[%s3725_s13 + $0x8] sm:$0xff]  ;;  %v560_v44 = vld [vmem:[%s3725_s13 + $0x30] sm:$0xff]  ;;  %2822 = vmatprep.subr.bf16.mxu0 %v6028_v16 }
  0x9a   : >> { %586 = vrot.lane.b32.xlu0 %v554_v1, %s3292_s15  ;;  %v558_v34 = vld [vmem:[%s3725_s13 + $0x20] sm:$0xff]  ;;  %v559_v43 = vld [vmem:[%s3725_s13 + $0x28] sm:$0xff]  ;;  %v561_v46 = vld [vmem:[%s3725_s13 + $0x38] sm:$0xff]  ;;  %2838 = vmatprep.subr.bf16.mxu1 %v6028_v16 }
  0x9b   : >> { %v562_v49 = vld [vmem:[%s3725_s13 + $0x40] sm:$0xff]  ;;  %v563_v56 = vld [vmem:[%s3725_s13 + $0x48] sm:$0xff]  ;;  %v564_v59 = vld [vmem:[%s3725_s13 + $0x50] sm:$0xff] }
  0x9c   : >> { %v565_v61 = vld [vmem:[%s3725_s13 + $0x58] sm:$0xff]  ;;  %v566_v62 = vld [vmem:[%s3725_s13 + $0x60] sm:$0xff]  ;;  %v567_v0 = vld [vmem:[%s3725_s13 + $0x68] sm:$0xff]  ;;  %2823 = vmatpush3.bf16.msra.mxu0 %v6028_v16  ;;  %2839 = vmatpush3.bf16.msra.mxu1 %v6028_v16 }
  0x9d   : >> { %592 = vrot.lane.b32.xlu1 %v557_v28, %s3292_s15  ;;  %v568_v1 = vld [vmem:[%s3725_s13 + $0x70] sm:$0xff]  ;;  %v569_v17 = vld [vmem:[%s3725_s13 + $0x78] sm:$0xff]  ;;  %2824 = vmatprep.subr.bf16.mxu0 %v6028_v16  ;;  %v3797_v28 = vstv %s2549_s16  ;;  %v6300_v6 = vld [vmem:[#allocation18_spill] sm:$0xff] }
  0x9e   : >> { %588 = vrot.lane.b32.xlu0 %v555_v22, %s3292_s15  ;;  %2840 = vmatprep.subr.bf16.mxu1 %v6028_v16  ;;  %v3795_v22 = vstv %s3285_s12  ;;  %vm425_vm1 = vcmp.le.s32.totalorder %v6276_v4, %v3797_v28  ;;  %vm427_vm3 = vcmp.le.s32.totalorder %v6279_v12, %v3797_v28  ;;  %v6302_v5 = vld [vmem:[#allocation17_spill] sm:$0xff]  ;;  %vm426_vm7 = vcmp.le.s32.totalorder %v6277_v11, %v3797_v28  ;;  %v6304_v8 = vld [vmem:[#allocation19_spill] sm:$0xff]  ;;  %v6309_v9 = vld [vmem:[#allocation20_spill] sm:$0xff]  ;;  %s371_s12 = sadd.s32 1, %s3285_s12  }
  0x9f   : >> { %6298 = vst [vmem:[#allocation63_spill] sm:$0xff] %v3795_v22  ;;  %vm441_vm5 = vmand %vm407_vm0, %vm425_vm1  ;;  %vm428_vm12 = vcmp.le.s32.totalorder %v6278_v18, %v3797_v28  ;;  %vm411_vm0 = vcmp.ge.s32.totalorder %v6281_v23, 0  ;;  %vm429_vm1 = vcmp.le.s32.totalorder %v6281_v23, %v3797_v28  ;;  %v6316_v10 = vld [vmem:[#allocation21_spill] sm:$0xff]  ;;  %v6321_v29 = vld [vmem:[#allocation36_spill] sm:$0xff]  ;;  %p370_p1 = scmp.ge.s32.totalorder %s371_s12, %s367_s29 }
  0xa0   : >> { %2825 = vmatpush3.bf16.msra.mxu0 %v6028_v16  ;;  %2841 = vmatpush3.bf16.msra.mxu1 %v6028_v16  ;;  %vm443_vm9 = vmand %vm409_vm2, %vm427_vm3  ;;  %v6328_v30 = vld [vmem:[#allocation37_spill] sm:$0xff]  ;;  %v6340_v36 = vld [vmem:[#allocation42_spill] sm:$0xff] }
  0xa1   : >> { %596 = vrot.lane.b32.xlu1 %v559_v43, %s3292_s15  ;;  %2826 = vmatprep.subr.bf16.mxu0 %v6028_v16  ;;  %v3808_v43 = vadd.s32 %v3795_v22, %v6300_v6  ;;  %vm442_vm14 = vmand %vm408_vm6, %vm426_vm7  ;;  %v6311_v6 = vmov 0  ;;  %vm412_vm6 = vcmp.ge.s32.totalorder %v6280_v24, 0  ;;  %vm430_vm7 = vcmp.le.s32.totalorder %v6280_v24, %v3797_v28  ;;  %v6333_v35 = vld [vmem:[#allocation41_spill] sm:$0xff]  ;;  %v6347_v48 = vld [vmem:[#allocation51_spill] sm:$0xff] }
  0xa2   : >> { %594 = vrot.lane.b32.xlu0 %v558_v34, %s3292_s15  ;;  %2842 = vmatprep.subr.bf16.mxu1 %v6028_v16  ;;  %v3801_v34 = vadd.s32 %v3795_v22, %v6289_v2  ;;  %vm3854_vm3 = vmand %vm410_vm11, %vm428_vm12  ;;  %v6354_v50 = vld [vmem:[#allocation52_spill] sm:$0xff]  ;;  %v6360_v51 = vld [vmem:[#allocation53_spill] sm:$0xff] }
  0xa3   : >> { %6301 = vst [vmem:[#allocation65_spill] sm:$0xff] %v3808_v43  ;;  %vm6040_vm8 = vcmp.le.s32.totalorder %v3808_v43, 127  ;;  %vm445_vm11 = vmand %vm411_vm0, %vm429_vm1  ;;  %v6367_v52 = vld [vmem:[#allocation54_spill] sm:$0xff]  ;;  %v6375_v54 = vld [vmem:[#allocation56_spill] sm:$0xff] }
  0xa4   : >> { %2827 = vmatpush3.bf16.msra.mxu0 %v6028_v16  ;;  %2843 = vmatpush3.bf16.msra.mxu1 %v6028_v16  ;;  %6299 = vst [vmem:[#allocation64_spill] sm:$0xff] %v3801_v34  ;;  %vm6050_vm4 = vcmp.le.s32.totalorder %v3801_v34, 127  ;;  %vm3842_vm15 = vmand %vm443_vm9, %vm6040_vm8  ;;  %vm431_vm8 = vcmp.le.s32.totalorder %v6283_v40, %v3797_v28  ;;  %v6383_v55 = vld [vmem:[#allocation57_spill] sm:$0xff] }
  0xa5   : >> { %600 = vrot.lane.b32.xlu1 %v561_v46, %s3292_s15  ;;  %2828 = vmatprep.subr.bf16.mxu0 %v6028_v16  ;;  %v537_v46 = vld [vmem:[#allocation2] sm:$0xff]  ;;  %vm3828_vm10 = vmand %vm441_vm5, %vm6050_vm4  ;;  %v6312_v6 = vsel %vm3842_vm15, 4294967295, %v6311_v6  ;;  %vm433_vm4 = vcmp.le.s32.totalorder %v6284_v45, %v3797_v28 }
  0xa6   : >> { %598 = vrot.lane.b32.xlu0 %v560_v44, %s3292_s15  ;;  %2844 = vmatprep.subr.bf16.mxu1 %v6028_v16  ;;  %v3816_v44 = vadd.s32 %v3795_v22, %v6302_v5  ;;  %6313 = vst [vmem:[#allocation70_spill] sm:$0xff] %v6312_v6  ;;  %v6318_v5 = vmov 0  ;;  %vm3902_vm1 = vmand %vm412_vm6, %vm430_vm7  ;;  %vm414_vm6 = vcmp.ge.s32.totalorder %v6282_v41, 0  ;;  %vm432_vm7 = vcmp.le.s32.totalorder %v6282_v41, %v3797_v28 }
  0xa8   : >> { %2829 = vmatpush3.bf16.msra.mxu0 %v6028_v16  ;;  %2845 = vmatpush3.bf16.msra.mxu1 %v6028_v16  ;;  %6303 = vst [vmem:[#allocation66_spill] sm:$0xff] %v3816_v44  ;;  %vm6049_vm13 = vcmp.le.s32.totalorder %v3816_v44, 127  ;;  %v542_v44 = vld [vmem:[#allocation2 + $0x28] sm:$0xff] }
  0xa9   : >> { %604 = vrot.lane.b32.xlu1 %v563_v56, %s3292_s15  ;;  %2830 = vmatprep.subr.bf16.mxu0 %v6028_v16  ;;  %v3824_v56 = vadd.s32 %v3795_v22, %v6304_v8  ;;  %v540_v8 = vld [vmem:[#allocation2 + $0x18] sm:$0xff]  ;;  %vm3865_vm5 = vmand %vm442_vm14, %vm6049_vm13  ;;  %vm413_vm14 = vcmp.ge.s32.totalorder %v6283_v40, 0  ;;  %vm415_vm13 = vcmp.ge.s32.totalorder %v6284_v45, 0 }
  0xaa   : >> { %602 = vrot.lane.b32.xlu0 %v562_v49, %s3292_s15  ;;  %2846 = vmatprep.subr.bf16.mxu1 %v6028_v16  ;;  %v539_v49 = vld [vmem:[#allocation2 + $0x10] sm:$0xff]  ;;  %v6319_v5 = vsel %vm3865_vm5, 4294967295, %v6318_v5 }
  0xab   : >> { %6305 = vst [vmem:[#allocation67_spill] sm:$0xff] %v3824_v56  ;;  %vm6048_vm2 = vcmp.le.s32.totalorder %v3824_v56, 127  ;;  %6320 = vst [vmem:[#allocation72_spill] sm:$0xff] %v6319_v5  ;;  %v3920_v56 = vadd.s32 %v3795_v22, %v6333_v35  ;;  %v543_v35 = vld [vmem:[#allocation2 + $0x30] sm:$0xff]  ;;  %v545_v5 = vld [vmem:[#allocation2 + $0x40] sm:$0xff] }
  0xac   : >> { %2831 = vmatpush3.bf16.msra.mxu0 %v6028_v16  ;;  %2847 = vmatpush3.bf16.msra.mxu1 %v6028_v16  ;;  %vm3890_vm12 = vmand %vm3854_vm3, %vm6048_vm2 }
  0xad   : >> { %608 = vrot.lane.b32.xlu1 %v565_v61, %s3292_s15  ;;  %2832 = vmatprep.subr.bf16.mxu0 %v6028_v16  ;;  %6334 = vst [vmem:[#allocation77_spill] sm:$0xff] %v3920_v56 }
  0xae   : >> { %606 = vrot.lane.b32.xlu0 %v564_v59, %s3292_s15  ;;  %2848 = vmatprep.subr.bf16.mxu1 %v6028_v16 }
  0xb0   : >> { %2833 = vmatpush3.bf16.msra.mxu0 %v6028_v16  ;;  %2849 = vmatpush3.bf16.msra.mxu1 %v6028_v16 }
  0xb1   : >> { %612 = vrot.lane.b32.xlu1 %v567_v0, %s3292_s15  ;;  %2850 = vmatprep.subr.bf16.mxu0 %v6028_v16 }
  0xb2   : >> { %610 = vrot.lane.b32.xlu0 %v566_v62, %s3292_s15  ;;  %2866 = vmatprep.subr.bf16.mxu1 %v6028_v16  ;;  %v6306_v62 = vmov 0  ;;  %v538_v16 = vld [vmem:[#allocation2 + $0x8] sm:$0xff] }
  0xb3   : >> { %v6307_v62 = vsel %vm3828_vm10, 4294967295, %v6306_v62 }
  0xb4   : >> { %6308 = vst [vmem:[#allocation68_spill] sm:$0xff] %v6307_v62 }
  0xb5   : >> { %616 = vrot.lane.b32.xlu1 %v569_v17, %s3292_s15  ;;  %v3838_v17 = vadd.s32 %v3795_v22, %v6309_v9 }
  0xb6   : >> { %614 = vrot.lane.b32.xlu0 %v568_v1, %s3292_s15 }
  0xb7   : >> { %6310 = vst [vmem:[#allocation69_spill] sm:$0xff] %v3838_v17  ;;  %vm6045_vm9 = vcmp.le.s32.totalorder %v3838_v17, 127  ;;  %v544_v17 = vld [vmem:[#allocation2 + $0x38] sm:$0xff] }
  0xb8   : >> { %vm3914_vm3 = vmand %vm445_vm11, %vm6045_vm9 }
  0xb9   : >> { %vm447_vm9 = vmand %vm413_vm14, %vm431_vm8 }
  0xba   : >> { %vm3951_vm14 = vmand %vm414_vm6, %vm432_vm7  ;;  %vm416_vm7 = vcmp.ge.s32.totalorder %v6285_v47, 0  ;;  %vm417_vm6 = vcmp.ge.s32.totalorder %v6287_v53, 0 }
 0x10b   : >> { %v591_v61 = vpop.permute.xlu1 %590 }
 0x10c   : >> { %v587_v59 = vpop.permute.xlu0 %586  ;;  %v636_v1 = vadd.f32 %v591_v61, %v539_v49 }
 0x10d   : >> { %v634_v0 = vadd.f32 %v587_v59, %v537_v46  ;;  %v3860_v59 = vadd.s32 %v3795_v22, %v6316_v10 }
 0x10e   : >> { %v3878_v43 = vsel %vm3842_vm15, %v636_v1, -inf  ;;  %v3908_v1 = vadd.s32 %v3795_v22, %v6328_v30 }
 0x10f   : >> { %v3851_v46 = vsel %vm3828_vm10, %v634_v0, -inf  ;;  %6317 = vst [vmem:[#allocation71_spill] sm:$0xff] %v3860_v59  ;;  %v593_v9 = vpop.permute.xlu1 %592  ;;  %v3871_v0 = vadd.s32 %v3795_v22, %v6321_v29  ;;  %v541_v29 = vld [vmem:[#allocation2 + $0x20] sm:$0xff]  ;;  %vm6051_vm0 = vcmp.le.s32.totalorder %v3860_v59, 127 }
 0x110   : >> { %v589_v61 = vpop.permute.xlu0 %588  ;;  %666 = vmax.xlane.f32.xlu0 %v3851_v46  ;;  %v637_v3 = vadd.f32 %v593_v9, %v540_v8  ;;  %v6323_v8 = vmov 0  ;;  %6329 = vst [vmem:[#allocation75_spill] sm:$0xff] %v3908_v1  ;;  %vm3939_vm2 = vmand %vm3902_vm1, %vm6051_vm0  ;;  %vm6062_vm8 = vcmp.le.s32.totalorder %v3908_v1, 127  ;;  %vm434_vm0 = vcmp.le.s32.totalorder %v6285_v47, %v3797_v28 }
 0x111   : >> { %6322 = vst [vmem:[#allocation73_spill] sm:$0xff] %v3871_v0  ;;  %v635_v10 = vadd.f32 %v589_v61, %v538_v16  ;;  %v6324_v8 = vsel %vm3890_vm12, 4294967295, %v6323_v8  ;;  %vm6059_vm11 = vcmp.le.s32.totalorder %v3871_v0, 127  ;;  %v3957_v16 = vadd.s32 %v3795_v22, %v6340_v36  ;;  %v547_v0 = vld [vmem:[#allocation2 + $0x50] sm:$0xff] }
 0x112   : >> { %6325 = vst [vmem:[#allocation74_spill] sm:$0xff] %v6324_v8  ;;  %v3927_v6 = vsel %vm3890_vm12, %v637_v3, -inf  ;;  %vm3963_vm1 = vmand %vm447_vm9, %vm6059_vm11  ;;  %v3986_v8 = vadd.s32 %v3795_v22, %v6347_v48  ;;  %v4024_v1 = vadd.s32 %v3795_v22, %v6360_v51  ;;  %v548_v51 = vld [vmem:[#allocation2 + $0x58] sm:$0xff] }
 0x113   : >> { %v3899_v9 = vsel %vm3865_vm5, %v635_v10, -inf  ;;  %v597_v61 = vpop.permute.xlu1 %596  ;;  %v6330_v10 = vmov 0  ;;  %6341 = vst [vmem:[#allocation79_spill] sm:$0xff] %v3957_v16  ;;  %vm3980_vm9 = vmand %vm415_vm13, %vm433_vm4  ;;  %vm435_vm4 = vcmp.le.s32.totalorder %v6287_v53, %v3797_v28  ;;  %vm6071_vm13 = vcmp.le.s32.totalorder %v3957_v16, 127 }
 0x114   : >> { %v595_v49 = vpop.permute.xlu0 %594  ;;  %668 = vmax.xlane.f32.xlu1 %v3899_v9  ;;  %670 = vmax.xlane.f32.xlu0 %v3878_v43  ;;  %v6331_v10 = vsel %vm3914_vm3, 4294967295, %v6330_v10  ;;  %v639_v34 = vadd.f32 %v597_v61, %v542_v44  ;;  %6348 = vst [vmem:[#allocation81_spill] sm:$0xff] %v3986_v8  ;;  %vm3992_vm11 = vmand %vm3951_vm14, %vm6062_vm8  ;;  %v4010_v44 = vadd.s32 %v3795_v22, %v6354_v50  ;;  %vm6356_vm14 = vcmp.le.s32.totalorder %v3920_v56, 127 }
 0x115   : >> { %6332 = vst [vmem:[#allocation76_spill] sm:$0xff] %v6331_v10  ;;  %v638_v30 = vadd.f32 %v595_v49, %v541_v29  ;;  %v6335_v29 = vmov 0  ;;  %vm4018_vm8 = vmand %vm3980_vm9, %vm6356_vm14  ;;  %vm437_vm9 = vcmp.le.s32.totalorder %v6294_v58, %v3797_v28 }
 0x116   : >> { %v6336_v29 = vsel %vm3939_vm2, 4294967295, %v6335_v29  ;;  %v3973_v10 = vsel %vm3939_vm2, %v639_v34, -inf  ;;  %v6349_v34 = vmov 0  ;;  %vm4004_vm2 = vmand %vm416_vm7, %vm434_vm0  ;;  %6355 = vst [vmem:[#allocation83_spill] sm:$0xff] %v4010_v44  ;;  %vm418_vm0 = vcmp.ge.s32.totalorder %v6286_v57, 0 }
 0x117   : >> { %6337 = vst [vmem:[#allocation78_spill] sm:$0xff] %v6336_v29  ;;  %v3948_v3 = vsel %vm3914_vm3, %v638_v30, -inf  ;;  %v601_v61 = vpop.permute.xlu1 %600  ;;  %v6342_v30 = vmov 0  ;;  %v6350_v34 = vsel %vm3992_vm11, 4294967295, %v6349_v34  ;;  %6361 = vst [vmem:[#allocation85_spill] sm:$0xff] %v4024_v1  ;;  %vm436_vm7 = vcmp.le.s32.totalorder %v6286_v57, %v3797_v28  ;;  %v549_v29 = vld [vmem:[#allocation2 + $0x60] sm:$0xff] }
 0x118   : >> { %v599_v49 = vpop.permute.xlu0 %598  ;;  %674 = vmax.xlane.f32.xlu1 %v3948_v3  ;;  %672 = vmax.xlane.f32.xlu0 %v3927_v6  ;;  %v6343_v30 = vsel %vm3963_vm1, 4294967295, %v6342_v30  ;;  %v641_v59 = vadd.f32 %v601_v61, %v544_v17  ;;  %6351 = vst [vmem:[#allocation82_spill] sm:$0xff] %v6350_v34  ;;  %vm451_vm14 = vmand %vm417_vm6, %vm435_vm4  ;;  %vm438_vm6 = vcmp.le.s32.totalorder %v6295_v60, %v3797_v28 }
 0x119   : >> { %6344 = vst [vmem:[#allocation80_spill] sm:$0xff] %v6343_v30  ;;  %v640_v36 = vadd.f32 %v599_v49, %v543_v35  ;;  %v546_v35 = vld [vmem:[#allocation2 + $0x48] sm:$0xff]  ;;  %vm4055_vm4 = vmand %vm418_vm0, %vm436_vm7  ;;  %vm420_vm7 = vcmp.ge.s32.totalorder %v6295_v60, 0  ;;  %v4090_v34 = vadd.s32 %v3795_v22, %v6375_v54 }
 0x11a   : >> { %v4031_v56 = vsel %vm3992_vm11, %v641_v59, -inf  ;;  %vm419_vm11 = vcmp.ge.s32.totalorder %v6294_v58, 0  ;;  %v4114_v59 = vadd.s32 %v3795_v22, %v6383_v55 }
 0x11b   : >> { %v4001_v17 = vsel %vm3963_vm1, %v640_v36, -inf  ;;  %v605_v48 = vpop.permute.xlu1 %604  ;;  %v6357_v36 = vmov 0  ;;  %vm4043_vm1 = vmand %vm4004_vm2, %vm6071_vm13  ;;  %vm6369_vm2 = vcmp.le.s32.totalorder %v3986_v8, 127  ;;  %6376 = vst [vmem:[#allocation89_spill] sm:$0xff] %v4090_v34  ;;  %v551_v8 = vld [vmem:[#allocation2 + $0x70] sm:$0xff] }
 0x11c   : >> { %v603_v61 = vpop.permute.xlu0 %602  ;;  %678 = vmax.xlane.f32.xlu1 %v4001_v17  ;;  %676 = vmax.xlane.f32.xlu0 %v3973_v10  ;;  %v6358_v36 = vsel %vm4018_vm8, 4294967295, %v6357_v36  ;;  %v643_v30 = vadd.f32 %v605_v48, %v546_v35  ;;  %v4061_v35 = vadd.s32 %v3795_v22, %v6367_v52  ;;  %vm4067_vm13 = vmand %vm451_vm14, %vm6369_vm2  ;;  %vm6377_vm2 = vcmp.le.s32.totalorder %v4010_v44, 127  ;;  %6384 = vst [vmem:[#allocation91_spill] sm:$0xff] %v4114_v59 }
 0x11d   : >> { %6359 = vst [vmem:[#allocation84_spill] sm:$0xff] %v6358_v36  ;;  %v642_v50 = vadd.f32 %v603_v61, %v545_v5  ;;  %v6362_v5 = vmov 0  ;;  %vm4084_vm14 = vmand %vm419_vm11, %vm437_vm9  ;;  %vm439_vm11 = vcmp.le.s32.totalorder %v6296_v63, %v3797_v28  ;;  %vm6098_vm9 = vcmp.le.s32.totalorder %v4114_v59, 127 }
 0x11e   : >> { %v6363_v5 = vsel %vm4043_vm1, 4294967295, %v6362_v5  ;;  %6368 = vst [vmem:[#allocation87_spill] sm:$0xff] %v4061_v35  ;;  %v4077_v36 = vsel %vm4043_vm1, %v643_v30, -inf  ;;  %vm4096_vm0 = vmand %vm4055_vm4, %vm6377_vm2  ;;  %vm421_vm1 = vcmp.ge.s32.totalorder %v6296_v63, 0  ;;  %vm6385_vm4 = vcmp.le.s32.totalorder %v4024_v1, 127  ;;  %v552_v1 = vld [vmem:[#allocation2 + $0x78] sm:$0xff] }
 0x11f   : >> { %6364 = vst [vmem:[#allocation86_spill] sm:$0xff] %v6363_v5  ;;  %v4052_v48 = vsel %vm4018_vm8, %v642_v50, -inf  ;;  %v609_v61 = vpop.permute.xlu1 %608  ;;  %v6370_v50 = vmov 0  ;;  %vm4108_vm8 = vmand %vm420_vm7, %vm438_vm6  ;;  %vm422_vm6 = vcmp.ge.s32.totalorder %v6297_v7, 0  ;;  %vm440_vm7 = vcmp.le.s32.totalorder %v6297_v7, %v3797_v28 }
 0x120   : >> { %v607_v49 = vpop.permute.xlu0 %606  ;;  %682 = vmax.xlane.f32.xlu1 %v4052_v48  ;;  %680 = vmax.xlane.f32.xlu0 %v4031_v56  ;;  %v6371_v50 = vsel %vm4067_vm13, 4294967295, %v6370_v50  ;;  %v645_v16 = vadd.f32 %v609_v61, %v548_v51  ;;  %v6378_v51 = vmov 0  ;;  %vm4122_vm2 = vmand %vm4084_vm14, %vm6385_vm4  ;;  %vm6389_vm4 = vcmp.le.s32.totalorder %v4061_v35, 127 }
 0x121   : >> { %6372 = vst [vmem:[#allocation88_spill] sm:$0xff] %v6371_v50  ;;  %v644_v52 = vadd.f32 %v607_v49, %v547_v0  ;;  %v550_v0 = vld [vmem:[#allocation2 + $0x68] sm:$0xff]  ;;  %v6379_v51 = vsel %vm4096_vm0, 4294967295, %v6378_v51  ;;  %vm455_vm14 = vmand %vm421_vm1, %vm439_vm11  ;;  %vm6393_vm1 = vcmp.le.s32.totalorder %v4090_v34, 127 }
 0x122   : >> { %6380 = vst [vmem:[#allocation90_spill] sm:$0xff] %v6379_v51  ;;  %v4131_v50 = vsel %vm4096_vm0, %v645_v16, -inf  ;;  %vm456_vm0 = vmand %vm422_vm6, %vm440_vm7 }
 0x123   : >> { %v4105_v30 = vsel %vm4067_vm13, %v644_v52, -inf  ;;  %v613_v54 = vpop.permute.xlu1 %612  ;;  %v6386_v52 = vmov 0  ;;  %vm4143_vm13 = vmand %vm4108_vm8, %vm6389_vm4 }
 0x124   : >> { %v611_v61 = vpop.permute.xlu0 %610  ;;  %686 = vmax.xlane.f32.xlu1 %v4105_v30  ;;  %684 = vmax.xlane.f32.xlu0 %v4077_v36  ;;  %v6387_v52 = vsel %vm4122_vm2, 4294967295, %v6386_v52  ;;  %v647_v44 = vadd.f32 %v613_v54, %v550_v0  ;;  %v6390_v54 = vmov 0  ;;  %vm4156_vm11 = vmand %vm455_vm14, %vm6393_vm1  ;;  %v6394_v0 = vmov 0 }
 0x125   : >> { %6388 = vst [vmem:[#allocation92_spill] sm:$0xff] %v6387_v52  ;;  %v646_v55 = vadd.f32 %v611_v61, %v549_v29  ;;  %v6391_v54 = vsel %vm4143_vm13, 4294967295, %v6390_v54  ;;  %v6395_v0 = vsel %vm4156_vm11, 4294967295, %v6394_v0  ;;  %vm4166_vm8 = vmand %vm456_vm0, %vm6098_vm9  ;;  %v6397_v52 = vmov 0 }
 0x126   : >> { %6392 = vst [vmem:[#allocation93_spill] sm:$0xff] %v6391_v54  ;;  %6396 = vst [vmem:[#allocation94_spill] sm:$0xff] %v6395_v0  ;;  %v6398_v52 = vsel %vm4166_vm8, 4294967295, %v6397_v52 }
 0x127   : >> { %v4149_v29 = vsel %vm4122_vm2, %v646_v55, -inf  ;;  %v617_v16 = vpop.permute.xlu1 %616  ;;  %v4162_v55 = vsel %vm4143_vm13, %v647_v44, -inf  ;;  %6399 = vst [vmem:[#allocation95_spill] sm:$0xff] %v6398_v52 }
 0x128   : >> { %v615_v28 = vpop.permute.xlu0 %614  ;;  %690 = vmax.xlane.f32.xlu1 %v4149_v29  ;;  %688 = vmax.xlane.f32.xlu0 %v4131_v50  ;;  %v649_v61 = vadd.f32 %v617_v16, %v552_v1 }
 0x129   : >> { %v648_v49 = vadd.f32 %v615_v28, %v551_v8 }
 0x12a   : >> { %v4178_v1 = vsel %vm4166_vm8, %v649_v61, -inf }
 0x12b   : >> { %v4172_v51 = vsel %vm4156_vm11, %v648_v49, -inf }
 0x12c   : >> { %694 = vmax.xlane.f32.xlu1 %v4172_v51  ;;  %692 = vmax.xlane.f32.xlu0 %v4162_v55 }
 0x130   : >> { %696 = vmax.xlane.f32.xlu0 %v4178_v1 }
 0x19d   : >> { %v4181_v44 = vpop.xlane.xlu0 %666 }
 0x19e   : >> { %vm698_vm0 = vcmp.gt.f32.partialorder %v4181_v44, -inf }
 0x19f   : >> { %v4187_v8 = vsel %vm698_vm0, %v4181_v44, 0.0 }
 0x1a0   : >> { %v730_v28 = vsub.f32 %v3851_v46, %v4187_v8 }
 0x1a1   : >> { %v4191_v16 = vpop.xlane.xlu1 %668  ;;  %v4193_v49 = vpop.xlane.xlu0 %670 }
 0x1a2   : >> { %vm699_vm6 = vcmp.gt.f32.partialorder %v4191_v16, -inf  ;;  %vm700_vm7 = vcmp.gt.f32.partialorder %v4193_v49, -inf  ;;  %v746_v61 = vmul.f32 1.442695, %v730_v28 }
 0x1a3   : >> { %v4200_v52 = vsel %vm699_vm6, %v4191_v16, 0.0  ;;  %v4205_v54 = vsel %vm700_vm7, %v4193_v49, 0.0 }
 0x1a4   : >> { %v731_v46 = vsub.f32 %v3899_v9, %v4200_v52  ;;  %v732_v5 = vsub.f32 %v3878_v43, %v4205_v54  ;;  %2945 = vpow2.f32 %v746_v61 }
 0x1a5   : >> { %v4211_v59 = vpop.xlane.xlu1 %674  ;;  %v4213_v28 = vpop.xlane.xlu0 %672 }
 0x1a6   : >> { %v748_v34 = vmul.f32 1.442695, %v731_v46  ;;  %v750_v35 = vmul.f32 1.442695, %v732_v5  ;;  %vm6103_vm14 = vcmp.gt.f32.partialorder %v4211_v59, -inf  ;;  %vm701_vm4 = vcmp.gt.f32.partialorder %v4213_v28, -inf }
 0x1a7   : >> { %v4220_v62 = vsel %vm6103_vm14, %v4211_v59, 0.0  ;;  %v4225_v43 = vsel %vm701_vm4, %v4213_v28, 0.0 }
 0x1a8   : >> { %2947 = vpow2.f32 %v748_v34  ;;  %v734_v9 = vsub.f32 %v3948_v3, %v4220_v62  ;;  %v733_v5 = vsub.f32 %v3927_v6, %v4225_v43 }
 0x1a9   : >> { %2949 = vpow2.f32 %v750_v35  ;;  %v4231_v61 = vpop.xlane.xlu1 %678  ;;  %v4233_v46 = vpop.xlane.xlu0 %676 }
 0x1aa   : >> { %v754_v0 = vmul.f32 1.442695, %v734_v9  ;;  %v752_v42 = vmul.f32 1.442695, %v733_v5  ;;  %vm6102_vm1 = vcmp.gt.f32.partialorder %v4231_v61, -inf  ;;  %vm703_vm9 = vcmp.gt.f32.partialorder %v4233_v46, -inf }
 0x1ab   : >> { %v4240_v34 = vsel %vm6102_vm1, %v4231_v61, 0.0  ;;  %v4245_v6 = vsel %vm703_vm9, %v4233_v46, 0.0 }
 0x1ac   : >> { %2951 = vpow2.f32 %v754_v0  ;;  %v736_v3 = vsub.f32 %v4001_v17, %v4240_v34  ;;  %v735_v35 = vsub.f32 %v3973_v10, %v4245_v6 }
 0x1ad   : >> { %2953 = vpow2.f32 %v752_v42  ;;  %v4251_v9 = vpop.xlane.xlu1 %682  ;;  %v4253_v5 = vpop.xlane.xlu0 %680 }
 0x1ae   : >> { %v2946_v38 = vpop.eup %2945  ;;  %v758_v33 = vmul.f32 1.442695, %v736_v3  ;;  %v756_v27 = vmul.f32 1.442695, %v735_v35  ;;  %vm6107_vm1 = vcmp.gt.f32.partialorder %v4251_v9, -inf  ;;  %vm6108_vm14 = vcmp.gt.f32.partialorder %v4253_v5, -inf }
 0x1af   : >> { %v4260_v0 = vsel %vm6107_vm1, %v4251_v9, 0.0  ;;  %v4265_v42 = vsel %vm6108_vm14, %v4253_v5, 0.0  ;;  %2682 = vmatprep.mubr.f32.mxu0 %v2946_v38 }
 0x1b0   : >> { %2955 = vpow2.f32 %v758_v33  ;;  %v738_v10 = vsub.f32 %v4052_v48, %v4260_v0  ;;  %v737_v17 = vsub.f32 %v4031_v56, %v4265_v42 }
 0x1b1   : >> { %2957 = vpow2.f32 %v756_v27  ;;  %v4271_v3 = vpop.xlane.xlu1 %686  ;;  %v4273_v35 = vpop.xlane.xlu0 %684 }
 0x1b2   : >> { %v2948_v39 = vpop.eup %2947  ;;  %v762_v31 = vmul.f32 1.442695, %v738_v10  ;;  %v760_v37 = vmul.f32 1.442695, %v737_v17  ;;  %vm6114_vm1 = vcmp.gt.f32.partialorder %v4271_v3, -inf  ;;  %vm6113_vm14 = vcmp.gt.f32.partialorder %v4273_v35, -inf }
 0x1b3   : >> { %v2950_v38 = vpop.eup %2949  ;;  %v4280_v33 = vsel %vm6114_vm1, %v4271_v3, 0.0  ;;  %v4285_v27 = vsel %vm6113_vm14, %v4273_v35, 0.0  ;;  %2683 = vmatmul.mubr.f32.vlgmr.msra.gmra.mrb[0].mxu0 %v2948_v39  ;;  %v6400_v10 = vmov 1.0|1.0  }
 0x1b4   : >> { %2959 = vpow2.f32 %v762_v31  ;;  %v740_v56 = vsub.f32 %v4105_v30, %v4280_v33  ;;  %v739_v48 = vsub.f32 %v4077_v36, %v4285_v27  ;;  %2685 = vmatprep.mubr.f32.mxu0 %v2950_v38  ;;  %2851 = vmatpush3.bf16.msra.mxu0 %v6400_v10 }
 0x1b5   : >> { %2961 = vpow2.f32 %v760_v37  ;;  %v4292_v17 = vpop.xlane.xlu1 %690  ;;  %v4294_v22 = vpop.xlane.xlu0 %688  ;;  %2852 = vmatprep.subr.bf16.mxu0 %v6400_v10 }
 0x1b6   : >> { %v2952_v25 = vpop.eup %2951  ;;  %v766_v32 = vmul.f32 1.442695, %v740_v56  ;;  %v764_v39 = vmul.f32 1.442695, %v739_v48  ;;  %vm6120_vm14 = vcmp.gt.f32.partialorder %v4292_v17, -inf  ;;  %vm6119_vm1 = vcmp.gt.f32.partialorder %v4294_v22, -inf }
 0x1b7   : >> { %v2954_v31 = vpop.eup %2953  ;;  %v4302_v36 = vsel %vm6120_vm14, %v4292_v17, 0.0  ;;  %v4307_v37 = vsel %vm6119_vm1, %v4294_v22, 0.0 }
 0x1b8   : >> { %2963 = vpow2.f32 %v766_v32  ;;  %v742_v30 = vsub.f32 %v4149_v29, %v4302_v36  ;;  %v741_v38 = vsub.f32 %v4131_v50, %v4307_v37  ;;  %2686 = vmatmul.mubr.f32.gmra.mrb[2].mxu0 %v2954_v31 }
 0x1b9   : >> { %2965 = vpow2.f32 %v764_v39  ;;  %2688 = vmatprep.mubr.f32.mxu0 %v2952_v25  ;;  %v4313_v56 = vpop.xlane.xlu1 %694  ;;  %v4315_v48 = vpop.xlane.xlu0 %692  ;;  %2853 = vmatpush3.bf16.msra.mxu0 %v6400_v10 }
 0x1ba   : >> { %v2956_v26 = vpop.eup %2955  ;;  %v770_v20 = vmul.f32 1.442695, %v742_v30  ;;  %v768_v7 = vmul.f32 1.442695, %v741_v38  ;;  %vm712_vm1 = vcmp.gt.f32.partialorder %v4313_v56, -inf  ;;  %vm6123_vm14 = vcmp.gt.f32.partialorder %v4315_v48, -inf  ;;  %2854 = vmatprep.subr.bf16.mxu0 %v6400_v10 }
 0x1bb   : >> { %v2958_v32 = vpop.eup %2957  ;;  %v4324_v25 = vsel %vm712_vm1, %v4313_v56, 0.0  ;;  %v4329_v50 = vsel %vm6123_vm14, %v4315_v48, 0.0 }
 0x1bc   : >> { %2967 = vpow2.f32 %v770_v20  ;;  %v744_v29 = vsub.f32 %v4172_v51, %v4324_v25  ;;  %v743_v39 = vsub.f32 %v4162_v55, %v4329_v50  ;;  %2689 = vmatmul.mubr.f32.gmra.mrb[4].mxu0 %v2958_v32 }
 0x1bd   : >> { %2969 = vpow2.f32 %v768_v7  ;;  %2691 = vmatprep.mubr.f32.mxu0 %v2956_v26  ;;  %v4335_v31 = vpop.xlane.xlu0 %696  ;;  %2855 = vmatpush3.bf16.msra.mxu0 %v6400_v10 }
 0x1be   : >> { %v2960_v30 = vpop.eup %2959  ;;  %v774_v38 = vmul.f32 1.442695, %v744_v29  ;;  %v772_v63 = vmul.f32 1.442695, %v743_v39  ;;  %vm713_vm14 = vcmp.gt.f32.partialorder %v4335_v31, -inf  ;;  %2856 = vmatprep.subr.bf16.mxu0 %v6400_v10 }
 0x1bf   : >> { %v2962_v20 = vpop.eup %2961  ;;  %v4343_v51 = vsel %vm713_vm14, %v4335_v31, 0.0 }
 0x1c0   : >> { %2971 = vpow2.f32 %v774_v38  ;;  %v745_v26 = vsub.f32 %v4178_v1, %v4343_v51  ;;  %2692 = vmatmul.mubr.f32.gmra.mrb[6].mxu0 %v2962_v20  ;;  %v3294_v38 = vmov 0  }
 0x1c1   : >> { %2973 = vpow2.f32 %v772_v63  ;;  %2694 = vmatprep.mubr.f32.mxu0 %v2960_v30  ;;  %2857 = vmatpush3.bf16.msra.mxu0 %v6400_v10 }
 0x1c2   : >> { %v2964_v7 = vpop.eup %2963  ;;  %v776_v55 = vmul.f32 1.442695, %v745_v26  ;;  %2858 = vmatprep.subr.bf16.mxu0 %v6400_v10  ;;  %2943 = vset.pattern.permute.xlu0 %v3294_v38 }
 0x1c3   : >> { %v2966_v32 = vpop.eup %2965  ;;  %2944 = vset.pattern.permute.xlu1 %v3294_v38 }
 0x1c4   : >> { %2975 = vpow2.f32 %v776_v55  ;;  %2695 = vmatmul.mubr.f32.gmra.mrb[8].mxu0 %v2966_v32 }
 0x1c5   : >> { %2697 = vmatprep.mubr.f32.mxu0 %v2964_v7  ;;  %2859 = vmatpush3.bf16.msra.mxu0 %v6400_v10 }
 0x1c6   : >> { %v2968_v29 = vpop.eup %2967  ;;  %2860 = vmatprep.subr.bf16.mxu0 %v6400_v10 }
 0x1c7   : >> { %v2970_v39 = vpop.eup %2969 }
 0x1c8   : >> { %2698 = vmatmul.mubr.f32.gmra.mrb[10].mxu0 %v2970_v39 }
 0x1c9   : >> { %2700 = vmatprep.mubr.f32.mxu0 %v2968_v29  ;;  %2861 = vmatpush3.bf16.msra.mxu0 %v6400_v10 }
 0x1ca   : >> { %v2972_v63 = vpop.eup %2971  ;;  %2862 = vmatprep.subr.bf16.mxu0 %v6400_v10 }
 0x1cb   : >> { %v2974_v1 = vpop.eup %2973 }
 0x1cc   : >> { %2701 = vmatmul.mubr.f32.gmra.mrb[12].mxu0 %v2974_v1 }
 0x1cd   : >> { %2703 = vmatprep.mubr.f32.mxu0 %v2972_v63  ;;  %2863 = vmatpush3.bf16.msra.mxu0 %v6400_v10 }
 0x1ce   : >> { %v2976_v30 = vpop.eup %2975  ;;  %2864 = vmatprep.subr.bf16.mxu0 %v6400_v10 }
 0x1d0   : >> { %2704 = vmatmul.mubr.f32.gmra.mrb[14].mxu0 %v2976_v30 }
 0x1d1   : >> { %2865 = vmatpush3.bf16.msra.mxu0 %v6400_v10 }
 0x286   : >> { %v2684_v20 = vpop.f32.mrb[0].mxu0 }
 0x287   : >> { %2977 = vlog2.f32 %v2684_v20  ;;  %v844_v26 = vpop.f32.mrb[1].mxu0 }
 0x288   : >> { %2979 = vlog2.f32 %v844_v26 }
 0x28b   : >> { %v2687_v7 = vpop.f32.mrb[2].mxu0 }
 0x28c   : >> { %2981 = vlog2.f32 %v2687_v7  ;;  %v854_v55 = vpop.f32.mrb[3].mxu0 }
 0x28d   : >> { %2983 = vlog2.f32 %v854_v55 }
 0x28f   : >> { %v2690_v32 = vpop.f32.mrb[4].mxu0 }
 0x290   : >> { %2985 = vlog2.f32 %v2690_v32  ;;  %v864_v29 = vpop.f32.mrb[5].mxu0 }
 0x291   : >> { %v2978_v39 = vpop.eup %2977  ;;  %2987 = vlog2.f32 %v864_v29 }
 0x292   : >> { %v2980_v63 = vpop.eup %2979  ;;  %v926_v1 = vmul.f32 0.6931472, %v2978_v39 }
 0x293   : >> { %v924_v30 = vmul.f32 0.6931472, %v2980_v63  ;;  %v2693_v10 = vpop.f32.mrb[6].mxu0 }
 0x294   : >> { %v874_v60 = vpop.f32.mrb[7].mxu0  ;;  %v956_v38 = vadd.f32 %v926_v1, %v4200_v52  ;;  %2989 = vlog2.f32 %v2693_v10 }
 0x295   : >> { %v955_v20 = vadd.f32 %v924_v30, %v4187_v8  ;;  %2991 = vlog2.f32 %v874_v60 }
 0x296   : >> { %v2982_v58 = vpop.eup %2981  ;;  %v4360_v26 = vsel %vm699_vm6, %v956_v38, -inf  ;;  %vm6403_vm6 = vcmp.gt.f32.partialorder %v4271_v3, -inf }
 0x297   : >> { %v2984_v7 = vpop.eup %2983  ;;  %v930_v55 = vmul.f32 0.6931472, %v2982_v58  ;;  %v2696_v32 = vpop.f32.mrb[8].mxu0  ;;  %1112 = vperm.xlu0 %2943, %v4360_v26   ;;  %v4365_v29 = vsel %vm698_vm0, %v955_v20, -inf  ;;  %vm6401_vm0 = vcmp.gt.f32.partialorder %v4211_v59, -inf }
 0x298   : >> { %v928_v39 = vmul.f32 0.6931472, %v2984_v7  ;;  %v884_v63 = vpop.f32.mrb[9].mxu0  ;;  %1107 = vperm.xlu1 %2944, %v4365_v29  }
 0x299   : >> { %v958_v52 = vadd.f32 %v930_v55, %v4225_v43 }
 0x29a   : >> { %v2986_v8 = vpop.eup %2985  ;;  %v957_v1 = vadd.f32 %v928_v39, %v4205_v54 }
 0x29b   : >> { %v934_v16 = vmul.f32 0.6931472, %v2986_v8  ;;  %v2699_v10 = vpop.f32.mrb[10].mxu0  ;;  %v4371_v58 = vsel %vm701_vm4, %v958_v52, -inf  ;;  %v2988_v30 = vpop.eup %2987  ;;  %vm6405_vm4 = vcmp.gt.f32.partialorder %v4292_v17, -inf }
 0x29c   : >> { %v894_v44 = vpop.f32.mrb[11].mxu0  ;;  %1122 = vperm.xlu1 %2944, %v4371_v58   ;;  %v932_v38 = vmul.f32 0.6931472, %v2988_v30  ;;  %v4377_v43 = vsel %vm700_vm7, %v957_v1, -inf  ;;  %vm6404_vm7 = vcmp.gt.f32.partialorder %v4231_v61, -inf }
 0x29d   : >> { %2993 = vlog2.f32 %v894_v44  ;;  %v960_v60 = vadd.f32 %v934_v16, %v4245_v6 }
 0x29e   : >> { %2995 = vlog2.f32 %v2696_v32  ;;  %v2990_v7 = vpop.eup %2989  ;;  %v959_v32 = vadd.f32 %v932_v38, %v4220_v62 }
 0x29f   : >> { %v2702_v20 = vpop.f32.mrb[12].mxu0  ;;  %v938_v54 = vmul.f32 0.6931472, %v2990_v7  ;;  %v976_v39 = vsel %vm703_vm9, %v960_v60, -inf  ;;  %v2992_v52 = vpop.eup %2991  ;;  %vm6402_vm9 = vcmp.gt.f32.partialorder %v4253_v5, -inf }
 0x2a0   : >> { %v904_v28 = vpop.f32.mrb[13].mxu0  ;;  %1117 = vperm.xlu1 %2944, %v4377_v43   ;;  %v936_v6 = vmul.f32 0.6931472, %v2992_v52  ;;  %v975_v16 = vsel %vm6401_vm0, %v959_v32, -inf  ;;  %vm6406_vm0 = vcmp.gt.f32.partialorder %v4273_v35, -inf }
 0x2a1   : >> { %2997 = vlog2.f32 %v904_v28  ;;  %v962_v1 = vadd.f32 %v938_v54, %v4265_v42 }
 0x2a2   : >> { %2999 = vlog2.f32 %v884_v63 }
 0x2a3   : >> { %v2705_v55 = vpop.f32.mrb[14].mxu0  ;;  %v978_v38 = vsel %vm6402_vm9, %v962_v1, -inf  ;;  %vm6407_vm9 = vcmp.gt.f32.partialorder %v4251_v9, -inf }
 0x2a4   : >> { %v914_v8 = vpop.f32.mrb[15].mxu0  ;;  %1132 = vperm.xlu1 %2944, %v976_v39  }
 0x2a5   : >> { %3001 = vlog2.f32 %v914_v8 }
 0x2a6   : >> { %3003 = vlog2.f32 %v2699_v10  ;;  %v961_v10 = vadd.f32 %v936_v6, %v4240_v34 }
 0x2a7   : >> { %v2994_v49 = vpop.eup %2993  ;;  %3005 = vlog2.f32 %v2702_v20 }
 0x2a8   : >> { %v2996_v63 = vpop.eup %2995  ;;  %v944_v30 = vmul.f32 0.6931472, %v2994_v49  ;;  %1127 = vperm.xlu1 %2944, %v975_v16   ;;  %3007 = vlog2.f32 %v2705_v55 }
 0x2a9   : >> { %v942_v62 = vmul.f32 0.6931472, %v2996_v63 }
 0x2aa   : >> { %v965_v46 = vadd.f32 %v944_v30, %v4280_v33  ;;  %v977_v33 = vsel %vm6404_vm7, %v961_v10, -inf  ;;  %vm6409_vm7 = vcmp.gt.f32.partialorder %v4315_v48, -inf }
 0x2ab   : >> { %v2998_v44 = vpop.eup %2997  ;;  %v964_v5 = vadd.f32 %v942_v62, %v4285_v27 }
 0x2ac   : >> { %v3000_v60 = vpop.eup %2999  ;;  %v948_v7 = vmul.f32 0.6931472, %v2998_v44  ;;  %1142 = vperm.xlu1 %2944, %v978_v38   ;;  %v981_v59 = vsel %vm6403_vm6, %v965_v46, -inf  ;;  %vm6408_vm6 = vcmp.gt.f32.partialorder %v4294_v22, -inf  ;;  %v4421_v46 = vstv %s1035_s17 }
 0x2ad   : >> { %1157 = vperm.xlu0 %2943, %v981_v59   ;;  %v940_v28 = vmul.f32 0.6931472, %v3000_v60  ;;  %6410 = vst [vmem:[#allocation96_spill] sm:$0xff] %v4421_v46  ;;  %v4424_v44 = vsub.s32 0, %v6289_v2  ;;  %v1027_v2 = vld [vmem:[#allocation4 + $0x40] sm:$0xff] }
 0x2ae   : >> { %v967_v42 = vadd.f32 %v948_v7, %v4302_v36  ;;  %v980_v36 = vsel %vm6406_vm0, %v964_v5, -inf  ;;  %v6415_v5 = vld [vmem:[#allocation62_spill] sm:$0xff]  ;;  %vm6441_vm0 = vcmp.eq.s32.totalorder %v6281_v23, %v4421_v46 }
 0x2af   : >> { %v3002_v20 = vpop.eup %3001  ;;  %v963_v55 = vadd.f32 %v940_v28, %v4260_v0  ;;  %6411 = vst [vmem:[#allocation97_spill] sm:$0xff] %v4424_v44  ;;  %v6413_v28 = vld [vmem:[#allocation60_spill] sm:$0xff] }
 0x2b0   : >> { %v3004_v54 = vpop.eup %3003  ;;  %v952_v32 = vmul.f32 0.6931472, %v3002_v20  ;;  %1137 = vperm.xlu1 %2944, %v977_v33   ;;  %v983_v34 = vsel %vm6405_vm4, %v967_v42, -inf  ;;  %v6412_v20 = vld [vmem:[#allocation59_spill] sm:$0xff]  ;;  %vm6438_vm4 = vcmp.eq.s32.totalorder %v6276_v4, %v4421_v46 }
 0x2b1   : >> { %1167 = vperm.xlu0 %2943, %v983_v34   ;;  %v946_v52 = vmul.f32 0.6931472, %v3004_v54  ;;  %v3006_v8 = vpop.eup %3005  ;;  %v979_v17 = vsel %vm6407_vm9, %v963_v55, -inf  ;;  %v6416_v54 = vld [vmem:[#allocation29_spill] sm:$0xff]  ;;  %vm6440_vm9 = vcmp.eq.s32.totalorder %v6278_v18, %v4421_v46 }
 0x2b2   : >> { %v969_v3 = vadd.f32 %v952_v32, %v4324_v25  ;;  %v950_v27 = vmul.f32 0.6931472, %v3006_v8  ;;  %v3008_v6 = vpop.eup %3007  ;;  %v6421_v55 = vld [vmem:[#allocation33_spill] sm:$0xff] }
 0x2b3   : >> { %v966_v49 = vadd.f32 %v946_v52, %v4307_v37  ;;  %v954_v25 = vmul.f32 0.6931472, %v3008_v6  ;;  %v6419_v52 = vld [vmem:[#allocation39_spill] sm:$0xff]  ;;  %v6426_v6 = vld [vmem:[#allocation38_spill] sm:$0xff] }
 0x2b4   : >> { %1152 = vperm.xlu1 %2944, %v980_v36   ;;  %v985_v61 = vsel %vm712_vm1, %v969_v3, -inf  ;;  %v968_v0 = vadd.f32 %v950_v27, %v4329_v50  ;;  %vm6171_vm1 = vcmp.eq.s32.totalorder %v6277_v11, %v4421_v46  ;;  %v6423_v27 = vld [vmem:[#allocation63_spill] sm:$0xff] }
 0x2b5   : >> { %1177 = vperm.xlu0 %2943, %v985_v61   ;;  %v982_v35 = vsel %vm6408_vm6, %v966_v49, -inf  ;;  %v970_v1 = vadd.f32 %v954_v25, %v4343_v51  ;;  %vm6439_vm6 = vcmp.eq.s32.totalorder %v6279_v12, %v4421_v46 }
 0x2b6   : >> { %v984_v56 = vsel %vm6409_vm7, %v968_v0, -inf  ;;  %vm6147_vm7 = vcmp.eq.s32.totalorder %v6283_v40, %v4421_v46 }
 0x2b7   : >> { %v986_v9 = vsel %vm713_vm14, %v970_v1, -inf  ;;  %v6430_v1 = vld [vmem:[#allocation35_spill] sm:$0xff]  ;;  %vm6442_vm14 = vcmp.eq.s32.totalorder %v6280_v24, %v4421_v46 }
 0x2b8   : >> { %1147 = vperm.xlu1 %2944, %v979_v17  }
 0x2bc   : >> { %1162 = vperm.xlu1 %2944, %v982_v35  }
 0x2c0   : >> { %1172 = vperm.xlu1 %2944, %v984_v56  }
 0x2c4   : >> { %1182 = vperm.xlu1 %2944, %v986_v9  }
 0x2d3   : >> { %987 = vxpose.xlu0.b32.start [1/16] (narrow) %v4365_v29, 8 }
 0x2d7   : >> { %988 = vxpose.xlu0.b32.cont [2/16] (narrow) %v4360_v26, 8 }
 0x2db   : >> { %989 = vxpose.xlu0.b32.cont [3/16] (narrow) %v4377_v43, 8 }
 0x2df   : >> { %990 = vxpose.xlu0.b32.cont [4/16] (narrow) %v4371_v58, 8 }
 0x2e3   : >> { %991 = vxpose.xlu0.b32.cont [5/16] (narrow) %v975_v16, 8 }
 0x2e7   : >> { %992 = vxpose.xlu0.b32.cont [6/16] (narrow) %v976_v39, 8 }
 0x2eb   : >> { %993 = vxpose.xlu0.b32.cont [7/16] (narrow) %v977_v33, 8  ;;  %v6414_v33 = vld [vmem:[#allocation61_spill] sm:$0xff] }
 0x2ef   : >> { %994 = vxpose.xlu0.b32.cont [8/16] (narrow) %v978_v38, 8 }
 0x2f3   : >> { %995 = vxpose.xlu0.b32.cont [9/16] (narrow) %v979_v17, 8  ;;  %v6424_v17 = vld [vmem:[#allocation43_spill] sm:$0xff] }
 0x2f7   : >> { %996 = vxpose.xlu0.b32.cont [10/16] (narrow) %v980_v36, 8 }
 0x2fb   : >> { %997 = vxpose.xlu0.b32.cont [11/16] (narrow) %v981_v59, 8 }
 0x2ff   : >> { %998 = vxpose.xlu0.b32.cont [12/16] (narrow) %v982_v35, 8  ;;  %v6428_v35 = vld [vmem:[#allocation45_spill] sm:$0xff] }
 0x303   : >> { %999 = vxpose.xlu0.b32.cont [13/16] (narrow) %v983_v34, 8  ;;  %v6417_v34 = vld [vmem:[#allocation34_spill] sm:$0xff] }
 0x307   : >> { %1000 = vxpose.xlu0.b32.cont [14/16] (narrow) %v984_v56, 8 }
 0x30b   : >> { %1001 = vxpose.xlu0.b32.cont [15/16] (narrow) %v985_v61, 8 }
 0x30f   : >> { %1002 = vxpose.xlu0.b32.end [16/16] (narrow) %v986_v9, 8 }
 0x316   : >> { %v1113_v58 = vpop.permute.xlu0 %1112 }
 0x317   : >> { %v1108_v22 = vpop.permute.xlu1 %1107  ;;  %v4443_v38 = vadd.f32 %v1113_v58, %v6292_v14  ;;  %v1021_v58 = vld [vmem:[#allocation4 + $0x10] sm:$0xff] }
 0x318   : >> { %v4454_v10 = vadd.f32 %v1108_v22, %v6293_v13  ;;  %v6432_v22 = vld [vmem:[#allocation40_spill] sm:$0xff] }
 0x31b   : >> { %v1123_v37 = vpop.permute.xlu1 %1122 }
 0x31c   : >> { %v4457_v60 = vadd.f32 %v1123_v37, %v6290_v19 }
 0x31f   : >> { %v1118_v48 = vpop.permute.xlu1 %1117 }
 0x320   : >> { %v4460_v7 = vadd.f32 %v1118_v48, %v6291_v15  ;;  %v6434_v48 = vld [vmem:[#allocation44_spill] sm:$0xff] }
 0x323   : >> { %v1133_v50 = vpop.permute.xlu1 %1132 }
 0x324   : >> { %v4463_v59 = vadd.f32 %v1133_v50, %v6288_v21 }
 0x327   : >> { %v1128_v31 = vpop.permute.xlu1 %1127 }
 0x328   : >> { %v4474_v32 = vadd.f32 %v1128_v31, %v6416_v54  ;;  %v6436_v31 = vld [vmem:[#allocation48_spill] sm:$0xff] }
 0x32b   : >> { %v1143_v51 = vpop.permute.xlu1 %1142 }
 0x32c   : >> { %v1158_v39 = vpop.permute.xlu0 %1157  ;;  %v4477_v3 = vadd.f32 %v1143_v51, %v6417_v34 }
 0x32d   : >> { %v4480_v36 = vadd.f32 %v1158_v39, %v6419_v52 }
 0x32e   : >> { %6418 = vst [vmem:[#allocation98_spill] sm:$0xff] %v4477_v3  ;;  %v1032_v3 = vld [vmem:[#allocation4 + $0x68] sm:$0xff] }
 0x32f   : >> { %v1138_v26 = vpop.permute.xlu1 %1137  ;;  %6420 = vst [vmem:[#allocation99_spill] sm:$0xff] %v4480_v36  ;;  %v1029_v36 = vld [vmem:[#allocation4 + $0x50] sm:$0xff] }
 0x330   : >> { %v1168_v63 = vpop.permute.xlu0 %1167  ;;  %v4483_v8 = vadd.f32 %v1138_v26, %v6421_v55  ;;  %v1019_v26 = vld [vmem:[#allocation4] sm:$0xff] }
 0x331   : >> { %v4494_v49 = vadd.f32 %v1168_v63, %v6424_v17 }
 0x332   : >> { %6422 = vst [vmem:[#allocation100_spill] sm:$0xff] %v4483_v8  ;;  %v1033_v8 = vld [vmem:[#allocation4 + $0x70] sm:$0xff] }
 0x333   : >> { %v1153_v29 = vpop.permute.xlu1 %1152  ;;  %6425 = vst [vmem:[#allocation101_spill] sm:$0xff] %v4494_v49 }
 0x334   : >> { %v1178_v62 = vpop.permute.xlu0 %1177  ;;  %v4497_v25 = vadd.f32 %v1153_v29, %v6426_v6  ;;  %v1020_v29 = vld [vmem:[#allocation4 + $0x8] sm:$0xff] }
 0x335   : >> { %v4500_v0 = vadd.f32 %v1178_v62, %v6428_v35  ;;  %v1023_v62 = vld [vmem:[#allocation4 + $0x20] sm:$0xff] }
 0x336   : >> { %6427 = vst [vmem:[#allocation102_spill] sm:$0xff] %v4497_v25  ;;  %v1030_v25 = vld [vmem:[#allocation4 + $0x58] sm:$0xff] }
 0x337   : >> { %v1148_v43 = vpop.permute.xlu1 %1147  ;;  %6429 = vst [vmem:[#allocation103_spill] sm:$0xff] %v4500_v0 }
 0x338   : >> { %v4512_v9 = vadd.f32 %v1148_v43, %v6430_v1  ;;  %v1022_v43 = vld [vmem:[#allocation4 + $0x18] sm:$0xff] }
 0x33a   : >> { %6431 = vst [vmem:[#allocation104_spill] sm:$0xff] %v4512_v9 }
 0x33b   : >> { %v1163_v16 = vpop.permute.xlu1 %1162 }
 0x33c   : >> { %v4515_v37 = vadd.f32 %v1163_v16, %v6432_v22 }
 0x33e   : >> { %6433 = vst [vmem:[#allocation105_spill] sm:$0xff] %v4515_v37 }
 0x33f   : >> { %v1173_v30 = vpop.permute.xlu1 %1172 }
 0x340   : >> { %v4518_v50 = vadd.f32 %v1173_v30, %v6434_v48 }
 0x342   : >> { %6435 = vst [vmem:[#allocation106_spill] sm:$0xff] %v4518_v50 }
 0x343   : >> { %v1183_v42 = vpop.permute.xlu1 %1182 }
 0x344   : >> { %v4521_v51 = vadd.f32 %v1183_v42, %v6436_v31  ;;  %v1024_v42 = vld [vmem:[#allocation4 + $0x28] sm:$0xff] }
 0x346   : >> { %6437 = vst [vmem:[#allocation107_spill] sm:$0xff] %v4521_v51  ;;  %v1028_v51 = vld [vmem:[#allocation4 + $0x48] sm:$0xff] }
 0x353   : >> { %v1003_v61 = vpop.trf.xlu0 }
 0x354   : >> { %v1056_v56 = vrot.slane %v1003_v61, %v4424_v44  ;;  %v1025_v61 = vld [vmem:[#allocation4 + $0x30] sm:$0xff]  ;;  %v1026_v44 = vld [vmem:[#allocation4 + $0x38] sm:$0xff] }
 0x356   : >> { %v1057_v39 = vadd.f32 %v1056_v56, %v6293_v13  ;;  %v1058_v16 = vadd.f32 %v1056_v56, %v6292_v14  ;;  %v1059_v63 = vadd.f32 %v1056_v56, %v6291_v15  ;;  %v1060_v30 = vadd.f32 %v1056_v56, %v6290_v19 }
 0x357   : >> { %v1061_v13 = vadd.f32 %v1056_v56, %v6416_v54  ;;  %v1062_v14 = vadd.f32 %v1056_v56, %v6288_v21  ;;  %v1063_v15 = vadd.f32 %v1056_v56, %v6421_v55  ;;  %v1064_v19 = vadd.f32 %v1056_v56, %v6417_v34  ;;  %v1031_v54 = vld [vmem:[#allocation4 + $0x60] sm:$0xff] }
 0x358   : >> { %v1065_v0 = vadd.f32 %v1056_v56, %v6430_v1  ;;  %v1066_v50 = vadd.f32 %v1056_v56, %v6426_v6  ;;  %v1067_v49 = vadd.f32 %v1056_v56, %v6419_v52  ;;  %v1068_v37 = vadd.f32 %v1056_v56, %v6432_v22  ;;  %v1034_v1 = vld [vmem:[#allocation4 + $0x78] sm:$0xff] }
 0x359   : >> { %v1069_v21 = vadd.f32 %v1056_v56, %v6424_v17  ;;  %v1070_v55 = vadd.f32 %v1056_v56, %v6434_v48  ;;  %v1071_v34 = vadd.f32 %v1056_v56, %v6428_v35  ;;  %v1072_v9 = vadd.f32 %v1056_v56, %v6436_v31 }
 0x35a   : >> { %v1073_v6 = vsel %vm6438_vm4, %v1057_v39, %v1019_v26  ;;  %v1074_v22 = vsel %vm6171_vm1, %v1058_v16, %v1020_v29  ;;  %v1075_v17 = vsel %vm6439_vm6, %v1059_v63, %v1021_v58  ;;  %v1076_v35 = vsel %vm6440_vm9, %v1060_v30, %v1022_v43  ;;  %v6476_v39 = vld [vmem:[#allocation107_spill] sm:$0xff]  ;;  %v1233_v30 = vld [vmem:[#allocation3] sm:$0xff] }
 0x35b   : >> { %v1077_v56 = vsel %vm6441_vm0, %v1061_v13, %v1023_v62  ;;  %v1078_v26 = vsel %vm6442_vm14, %v1062_v14, %v1024_v42  ;;  %v1079_v29 = vsel %vm6147_vm7, %v1063_v15, %v1025_v61  ;;  %vm6443_vm4 = vcmp.eq.s32.totalorder %v6282_v41, %v4421_v46  ;;  %v1247_v63 = vld [vmem:[#allocation3 + $0x70] sm:$0xff]  ;;  %v1633_v62 = vld [vmem:[%s4710_s18 + $0x68] sm:$0xff] }
 0x35c   : >> { %v1080_v58 = vsel %vm6443_vm4, %v1064_v19, %v1026_v44  ;;  %vm6444_vm6 = vcmp.eq.s32.totalorder %v6284_v45, %v4421_v46  ;;  %vm6445_vm9 = vcmp.eq.s32.totalorder %v6285_v47, %v4421_v46  ;;  %vm6446_vm0 = vcmp.eq.s32.totalorder %v6287_v53, %v4421_v46  ;;  %v1234_v42 = vld [vmem:[#allocation3 + $0x8] sm:$0xff] }
 0x35d   : >> { %v1081_v43 = vsel %vm6444_vm6, %v1065_v0, %v1027_v2  ;;  %v1082_v13 = vsel %vm6445_vm9, %v1066_v50, %v1028_v51  ;;  %v1083_v14 = vsel %vm6446_vm0, %v1067_v49, %v1029_v36  ;;  %vm6447_vm14 = vcmp.eq.s32.totalorder %v6286_v57, %v4421_v46  ;;  %v6474_v50 = vld [vmem:[#allocation103_spill] sm:$0xff] }
 0x35e   : >> { %v1084_v15 = vsel %vm6447_vm14, %v1068_v37, %v1030_v25  ;;  %vm6448_vm7 = vcmp.eq.s32.totalorder %v6412_v20, %v4421_v46  ;;  %vm6449_vm4 = vcmp.eq.s32.totalorder %v6413_v28, %v4421_v46  ;;  %vm6450_vm6 = vcmp.eq.s32.totalorder %v6414_v33, %v4421_v46 }
 0x35f   : >> { %v1085_v19 = vsel %vm6448_vm7, %v1069_v21, %v1031_v54  ;;  %v1086_v2 = vsel %vm6449_vm4, %v1070_v55, %v1032_v3  ;;  %v1087_v44 = vsel %vm6450_vm6, %v1071_v34, %v1033_v8  ;;  %vm6451_vm9 = vcmp.eq.s32.totalorder %v6415_v5, %v4421_v46  ;;  %v6464_v8 = vld [vmem:[#allocation102_spill] sm:$0xff] }
 0x360   : >> { %v1088_v36 = vsel %vm6451_vm9, %v1072_v9, %v1034_v1  ;;  %vm6452_vm0 = vcmp.eq.s32.totalorder %v6276_v4, %v6423_v27  ;;  %vm6453_vm7 = vcmp.eq.s32.totalorder %v6277_v11, %v6423_v27  ;;  %vm6454_vm14 = vcmp.eq.s32.totalorder %v6279_v12, %v6423_v27  ;;  %v6470_v1 = vld [vmem:[#allocation101_spill] sm:$0xff] }
 0x361   : >> { %v4607_v49 = vsel %vm6452_vm0, %v4454_v10, %v1073_v6  ;;  %v4613_v21 = vsel %vm6453_vm7, %v4443_v38, %v1074_v22  ;;  %v4619_v54 = vsel %vm6454_vm14, %v4460_v7, %v1075_v17  ;;  %vm6455_vm4 = vcmp.eq.s32.totalorder %v6278_v18, %v6423_v27  ;;  %v6458_v7 = vld [vmem:[#allocation100_spill] sm:$0xff]  ;;  %v6466_v6 = vld [vmem:[#allocation99_spill] sm:$0xff]  ;;  %v6472_v22 = vld [vmem:[#allocation106_spill] sm:$0xff] }
 0x362   : >> { %v4625_v34 = vsel %vm6455_vm4, %v4457_v60, %v1076_v35  ;;  %vm6456_vm6 = vcmp.eq.s32.totalorder %v6281_v23, %v6423_v27  ;;  %vm6457_vm9 = vcmp.eq.s32.totalorder %v6280_v24, %v6423_v27  ;;  %vm6459_vm0 = vcmp.eq.s32.totalorder %v6283_v40, %v6423_v27  ;;  %v6460_v60 = vld [vmem:[#allocation98_spill] sm:$0xff]  ;;  %1217 = vst [vmem:[#allocation4] sm:$0xff] %v4607_v49  ;;  %v6468_v35 = vld [vmem:[#allocation105_spill] sm:$0xff] }
 0x363   : >> { %v4631_v10 = vsel %vm6456_vm6, %v4474_v32, %v1077_v56  ;;  %v4637_v38 = vsel %vm6457_vm9, %v4463_v59, %v1078_v26  ;;  %v4643_v3 = vsel %vm6459_vm0, %v6458_v7, %v1079_v29  ;;  %vm6461_vm7 = vcmp.eq.s32.totalorder %v6282_v41, %v6423_v27  ;;  %1218 = vst [vmem:[#allocation4 + $0x8] sm:$0xff] %v4613_v21  ;;  %v6462_v59 = vld [vmem:[#allocation104_spill] sm:$0xff] }
 0x364   : >> { %v4649_v55 = vsel %vm6461_vm7, %v6460_v60, %v1080_v58  ;;  %1219 = vst [vmem:[#allocation4 + $0x10] sm:$0xff] %v4619_v54  ;;  %1220 = vst [vmem:[#allocation4 + $0x18] sm:$0xff] %v4625_v34  ;;  %vm6463_vm14 = vcmp.eq.s32.totalorder %v6284_v45, %v6423_v27  ;;  %vm6465_vm4 = vcmp.eq.s32.totalorder %v6285_v47, %v6423_v27  ;;  %v1235_v7 = vld [vmem:[#allocation3 + $0x10] sm:$0xff] }
 0x365   : >> { %v4659_v32 = vsel %vm6463_vm14, %v6462_v59, %v1081_v43  ;;  %v4665_v17 = vsel %vm6465_vm4, %v6464_v8, %v1082_v13  ;;  %vm6467_vm6 = vcmp.eq.s32.totalorder %v6287_v53, %v6423_v27  ;;  %vm6469_vm9 = vcmp.eq.s32.totalorder %v6286_v57, %v6423_v27  ;;  %1221 = vst [vmem:[#allocation4 + $0x20] sm:$0xff] %v4631_v10  ;;  %v6490_v8 = vld [vmem:[#allocation78_spill] sm:$0xff] }
 0x366   : >> { %v4671_v25 = vsel %vm6467_vm6, %v6466_v6, %v1083_v14  ;;  %v4677_v0 = vsel %vm6469_vm9, %v6468_v35, %v1084_v15  ;;  %1222 = vst [vmem:[#allocation4 + $0x28] sm:$0xff] %v4637_v38  ;;  %1223 = vst [vmem:[#allocation4 + $0x30] sm:$0xff] %v4643_v3  ;;  %vm6471_vm0 = vcmp.eq.s32.totalorder %v6412_v20, %v6423_v27  ;;  %vm486_vm6 = vcmp.ge.s32.totalorder %v6413_v28, 1 }
 0x367   : >> { %1224 = vst [vmem:[#allocation4 + $0x38] sm:$0xff] %v4649_v55  ;;  %v4687_v9 = vsel %vm6471_vm0, %v6470_v1, %v1085_v19  ;;  %vm6473_vm7 = vcmp.eq.s32.totalorder %v6413_v28, %v6423_v27  ;;  %vm6475_vm14 = vcmp.eq.s32.totalorder %v6414_v33, %v6423_v27  ;;  %vm6477_vm4 = vcmp.eq.s32.totalorder %v6415_v5, %v6423_v27 }
 0x368   : >> { %v1214_v37 = vsel %vm6473_vm7, %v6472_v22, %v1086_v2  ;;  %v1215_v51 = vsel %vm6475_vm14, %v6474_v50, %v1087_v44  ;;  %v1216_v16 = vsel %vm6477_vm4, %v6476_v39, %v1088_v36  ;;  %1225 = vst [vmem:[#allocation4 + $0x40] sm:$0xff] %v4659_v32  ;;  %1226 = vst [vmem:[#allocation4 + $0x48] sm:$0xff] %v4665_v17  ;;  %vm487_vm7 = vcmp.ge.s32.totalorder %v6414_v33, 1  ;;  %v1634_v44 = vld [vmem:[%s4710_s18 + $0x70] sm:$0xff]  ;;  %v1635_v22 = vld [vmem:[%s4710_s18 + $0x78] sm:$0xff] }
 0x369   : >> { %1227 = vst [vmem:[#allocation4 + $0x50] sm:$0xff] %v4671_v25  ;;  %1228 = vst [vmem:[#allocation4 + $0x58] sm:$0xff] %v4677_v0  ;;  %vm502_vm9 = vcmp.le.s32.totalorder %v6413_v28, %v6423_v27  ;;  %vm503_vm14 = vcmp.le.s32.totalorder %v6414_v33, %v6423_v27  ;;  %v1649_v19 = vadd.f32 %v1633_v62, %v1214_v37  ;;  %v6480_v36 = vld [vmem:[#allocation87_spill] sm:$0xff]  ;;  %v1236_v50 = vld [vmem:[#allocation3 + $0x18] sm:$0xff] }
 0x36a   : >> { %1229 = vst [vmem:[#allocation4 + $0x60] sm:$0xff] %v4687_v9  ;;  %1230 = vst [vmem:[#allocation4 + $0x68] sm:$0xff] %v1214_v37  ;;  %vm6481_vm4 = vcmp.le.s32.totalorder %v6480_v36, 127  ;;  %v1650_v35 = vadd.f32 %v1634_v44, %v1215_v51  ;;  %v6483_v37 = vld [vmem:[#allocation89_spill] sm:$0xff] }
 0x36b   : >> { %1231 = vst [vmem:[#allocation4 + $0x70] sm:$0xff] %v1215_v51  ;;  %1232 = vst [vmem:[#allocation4 + $0x78] sm:$0xff] %v1216_v16  ;;  %v1651_v51 = vadd.f32 %v1635_v22, %v1216_v16  ;;  %v1238_v16 = vld [vmem:[#allocation3 + $0x28] sm:$0xff]  ;;  %v1240_v22 = vld [vmem:[#allocation3 + $0x38] sm:$0xff] }
 0x36c   : >> { %vm518_vm0 = vmand %vm486_vm6, %vm502_vm9  ;;  %vm488_vm9 = vcmp.ge.s32.totalorder %v6415_v5, 1 }
 0x36d   : >> { %vm534_vm6 = vmand %vm518_vm0, %vm6481_vm4  ;;  %vm6484_vm0 = vcmp.le.s32.totalorder %v6483_v37, 127 }
 0x36e   : >> { %v4739_v59 = vsel %vm534_vm6, %v1649_v19, -inf }
 0x372   : >> { %v1264_v61 = vld [vmem:[%s4714_s23 + $0x70] sm:$0xff]  ;;  %v1250_v56 = vld [vmem:[%s4714_s23] sm:$0xff]  ;;  %v1251_v26 = vld [vmem:[%s4714_s23 + $0x8] sm:$0xff] }
 0x373   : >> { %v1280_v29 = vadd.f32 %v1264_v61, %v1247_v63  ;;  %v1266_v58 = vadd.f32 %v1250_v56, %v1233_v30  ;;  %v1267_v2 = vadd.f32 %v1251_v26, %v1234_v42  ;;  %v1252_v60 = vld [vmem:[%s4714_s23 + $0x10] sm:$0xff]  ;;  %v1253_v39 = vld [vmem:[%s4714_s23 + $0x18] sm:$0xff]  ;;  %v1237_v56 = vld [vmem:[#allocation3 + $0x20] sm:$0xff] }
 0x374   : >> { %v1268_v1 = vadd.f32 %v1252_v60, %v1235_v7  ;;  %v1269_v42 = vadd.f32 %v1253_v39, %v1236_v50  ;;  %v6486_v61 = vld [vmem:[#allocation91_spill] sm:$0xff]  ;;  %v1254_v26 = vld [vmem:[%s4714_s23 + $0x20] sm:$0xff]  ;;  %v1257_v37 = vld [vmem:[%s4714_s23 + $0x38] sm:$0xff] }
 0x375   : >> { %v4724_v13 = vsel %vm4156_vm11, %v1280_v29, -inf  ;;  %v4728_v15 = vsel %vm3828_vm10, %v1266_v58, -inf  ;;  %vm519_vm11 = vmand %vm487_vm7, %vm503_vm14  ;;  %vm504_vm10 = vcmp.le.s32.totalorder %v6415_v5, %v6423_v27  ;;  %v4743_v6 = vsel %vm3865_vm5, %v1267_v2, -inf  ;;  %v1255_v19 = vld [vmem:[%s4714_s23 + $0x28] sm:$0xff]  ;;  %v1239_v7 = vld [vmem:[#allocation3 + $0x30] sm:$0xff] }
 0x376   : >> { %1326 = vmax.xlane.f32.xlu0 %v4724_v13  ;;  %1298 = vmax.xlane.f32.xlu1 %v4728_v15  ;;  %vm535_vm7 = vmand %vm519_vm11, %vm6484_vm0  ;;  %v4755_v62 = vsel %vm3842_vm15, %v1268_v1, -inf  ;;  %vm6487_vm5 = vcmp.le.s32.totalorder %v6486_v61, 127  ;;  %v4766_v43 = vsel %vm3890_vm12, %v1269_v42, -inf  ;;  %v1270_v14 = vadd.f32 %v1254_v26, %v1237_v56  ;;  %v1256_v60 = vld [vmem:[%s4714_s23 + $0x30] sm:$0xff]  ;;  %v1258_v42 = vld [vmem:[%s4714_s23 + $0x40] sm:$0xff] }
 0x377   : >> { %vm520_vm14 = vmand %vm488_vm9, %vm504_vm10  ;;  %v4751_v63 = vsel %vm535_vm7, %v1650_v35, -inf  ;;  %v1271_v36 = vadd.f32 %v1255_v19, %v1238_v16  ;;  %vm6491_vm15 = vnez %v6490_v8  ;;  %v1272_v1 = vadd.f32 %v1256_v60, %v1239_v7  ;;  %v6492_v50 = vld [vmem:[#allocation80_spill] sm:$0xff]  ;;  %v6494_v61 = vld [vmem:[#allocation82_spill] sm:$0xff] }
 0x378   : >> { %vm536_vm4 = vmand %vm520_vm14, %vm6487_vm5  ;;  %v4773_v44 = vsel %vm3914_vm3, %v1270_v14, -inf  ;;  %vm6493_vm12 = vnez %v6492_v50  ;;  %v1273_v30 = vadd.f32 %v1257_v37, %v1240_v22  ;;  %vm6495_vm3 = vnez %v6494_v61  ;;  %v1242_v58 = vld [vmem:[#allocation3 + $0x48] sm:$0xff]  ;;  %v6496_v16 = vld [vmem:[#allocation84_spill] sm:$0xff] }
 0x379   : >> { %v4762_v29 = vsel %vm536_vm4, %v1651_v51, -inf  ;;  %v4779_v35 = vsel %vm6491_vm15, %v1271_v36, -inf  ;;  %v4785_v39 = vsel %vm6493_vm12, %v1272_v1, -inf  ;;  %v1241_v51 = vld [vmem:[#allocation3 + $0x40] sm:$0xff]  ;;  %v1259_v14 = vld [vmem:[%s4714_s23 + $0x48] sm:$0xff]  ;;  %vm6497_vm6 = vnez %v6496_v16  ;;  %v1243_v36 = vld [vmem:[#allocation3 + $0x50] sm:$0xff] }
 0x37a   : >> { %1694 = vmax.xlane.f32.xlu0 %v4739_v59  ;;  %1300 = vmax.xlane.f32.xlu1 %v4743_v6  ;;  %v4791_v56 = vsel %vm6495_vm3, %v1273_v30, -inf  ;;  %v1274_v26 = vadd.f32 %v1258_v42, %v1241_v51  ;;  %v1275_v2 = vadd.f32 %v1259_v14, %v1242_v58  ;;  %v1260_v7 = vld [vmem:[%s4714_s23 + $0x50] sm:$0xff]  ;;  %v6498_v60 = vld [vmem:[#allocation86_spill] sm:$0xff]  ;;  %v1244_v22 = vld [vmem:[#allocation3 + $0x58] sm:$0xff]  ;;  %vm473_vm0 = vcmp.ge.s32.totalorder %v6276_v4, 1 }
 0x37b   : >> { %vm6499_vm11 = vnez %v6498_v60  ;;  %v1276_v1 = vadd.f32 %v1260_v7, %v1243_v36  ;;  %v1261_v37 = vld [vmem:[%s4714_s23 + $0x58] sm:$0xff]  ;;  %v1245_v42 = vld [vmem:[#allocation3 + $0x60] sm:$0xff]  ;;  %v1246_v16 = vld [vmem:[#allocation3 + $0x68] sm:$0xff]  ;;  %vm489_vm7 = vcmp.le.s32.totalorder %v6276_v4, %v6423_v27  ;;  %vm481_vm5 = vcmp.ge.s32.totalorder %v6284_v45, 1 }
 0x37c   : >> { %v4797_v19 = vsel %vm6497_vm6, %v1274_v26, -inf  ;;  %v4803_v8 = vsel %vm6499_vm11, %v1275_v2, -inf  ;;  %v6500_v50 = vld [vmem:[#allocation88_spill] sm:$0xff]  ;;  %v1277_v51 = vadd.f32 %v1261_v37, %v1244_v22  ;;  %v1262_v61 = vld [vmem:[%s4714_s23 + $0x60] sm:$0xff]  ;;  %v1263_v2 = vld [vmem:[%s4714_s23 + $0x68] sm:$0xff]  ;;  %vm497_vm4 = vcmp.le.s32.totalorder %v6284_v45, %v6423_v27 }
 0x37d   : >> { %vm6501_vm9 = vnez %v6500_v50  ;;  %v6502_v26 = vld [vmem:[#allocation90_spill] sm:$0xff]  ;;  %v1278_v14 = vadd.f32 %v1262_v61, %v1245_v42  ;;  %v1279_v60 = vadd.f32 %v1263_v2, %v1246_v16  ;;  %vm505_vm14 = vmand %vm473_vm0, %vm489_vm7  ;;  %vm474_vm3 = vcmp.ge.s32.totalorder %v6277_v11, 1  ;;  %v1622_v22 = vld [vmem:[%s4710_s18 + $0x10] sm:$0xff] }
 0x37e   : >> { %1696 = vmax.xlane.f32.xlu0 %v4751_v63  ;;  %1302 = vmax.xlane.f32.xlu1 %v4755_v62  ;;  %v4809_v30 = vsel %vm6501_vm9, %v1276_v1, -inf  ;;  %vm6503_vm10 = vnez %v6502_v26  ;;  %v1620_v1 = vld [vmem:[%s4710_s18] sm:$0xff]  ;;  %vm513_vm12 = vmand %vm481_vm5, %vm497_vm4  ;;  %vm490_vm6 = vcmp.le.s32.totalorder %v6277_v11, %v6423_v27  ;;  %vm498_vm0 = vcmp.le.s32.totalorder %v6285_v47, %v6423_v27  ;;  %v1629_v36 = vld [vmem:[%s4710_s18 + $0x48] sm:$0xff] }
 0x37f   : >> { %v4815_v58 = vsel %vm6503_vm10, %v1277_v51, -inf  ;;  %v4824_v7 = vsel %vm4122_vm2, %v1278_v14, -inf  ;;  %v4833_v37 = vsel %vm4143_vm13, %v1279_v60, -inf  ;;  %v1636_v50 = vadd.f32 %v1620_v1, %v4607_v49  ;;  %v6506_v51 = vld [vmem:[#allocation64_spill] sm:$0xff]  ;;  %v1628_v42 = vld [vmem:[%s4710_s18 + $0x40] sm:$0xff]  ;;  %v1621_v14 = vld [vmem:[%s4710_s18 + $0x8] sm:$0xff] }
 0x380   : >> { %vm6507_vm2 = vcmp.le.s32.totalorder %v6506_v51, 127  ;;  %v1644_v26 = vadd.f32 %v1628_v42, %v4659_v32  ;;  %v6508_v49 = vld [vmem:[#allocation77_spill] sm:$0xff]  ;;  %vm506_vm9 = vmand %vm474_vm3, %vm490_vm6  ;;  %vm482_vm10 = vcmp.ge.s32.totalorder %v6285_v47, 1  ;;  %v1637_v2 = vadd.f32 %v1621_v14, %v4613_v21  ;;  %v6510_v32 = vld [vmem:[#allocation66_spill] sm:$0xff] }
 0x381   : >> { %vm521_vm15 = vmand %vm505_vm14, %vm6507_vm2  ;;  %vm6509_vm13 = vcmp.le.s32.totalorder %v6508_v49, 127  ;;  %vm6511_vm7 = vcmp.le.s32.totalorder %v6510_v32, 127  ;;  %vm475_vm4 = vcmp.ge.s32.totalorder %v6279_v12, 1  ;;  %vm491_vm2 = vcmp.le.s32.totalorder %v6279_v12, %v6423_v27  ;;  %v6512_v21 = vld [vmem:[#allocation79_spill] sm:$0xff]  ;;  %v1623_v14 = vld [vmem:[%s4710_s18 + $0x18] sm:$0xff] }
 0x382   : >> { %1698 = vmax.xlane.f32.xlu0 %v4762_v29  ;;  %1304 = vmax.xlane.f32.xlu1 %v4766_v43  ;;  %v4843_v61 = vsel %vm521_vm15, %v1636_v50, -inf  ;;  %vm529_vm11 = vmand %vm513_vm12, %vm6509_vm13  ;;  %v1645_v1 = vadd.f32 %v1629_v36, %v4665_v17  ;;  %vm6513_vm15 = vcmp.le.s32.totalorder %v6512_v21, 127  ;;  %vm483_vm6 = vcmp.ge.s32.totalorder %v6287_v53, 1  ;;  %v6514_v17 = vld [vmem:[#allocation65_spill] sm:$0xff]  ;;  %v1630_v42 = vld [vmem:[%s4710_s18 + $0x50] sm:$0xff] }
 0x383   : >> { %v4853_v16 = vsel %vm529_vm11, %v1644_v26, -inf  ;;  %vm522_vm14 = vmand %vm506_vm9, %vm6511_vm7  ;;  %vm499_vm13 = vcmp.le.s32.totalorder %v6287_v53, %v6423_v27  ;;  %v1638_v51 = vadd.f32 %v1622_v22, %v4619_v54  ;;  %vm6515_vm11 = vcmp.le.s32.totalorder %v6514_v17, 127  ;;  %v6516_v54 = vld [vmem:[#allocation81_spill] sm:$0xff] }
 0x384   : >> { %vm514_vm5 = vmand %vm482_vm10, %vm498_vm0  ;;  %v4863_v60 = vsel %vm522_vm14, %v1637_v2, -inf  ;;  %vm476_vm0 = vcmp.ge.s32.totalorder %v6278_v18, 1  ;;  %vm492_vm7 = vcmp.le.s32.totalorder %v6278_v18, %v6423_v27  ;;  %v1646_v49 = vadd.f32 %v1630_v42, %v4671_v25  ;;  %v6518_v25 = vld [vmem:[#allocation67_spill] sm:$0xff]  ;;  %v1631_v36 = vld [vmem:[%s4710_s18 + $0x58] sm:$0xff] }
 0x385   : >> { %vm530_vm12 = vmand %vm514_vm5, %vm6513_vm15  ;;  %vm6517_vm14 = vcmp.le.s32.totalorder %v6516_v54, 127  ;;  %vm500_vm15 = vcmp.le.s32.totalorder %v6286_v57, %v6423_v27  ;;  %v1639_v32 = vadd.f32 %v1623_v14, %v4625_v34  ;;  %v1647_v21 = vadd.f32 %v1631_v36, %v4677_v0  ;;  %v6520_v34 = vld [vmem:[#allocation83_spill] sm:$0xff]  ;;  %v1624_v22 = vld [vmem:[%s4710_s18 + $0x20] sm:$0xff] }
 0x386   : >> { %1306 = vmax.xlane.f32.xlu1 %v4773_v44  ;;  %vm507_vm3 = vmand %vm475_vm4, %vm491_vm2  ;;  %v4873_v50 = vsel %vm530_vm12, %v1645_v1, -inf  ;;  %vm484_vm2 = vcmp.ge.s32.totalorder %v6286_v57, 1  ;;  %vm6519_vm12 = vcmp.le.s32.totalorder %v6518_v25, 127  ;;  %v1640_v17 = vadd.f32 %v1624_v22, %v4631_v10  ;;  %v6522_v42 = vld [vmem:[#allocation69_spill] sm:$0xff] }
 0x387   : >> { %vm523_vm9 = vmand %vm507_vm3, %vm6515_vm11  ;;  %vm493_vm11 = vcmp.le.s32.totalorder %v6281_v23, %v6423_v27  ;;  %v1265_v0 = vld [vmem:[%s4714_s23 + $0x78] sm:$0xff] }
 0x388   : >> { %vm515_vm10 = vmand %vm483_vm6, %vm499_vm13  ;;  %v4883_v26 = vsel %vm523_vm9, %v1638_v51, -inf  ;;  %vm477_vm13 = vcmp.ge.s32.totalorder %v6281_v23, 1  ;;  %vm6521_vm9 = vcmp.le.s32.totalorder %v6520_v34, 127  ;;  %v1625_v34 = vld [vmem:[%s4710_s18 + $0x28] sm:$0xff] }
 0x389   : >> { %vm531_vm5 = vmand %vm515_vm10, %vm6517_vm14 }
 0x38a   : >> { %1308 = vmax.xlane.f32.xlu1 %v4779_v35  ;;  %vm508_vm4 = vmand %vm476_vm0, %vm492_vm7  ;;  %v4893_v2 = vsel %vm531_vm5, %v1646_v49, -inf  ;;  %vm6523_vm7 = vcmp.le.s32.totalorder %v6522_v42, 127  ;;  %v1248_v49 = vld [vmem:[#allocation3 + $0x78] sm:$0xff]  ;;  %vm485_vm5 = vcmp.ge.s32.totalorder %v6412_v20, 1  ;;  %v1626_v42 = vld [vmem:[%s4710_s18 + $0x30] sm:$0xff] }
 0x38b   : >> { %vm524_vm3 = vmand %vm508_vm4, %vm6519_vm12  ;;  %vm501_vm4 = vcmp.le.s32.totalorder %v6412_v20, %v6423_v27  ;;  %v1281_v14 = vadd.f32 %v1265_v0, %v1248_v49  ;;  %vm494_vm12 = vcmp.le.s32.totalorder %v6280_v24, %v6423_v27  ;;  %v1642_v0 = vadd.f32 %v1626_v42, %v4643_v3 }
 0x38c   : >> { %vm516_vm6 = vmand %vm484_vm2, %vm500_vm15  ;;  %v4903_v1 = vsel %vm524_vm3, %v1639_v32, -inf  ;;  %v1632_v32 = vld [vmem:[%s4710_s18 + $0x60] sm:$0xff]  ;;  %vm478_vm15 = vcmp.ge.s32.totalorder %v6280_v24, 1 }
 0x38d   : >> { %vm532_vm10 = vmand %vm516_vm6, %vm6521_vm9  ;;  %v4929_v25 = vsel %vm4166_vm8, %v1281_v14, -inf  ;;  %v1648_v36 = vadd.f32 %v1632_v32, %v4687_v9  ;;  %vm495_vm9 = vcmp.le.s32.totalorder %v6283_v40, %v6423_v27  ;;  %v6527_v9 = vld [vmem:[#allocation71_spill] sm:$0xff]  ;;  %v6529_v14 = vld [vmem:[#allocation73_spill] sm:$0xff] }
 0x38e   : >> { %1310 = vmax.xlane.f32.xlu1 %v4785_v39  ;;  %vm509_vm0 = vmand %vm477_vm13, %vm493_vm11  ;;  %v4910_v51 = vsel %vm532_vm10, %v1647_v21, -inf  ;;  %v6525_v21 = vld [vmem:[#allocation85_spill] sm:$0xff]  ;;  %vm479_vm11 = vcmp.ge.s32.totalorder %v6283_v40, 1  ;;  %vm6528_vm8 = vcmp.le.s32.totalorder %v6527_v9, 127 }
 0x38f   : >> { %vm525_vm14 = vmand %vm509_vm0, %vm6523_vm7  ;;  %vm6526_vm3 = vcmp.le.s32.totalorder %v6525_v21, 127  ;;  %vm480_vm7 = vcmp.ge.s32.totalorder %v6282_v41, 1 }
 0x390   : >> { %v4920_v54 = vsel %vm525_vm14, %v1640_v17, -inf  ;;  %vm517_vm2 = vmand %vm485_vm5, %vm501_vm4  ;;  %v1641_v17 = vadd.f32 %v1625_v34, %v4637_v38  ;;  %vm496_vm14 = vcmp.le.s32.totalorder %v6282_v41, %v6423_v27  ;;  %vm6530_vm5 = vcmp.le.s32.totalorder %v6529_v14, 127  ;;  %v1627_v38 = vld [vmem:[%s4710_s18 + $0x38] sm:$0xff] }
 0x391   : >> { %vm533_vm6 = vmand %vm517_vm2, %vm6526_vm3  ;;  %v1643_v10 = vadd.f32 %v1627_v38, %v4649_v55 }
 0x392   : >> { %1312 = vmax.xlane.f32.xlu1 %v4791_v56  ;;  %vm510_vm13 = vmand %vm478_vm15, %vm494_vm12  ;;  %v4939_v22 = vsel %vm533_vm6, %v1648_v36, -inf  ;;  %v6531_v36 = vld [vmem:[#allocation75_spill] sm:$0xff] }
 0x393   : >> { %vm526_vm10 = vmand %vm510_vm13, %vm6528_vm8  ;;  %vm6532_vm15 = vcmp.le.s32.totalorder %v6531_v36, 127 }
 0x394   : >> { %vm511_vm0 = vmand %vm479_vm11, %vm495_vm9  ;;  %v4949_v49 = vsel %vm526_vm10, %v1641_v17, -inf }
 0x395   : >> { %vm527_vm4 = vmand %vm511_vm0, %vm6530_vm5 }
 0x396   : >> { %1314 = vmax.xlane.f32.xlu1 %v4797_v19  ;;  %vm512_vm2 = vmand %vm480_vm7, %vm496_vm14  ;;  %v4956_v32 = vsel %vm527_vm4, %v1642_v0, -inf }
 0x397   : >> { %vm528_vm12 = vmand %vm512_vm2, %vm6532_vm15 }
 0x398   : >> { %v4962_v21 = vsel %vm528_vm12, %v1643_v10, -inf }
 0x39a   : >> { %1316 = vmax.xlane.f32.xlu1 %v4803_v8 }
 0x39e   : >> { %1318 = vmax.xlane.f32.xlu1 %v4809_v30 }
 0x3a2   : >> { %1320 = vmax.xlane.f32.xlu1 %v4815_v58 }
 0x3a6   : >> { %1322 = vmax.xlane.f32.xlu1 %v4824_v7 }
 0x3aa   : >> { %1324 = vmax.xlane.f32.xlu1 %v4833_v37 }
 0x3ae   : >> { %1668 = vmax.xlane.f32.xlu1 %v4843_v61 }
 0x3b2   : >> { %1684 = vmax.xlane.f32.xlu1 %v4853_v16 }
 0x3b6   : >> { %1670 = vmax.xlane.f32.xlu1 %v4863_v60 }
 0x3ba   : >> { %1686 = vmax.xlane.f32.xlu1 %v4873_v50 }
 0x3be   : >> { %1672 = vmax.xlane.f32.xlu1 %v4883_v26 }
 0x3c2   : >> { %1688 = vmax.xlane.f32.xlu1 %v4893_v2 }
 0x3c6   : >> { %1674 = vmax.xlane.f32.xlu1 %v4903_v1 }
 0x3ca   : >> { %1690 = vmax.xlane.f32.xlu1 %v4910_v51 }
 0x3ce   : >> { %1676 = vmax.xlane.f32.xlu1 %v4920_v54 }
 0x3d2   : >> { %1328 = vmax.xlane.f32.xlu1 %v4929_v25 }
 0x3d6   : >> { %1692 = vmax.xlane.f32.xlu1 %v4939_v22 }
 0x3da   : >> { %1678 = vmax.xlane.f32.xlu1 %v4949_v49 }
 0x3de   : >> { %1680 = vmax.xlane.f32.xlu1 %v4956_v32 }
 0x3e2   : >> { %1682 = vmax.xlane.f32.xlu1 %v4962_v21 }
 0x403   : >> { %v4965_v3 = vpop.xlane.xlu1 %1298 }
 0x404   : >> { %vm1330_vm3 = vcmp.gt.f32.partialorder %v4965_v3, -inf }
 0x405   : >> { %v4971_v34 = vsel %vm1330_vm3, %v4965_v3, 0.0 }
 0x406   : >> { %v1362_v55 = vsub.f32 %v4728_v15, %v4971_v34 }
 0x407   : >> { %v4975_v17 = vpop.xlane.xlu1 %1300 }
 0x408   : >> { %vm1331_vm6 = vcmp.gt.f32.partialorder %v4975_v17, -inf  ;;  %v1378_v9 = vmul.f32 1.442695, %v1362_v55 }
 0x409   : >> { %v4981_v42 = vsel %vm1331_vm6, %v4975_v17, 0.0 }
 0x40a   : >> { %v1363_v0 = vsub.f32 %v4743_v6, %v4981_v42  ;;  %3009 = vpow2.f32 %v1378_v9 }
 0x40b   : >> { %v4985_v14 = vpop.xlane.xlu1 %1302 }
 0x40c   : >> { %v1380_v38 = vmul.f32 1.442695, %v1363_v0  ;;  %vm1332_vm13 = vcmp.gt.f32.partialorder %v4985_v14, -inf }
 0x40d   : >> { %v4991_v15 = vsel %vm1332_vm13, %v4985_v14, 0.0 }
 0x40e   : >> { %v1364_v10 = vsub.f32 %v4755_v62, %v4991_v15  ;;  %3011 = vpow2.f32 %v1380_v38 }
 0x40f   : >> { %v4995_v36 = vpop.xlane.xlu1 %1304 }
 0x410   : >> { %v1382_v55 = vmul.f32 1.442695, %v1364_v10  ;;  %vm1333_vm11 = vcmp.gt.f32.partialorder %v4995_v36, -inf }
 0x411   : >> { %v5001_v6 = vsel %vm1333_vm11, %v4995_v36, 0.0 }
 0x412   : >> { %v1365_v9 = vsub.f32 %v4766_v43, %v5001_v6  ;;  %3013 = vpow2.f32 %v1382_v55 }
 0x413   : >> { %v5005_v0 = vpop.xlane.xlu1 %1306 }
 0x414   : >> { %v1384_v31 = vmul.f32 1.442695, %v1365_v9  ;;  %vm1334_vm9 = vcmp.gt.f32.partialorder %v5005_v0, -inf  ;;  %v3010_v62 = vpop.eup %3009 }
 0x415   : >> { %v5011_v38 = vsel %vm1334_vm9, %v5005_v0, 0.0  ;;  %2738 = vmatprep.mubr.f32.mxu1 %v3010_v62 }
 0x416   : >> { %v1366_v10 = vsub.f32 %v4773_v44, %v5011_v38  ;;  %3015 = vpow2.f32 %v1384_v31  ;;  %v6533_v44 = vmov 1.0|1.0  }
 0x417   : >> { %v5015_v48 = vpop.xlane.xlu1 %1308 }
 0x418   : >> { %v1386_v43 = vmul.f32 1.442695, %v1366_v10  ;;  %vm1335_vm8 = vcmp.gt.f32.partialorder %v5015_v48, -inf  ;;  %v3012_v55 = vpop.eup %3011 }
 0x419   : >> { %v5021_v9 = vsel %vm1335_vm8, %v5015_v48, 0.0  ;;  %2739 = vmatmul.mubr.f32.vlgmr.msra.gmra.mrb[0].mxu1 %v3012_v55 }
 0x41a   : >> { %3017 = vpow2.f32 %v1386_v43  ;;  %v1367_v52 = vsub.f32 %v4779_v35, %v5021_v9  ;;  %2874 = vmatpush3.bf16.msra.mxu1 %v6533_v44 }
 0x41b   : >> { %v5025_v5 = vpop.xlane.xlu1 %1310  ;;  %2867 = vmatprep.subr.bf16.mxu1 %v6533_v44 }
 0x41c   : >> { %v1388_v31 = vmul.f32 1.442695, %v1367_v52  ;;  %vm1336_vm10 = vcmp.gt.f32.partialorder %v5025_v5, -inf  ;;  %v3014_v62 = vpop.eup %3013 }
 0x41d   : >> { %v5033_v10 = vsel %vm1336_vm10, %v5025_v5, 0.0  ;;  %2741 = vmatprep.mubr.f32.mxu1 %v3014_v62 }
 0x41e   : >> { %3019 = vpow2.f32 %v1388_v31  ;;  %v1368_v35 = vsub.f32 %v4785_v39, %v5033_v10  ;;  %2875 = vmatpush3.bf16.msra.mxu1 %v6533_v44 }
 0x41f   : >> { %v5037_v43 = vpop.xlane.xlu1 %1312  ;;  %2868 = vmatprep.subr.bf16.mxu1 %v6533_v44 }
 0x420   : >> { %v1390_v52 = vmul.f32 1.442695, %v1368_v35  ;;  %vm6188_vm0 = vcmp.gt.f32.partialorder %v5037_v43, -inf  ;;  %v3016_v55 = vpop.eup %3015 }
 0x421   : >> { %v5045_v33 = vsel %vm6188_vm0, %v5037_v43, 0.0  ;;  %2742 = vmatmul.mubr.f32.gmra.mrb[2].mxu1 %v3016_v55 }
 0x422   : >> { %3021 = vpow2.f32 %v1390_v52  ;;  %v1369_v39 = vsub.f32 %v4791_v56, %v5045_v33  ;;  %2876 = vmatpush3.bf16.msra.mxu1 %v6533_v44 }
 0x423   : >> { %v5049_v31 = vpop.xlane.xlu1 %1314  ;;  %2869 = vmatprep.subr.bf16.mxu1 %v6533_v44 }
 0x424   : >> { %v3018_v62 = vpop.eup %3017  ;;  %v1392_v35 = vmul.f32 1.442695, %v1369_v39  ;;  %vm1338_vm7 = vcmp.gt.f32.partialorder %v5049_v31, -inf }
 0x425   : >> { %v5057_v20 = vsel %vm1338_vm7, %v5049_v31, 0.0  ;;  %2744 = vmatprep.mubr.f32.mxu1 %v3018_v62 }
 0x426   : >> { %3023 = vpow2.f32 %v1392_v35  ;;  %v1370_v56 = vsub.f32 %v4797_v19, %v5057_v20  ;;  %2877 = vmatpush3.bf16.msra.mxu1 %v6533_v44 }
 0x427   : >> { %v5061_v52 = vpop.xlane.xlu1 %1316  ;;  %2870 = vmatprep.subr.bf16.mxu1 %v6533_v44 }
 0x428   : >> { %v3020_v55 = vpop.eup %3019  ;;  %v1394_v39 = vmul.f32 1.442695, %v1370_v56  ;;  %vm6187_vm14 = vcmp.gt.f32.partialorder %v5061_v52, -inf }
 0x429   : >> { %v5069_v28 = vsel %vm6187_vm14, %v5061_v52, 0.0  ;;  %2745 = vmatmul.mubr.f32.gmra.mrb[4].mxu1 %v3020_v55  ;;  %v5083_v55 = vpop.xlane.xlu0 %1326 }
 0x42a   : >> { %3025 = vpow2.f32 %v1394_v39  ;;  %v1371_v19 = vsub.f32 %v4803_v8, %v5069_v28  ;;  %2878 = vmatpush3.bf16.msra.mxu1 %v6533_v44  ;;  %6534 = vst [vmem:[#allocation100_spill] sm:$0xff] %v5083_v55  ;;  %vm6172_vm2 = vcmp.gt.f32.partialorder %v5083_v55, -inf }
 0x42b   : >> { %v5073_v62 = vpop.xlane.xlu1 %1318  ;;  %2871 = vmatprep.subr.bf16.mxu1 %v6533_v44  ;;  %v5106_v47 = vsel %vm6172_vm2, %v5083_v55, 0.0 }
 0x42c   : >> { %v3022_v35 = vpop.eup %3021  ;;  %v1396_v56 = vmul.f32 1.442695, %v1371_v19  ;;  %vm6186_vm5 = vcmp.gt.f32.partialorder %v5073_v62, -inf  ;;  %6536 = vst [vmem:[#allocation104_spill] sm:$0xff] %v5106_v47 }
 0x42d   : >> { %v5081_v53 = vsel %vm6186_vm5, %v5073_v62, 0.0  ;;  %2747 = vmatprep.mubr.f32.mxu1 %v3022_v35 }
 0x42e   : >> { %3027 = vpow2.f32 %v1396_v56  ;;  %v1372_v8 = vsub.f32 %v4809_v30, %v5081_v53  ;;  %2879 = vmatpush3.bf16.msra.mxu1 %v6533_v44 }
 0x42f   : >> { %v5087_v39 = vpop.xlane.xlu1 %1320  ;;  %2872 = vmatprep.subr.bf16.mxu1 %v6533_v44 }
 0x430   : >> { %v3024_v19 = vpop.eup %3023  ;;  %v1398_v57 = vmul.f32 1.442695, %v1372_v8  ;;  %vm6181_vm4 = vcmp.gt.f32.partialorder %v5087_v39, -inf }
 0x431   : >> { %v5096_v35 = vsel %vm6181_vm4, %v5087_v39, 0.0  ;;  %2748 = vmatmul.mubr.f32.gmra.mrb[6].mxu1 %v3024_v19  ;;  %v1376_v19 = vsub.f32 %v4724_v13, %v5106_v47 }
 0x432   : >> { %3029 = vpow2.f32 %v1398_v57  ;;  %v1373_v30 = vsub.f32 %v4815_v58, %v5096_v35  ;;  %2880 = vmatpush3.bf16.msra.mxu1 %v6533_v44 }
 0x433   : >> { %v5100_v56 = vpop.xlane.xlu1 %1322  ;;  %2873 = vmatprep.subr.bf16.mxu1 %v6533_v44 }
 0x434   : >> { %6535 = vst [vmem:[#allocation98_spill] sm:$0xff] %v5100_v56  ;;  %v3026_v8 = vpop.eup %3025  ;;  %v1400_v45 = vmul.f32 1.442695, %v1373_v30  ;;  %vm6178_vm15 = vcmp.gt.f32.partialorder %v5100_v56, -inf }
 0x435   : >> { %v5113_v57 = vsel %vm6178_vm15, %v5100_v56, 0.0  ;;  %2750 = vmatprep.mubr.f32.mxu1 %v3026_v8 }
 0x436   : >> { %3031 = vpow2.f32 %v1400_v45  ;;  %v1374_v58 = vsub.f32 %v4824_v7, %v5113_v57  ;;  %2881 = vmatpush3.bf16.msra.mxu1 %v6533_v44  ;;  %v1406_v7 = vmul.f32 1.442695, %v1376_v19 }
 0x437   : >> { %v5119_v40 = vpop.xlane.xlu1 %1324 }
 0x438   : >> { %6537 = vst [vmem:[#allocation102_spill] sm:$0xff] %v5119_v40  ;;  %v3028_v30 = vpop.eup %3027  ;;  %v1402_v41 = vmul.f32 1.442695, %v1374_v58  ;;  %vm6175_vm12 = vcmp.gt.f32.partialorder %v5119_v40, -inf }
 0x439   : >> { %v5126_v23 = vsel %vm6175_vm12, %v5119_v40, 0.0  ;;  %2751 = vmatmul.mubr.f32.gmra.mrb[8].mxu1 %v3028_v30 }
 0x43a   : >> { %3033 = vpow2.f32 %v1402_v41  ;;  %v1375_v45 = vsub.f32 %v4833_v37, %v5126_v23 }
 0x43b   : >> { %v5130_v13 = vpop.xlane.xlu1 %1668 }
 0x43c   : >> { %v3030_v8 = vpop.eup %3029  ;;  %v1404_v24 = vmul.f32 1.442695, %v1375_v45  ;;  %vm1700_vm1 = vcmp.gt.f32.partialorder %v5130_v13, -inf }
 0x43d   : >> { %v5136_v44 = vsel %vm1700_vm1, %v5130_v13, 0.0  ;;  %2753 = vmatprep.mubr.f32.mxu1 %v3030_v8 }
 0x43e   : >> { %3035 = vpow2.f32 %v1404_v24  ;;  %v1732_v41 = vsub.f32 %v4843_v61, %v5136_v44 }
 0x43f   : >> { %3037 = vpow2.f32 %v1406_v7  ;;  %v5140_v58 = vpop.xlane.xlu1 %1684 }
 0x440   : >> { %6538 = vst [vmem:[#allocation99_spill] sm:$0xff] %v5140_v58  ;;  %v3032_v37 = vpop.eup %3031  ;;  %v1748_v19 = vmul.f32 1.442695, %v1732_v41  ;;  %vm6190_vm4 = vcmp.gt.f32.partialorder %v5140_v58, -inf }
 0x441   : >> { %2754 = vmatmul.mubr.f32.gmra.mrb[10].mxu1 %v3032_v37  ;;  %v5186_v4 = vsel %vm6190_vm4, %v5140_v58, 0.0 }
 0x442   : >> { %3039 = vpow2.f32 %v1748_v19  ;;  %6543 = vst [vmem:[#allocation107_spill] sm:$0xff] %v5186_v4 }
 0x443   : >> { %v5142_v30 = vpop.xlane.xlu1 %1670 }
 0x444   : >> { %v3034_v45 = vpop.eup %3033  ;;  %vm1701_vm2 = vcmp.gt.f32.partialorder %v5142_v30, -inf }
 0x445   : >> { %v5148_v8 = vsel %vm1701_vm2, %v5142_v30, 0.0  ;;  %2756 = vmatprep.mubr.f32.mxu1 %v3034_v45 }
 0x446   : >> { %v1733_v24 = vsub.f32 %v4863_v60, %v5148_v8 }
 0x447   : >> { %v5152_v61 = vpop.xlane.xlu1 %1686 }
 0x448   : >> { %6539 = vst [vmem:[#allocation105_spill] sm:$0xff] %v5152_v61  ;;  %v3036_v7 = vpop.eup %3035  ;;  %v1750_v41 = vmul.f32 1.442695, %v1733_v24  ;;  %vm6201_vm5 = vcmp.gt.f32.partialorder %v5152_v61, -inf }
 0x449   : >> { %v3038_v37 = vpop.eup %3037  ;;  %2757 = vmatmul.mubr.f32.gmra.mrb[12].mxu1 %v3036_v7  ;;  %v5205_v27 = vsel %vm6201_vm5, %v5152_v61, 0.0 }
 0x44a   : >> { %3041 = vpow2.f32 %v1750_v41  ;;  %2759 = vmatprep.mubr.f32.mxu1 %v3038_v37  ;;  %6545 = vst [vmem:[#allocation68_spill] sm:$0xff] %v5205_v27 }
 0x44b   : >> { %v5154_v19 = vpop.xlane.xlu1 %1672 }
 0x44c   : >> { %v3040_v12 = vpop.eup %3039  ;;  %vm1702_vm12 = vcmp.gt.f32.partialorder %v5154_v19, -inf }
 0x44d   : >> { %v5160_v45 = vsel %vm1702_vm12, %v5154_v19, 0.0  ;;  %2794 = vmatprep.mubr.f32.mxu0 %v3040_v12 }
 0x44e   : >> { %v1734_v60 = vsub.f32 %v4883_v26, %v5160_v45  ;;  %v5178_v26 = vpop.xlane.xlu0 %1694 }
 0x44f   : >> { %v5164_v18 = vpop.xlane.xlu1 %1688  ;;  %6542 = vst [vmem:[#allocation103_spill] sm:$0xff] %v5178_v26 }
 0x450   : >> { %6540 = vst [vmem:[#allocation101_spill] sm:$0xff] %v5164_v18  ;;  %v1752_v24 = vmul.f32 1.442695, %v1734_v60  ;;  %vm6196_vm0 = vcmp.gt.f32.partialorder %v5164_v18, -inf }
 0x452   : >> { %3043 = vpow2.f32 %v1752_v24 }
 0x453   : >> { %v5166_v7 = vpop.xlane.xlu1 %1674 }
 0x454   : >> { %v3042_v41 = vpop.eup %3041  ;;  %vm1703_vm15 = vcmp.gt.f32.partialorder %v5166_v7, -inf }
 0x455   : >> { %v5172_v37 = vsel %vm1703_vm15, %v5166_v7, 0.0  ;;  %2795 = vmatmul.mubr.f32.vlgmr.msra.gmra.mrb[16].mxu0 %v3042_v41  ;;  %v5196_v41 = vpop.xlane.xlu0 %1696 }
 0x456   : >> { %v1735_v12 = vsub.f32 %v4903_v1, %v5172_v37  ;;  %6544 = vst [vmem:[#allocation94_spill] sm:$0xff] %v5196_v41 }
 0x457   : >> { %v5176_v11 = vpop.xlane.xlu1 %1690 }
 0x458   : >> { %6541 = vst [vmem:[#allocation106_spill] sm:$0xff] %v5176_v11  ;;  %v1754_v60 = vmul.f32 1.442695, %v1735_v12  ;;  %vm6202_vm4 = vcmp.gt.f32.partialorder %v5176_v11, -inf }
 0x459   : >> { %v5226_v61 = vsel %vm6202_vm4, %v5176_v11, 0.0  ;;  %v5235_v47 = vpop.xlane.xlu0 %1698  ;;  %vm6209_vm4 = vcmp.gt.f32.partialorder %v5196_v41, -inf }
 0x45a   : >> { %3045 = vpow2.f32 %v1754_v60  ;;  %v1740_v60 = vsub.f32 %v4853_v16, %v5186_v4  ;;  %6549 = vst [vmem:[#allocation70_spill] sm:$0xff] %v5226_v61  ;;  %6551 = vst [vmem:[#allocation74_spill] sm:$0xff] %v5235_v47 }
 0x45b   : >> { %v5181_v24 = vpop.xlane.xlu1 %1676 }
 0x45c   : >> { %v3044_v46 = vpop.eup %3043  ;;  %vm6193_vm14 = vcmp.gt.f32.partialorder %v5181_v24, -inf }
 0x45d   : >> { %v5194_v1 = vsel %vm6193_vm14, %v5181_v24, 0.0  ;;  %2797 = vmatprep.mubr.f32.mxu0 %v3044_v46  ;;  %v5213_v46 = vsel %vm6196_vm0, %v5164_v18, 0.0  ;;  %vm1713_vm0 = vcmp.gt.f32.partialorder %v5178_v26, -inf }
 0x45e   : >> { %v1736_v12 = vsub.f32 %v4920_v54, %v5194_v1  ;;  %6547 = vst [vmem:[#allocation72_spill] sm:$0xff] %v5213_v46  ;;  %v1741_v54 = vsub.f32 %v4873_v50, %v5205_v27  ;;  %v1742_v4 = vsub.f32 %v4893_v2, %v5213_v46  ;;  %v5249_v2 = vsel %vm1713_vm0, %v5178_v26, 0.0 }
 0x45f   : >> { %v5208_v58 = vpop.xlane.xlu1 %1328  ;;  %6553 = vst [vmem:[#allocation78_spill] sm:$0xff] %v5249_v2 }
 0x460   : >> { %6546 = vst [vmem:[#allocation87_spill] sm:$0xff] %v5208_v58  ;;  %v1756_v55 = vmul.f32 1.442695, %v1736_v12  ;;  %vm6203_vm14 = vcmp.gt.f32.partialorder %v5208_v58, -inf  ;;  %v1764_v12 = vmul.f32 1.442695, %v1740_v60 }
 0x461   : >> { %v5219_v16 = vsel %vm6203_vm14, %v5208_v58, 0.0  ;;  %v1766_v60 = vmul.f32 1.442695, %v1741_v54  ;;  %vm6212_vm14 = vcmp.gt.f32.partialorder %v5235_v47, -inf  ;;  %v1745_v54 = vsub.f32 %v4739_v59, %v5249_v2 }
 0x462   : >> { %6548 = vst [vmem:[#allocation89_spill] sm:$0xff] %v5219_v16  ;;  %3047 = vpow2.f32 %v1756_v55  ;;  %v1377_v18 = vsub.f32 %v4929_v25, %v5219_v16  ;;  %v1743_v55 = vsub.f32 %v4910_v51, %v5226_v61 }
 0x463   : >> { %v5233_v58 = vpop.xlane.xlu1 %1692 }
 0x464   : >> { %6550 = vst [vmem:[#allocation91_spill] sm:$0xff] %v5233_v58  ;;  %v3046_v40 = vpop.eup %3045  ;;  %v1408_v50 = vmul.f32 1.442695, %v1377_v18  ;;  %vm6205_vm5 = vcmp.gt.f32.partialorder %v5233_v58, -inf  ;;  %v1768_v18 = vmul.f32 1.442695, %v1742_v4 }
 0x465   : >> { %v5244_v25 = vsel %vm6205_vm5, %v5233_v58, 0.0  ;;  %2798 = vmatmul.mubr.f32.gmra.mrb[18].mxu0 %v3046_v40  ;;  %v5259_v40 = vsel %vm6209_vm4, %v5196_v41, 0.0 }
 0x466   : >> { %6552 = vst [vmem:[#allocation76_spill] sm:$0xff] %v5244_v25  ;;  %3049 = vpow2.f32 %v1408_v50  ;;  %v1744_v51 = vsub.f32 %v4939_v22, %v5244_v25  ;;  %6554 = vst [vmem:[#allocation80_spill] sm:$0xff] %v5259_v40  ;;  %v1770_v50 = vmul.f32 1.442695, %v1743_v55  ;;  %v5272_v22 = vsel %vm6212_vm14, %v5235_v47, 0.0 }
 0x467   : >> { %3051 = vpow2.f32 %v1764_v12  ;;  %v5254_v11 = vpop.xlane.xlu1 %1678  ;;  %6555 = vst [vmem:[#allocation82_spill] sm:$0xff] %v5272_v22  ;;  %v1746_v41 = vsub.f32 %v4751_v63, %v5259_v40  ;;  %v1774_v25 = vmul.f32 1.442695, %v1745_v54  ;;  %v1747_v47 = vsub.f32 %v4762_v29, %v5272_v22 }
 0x468   : >> { %vm1705_vm5 = vcmp.gt.f32.partialorder %v5254_v11, -inf  ;;  %3053 = vpow2.f32 %v1766_v60  ;;  %v1772_v59 = vmul.f32 1.442695, %v1744_v51 }
 0x469   : >> { %v5267_v4 = vsel %vm1705_vm5, %v5254_v11, 0.0  ;;  %3055 = vpow2.f32 %v1768_v18  ;;  %v1776_v60 = vmul.f32 1.442695, %v1746_v41 }
 0x46a   : >> { %v1737_v12 = vsub.f32 %v4949_v49, %v5267_v4  ;;  %3057 = vpow2.f32 %v1770_v50  ;;  %v1778_v50 = vmul.f32 1.442695, %v1747_v47 }
 0x46b   : >> { %v5278_v55 = vpop.xlane.xlu1 %1680 }
 0x46c   : >> { %v3048_v58 = vpop.eup %3047  ;;  %v1758_v26 = vmul.f32 1.442695, %v1737_v12  ;;  %vm1706_vm4 = vcmp.gt.f32.partialorder %v5278_v55, -inf }
 0x46d   : >> { %v5286_v49 = vsel %vm1706_vm4, %v5278_v55, 0.0  ;;  %2800 = vmatprep.mubr.f32.mxu0 %v3048_v58 }
 0x46e   : >> { %3059 = vpow2.f32 %v1758_v26  ;;  %v1738_v63 = vsub.f32 %v4956_v32, %v5286_v49 }
 0x46f   : >> { %3061 = vpow2.f32 %v1772_v59  ;;  %v5290_v18 = vpop.xlane.xlu1 %1682 }
 0x470   : >> { %v3050_v51 = vpop.eup %3049  ;;  %v1760_v54 = vmul.f32 1.442695, %v1738_v63  ;;  %vm1707_vm14 = vcmp.gt.f32.partialorder %v5290_v18, -inf  ;;  %3063 = vpow2.f32 %v1774_v25 }
 0x471   : >> { %v3052_v29 = vpop.eup %3051  ;;  %v5296_v12 = vsel %vm1707_vm14, %v5290_v18, 0.0  ;;  %2760 = vmatmul.mubr.f32.gmra.mrb[14].mxu1 %v3050_v51 }
 0x472   : >> { %3065 = vpow2.f32 %v1760_v54  ;;  %v1739_v32 = vsub.f32 %v4962_v21, %v5296_v12  ;;  %2806 = vmatprep.mubr.f32.mxu1 %v3052_v29  ;;  %v3054_v58 = vpop.eup %3053 }
 0x473   : >> { %3067 = vpow2.f32 %v1776_v60  ;;  %v3056_v41 = vpop.eup %3055 }
 0x474   : >> { %v1762_v26 = vmul.f32 1.442695, %v1739_v32  ;;  %3069 = vpow2.f32 %v1778_v50  ;;  %v3058_v47 = vpop.eup %3057 }
 0x475   : >> { %2807 = vmatmul.mubr.f32.vlgmr.msra.gmra.mrb[16].mxu1 %v3054_v58 }
 0x476   : >> { %3071 = vpow2.f32 %v1762_v26  ;;  %2809 = vmatprep.mubr.f32.mxu1 %v3056_v41 }
 0x478   : >> { %v3060_v25 = vpop.eup %3059 }
 0x479   : >> { %v3062_v59 = vpop.eup %3061  ;;  %2801 = vmatmul.mubr.f32.gmra.mrb[20].mxu0 %v3060_v25  ;;  %2810 = vmatmul.mubr.f32.gmra.mrb[18].mxu1 %v3058_v47 }
 0x47a   : >> { %2812 = vmatprep.mubr.f32.mxu1 %v3062_v59  ;;  %v3064_v63 = vpop.eup %3063 }
 0x47c   : >> { %v3066_v51 = vpop.eup %3065 }
 0x47d   : >> { %v3068_v54 = vpop.eup %3067  ;;  %2803 = vmatprep.mubr.f32.mxu0 %v3066_v51  ;;  %2813 = vmatmul.mubr.f32.gmra.mrb[20].mxu1 %v3064_v63 }
 0x47e   : >> { %2815 = vmatprep.mubr.f32.mxu1 %v3068_v54  ;;  %v3070_v21 = vpop.eup %3069 }
 0x480   : >> { %v3072_v60 = vpop.eup %3071 }
 0x481   : >> { %2804 = vmatmul.mubr.f32.gmra.mrb[22].mxu0 %v3072_v60  ;;  %2816 = vmatmul.mubr.f32.gmra.mrb[22].mxu1 %v3070_v21 }
 0x4ec   : >> { %v2740_v29 = vpop.f32.mrb[0].mxu1 }
 0x4ed   : >> { %v1476_v50 = vpop.f32.mrb[1].mxu1 }
 0x4f4   : >> { %v2743_v32 = vpop.f32.mrb[2].mxu1 }
 0x4f5   : >> { %v1486_v58 = vpop.f32.mrb[3].mxu1 }
 0x4fc   : >> { %v2746_v26 = vpop.f32.mrb[4].mxu1 }
 0x4fd   : >> { %v1496_v41 = vpop.f32.mrb[5].mxu1 }
 0x504   : >> { %v5300_v40 = vpop.f32.mrb[6].mxu1 }
 0x505   : >> { %v1506_v47 = vpop.f32.mrb[7].mxu1 }
 0x50c   : >> { %v5302_v25 = vpop.f32.mrb[8].mxu1 }
 0x50d   : >> { %v1516_v59 = vpop.f32.mrb[9].mxu1 }
 0x50e   : >> { %3073 = vlog2.f32 %v1516_v59 }
 0x514   : >> { %v5304_v51 = vpop.f32.mrb[10].mxu1 }
 0x515   : >> { %v5306_v63 = vpop.f32.mrb[11].mxu1 }
 0x518   : >> { %v3074_v54 = vpop.eup %3073 }
 0x519   : >> { %v1572_v60 = vmul.f32 0.6931472, %v3074_v54 }
 0x51b   : >> { %v1595_v21 = vadd.f32 %v1572_v60, %v5057_v20 }
 0x51c   : >> { %v5309_v22 = vpop.f32.mrb[12].mxu1 }
 0x51d   : >> { %v5311_v2 = vpop.f32.mrb[13].mxu1  ;;  %v5315_v46 = vsel %vm1338_vm7, %v1595_v21, -inf }
 0x51e   : >> { %2179 = vperm.xlu1 %2944, %v5315_v46  }
 0x528   : >> { %v2796_v61 = vpop.f32.mrb[16].mxu0 }
 0x529   : >> { %3075 = vlog2.f32 %v2796_v61  ;;  %v1846_v59 = vpop.f32.mrb[17].mxu0 }
 0x52a   : >> { %3077 = vlog2.f32 %v1846_v59 }
 0x52b   : >> { %3079 = vlog2.f32 %v1476_v50 }
 0x52c   : >> { %3081 = vlog2.f32 %v2740_v29 }
 0x52d   : >> { %3083 = vlog2.f32 %v1486_v58 }
 0x533   : >> { %v3076_v27 = vpop.eup %3075 }
 0x534   : >> { %v3078_v16 = vpop.eup %3077  ;;  %v1928_v54 = vmul.f32 0.6931472, %v3076_v27 }
 0x535   : >> { %v1926_v20 = vmul.f32 0.6931472, %v3078_v16  ;;  %v3080_v50 = vpop.eup %3079 }
 0x536   : >> { %v1958_v60 = vadd.f32 %v1928_v54, %v5148_v8  ;;  %v1556_v8 = vmul.f32 0.6931472, %v3080_v50  ;;  %v3082_v16 = vpop.eup %3081 }
 0x537   : >> { %v1957_v21 = vadd.f32 %v1926_v20, %v5136_v44  ;;  %v3084_v30 = vpop.eup %3083  ;;  %v1558_v29 = vmul.f32 0.6931472, %v3082_v16 }
 0x538   : >> { %v2799_v56 = vpop.f32.mrb[18].mxu0  ;;  %v5321_v31 = vsel %vm1701_vm2, %v1958_v60, -inf  ;;  %v1587_v44 = vadd.f32 %v1556_v8, %v4971_v34  ;;  %v1560_v60 = vmul.f32 0.6931472, %v3084_v30 }
 0x539   : >> { %3085 = vlog2.f32 %v2799_v56  ;;  %2048 = vperm.xlu0 %2943, %v5321_v31   ;;  %v1856_v61 = vpop.f32.mrb[19].mxu0  ;;  %v5327_v27 = vsel %vm1700_vm1, %v1957_v21, -inf  ;;  %vm6556_vm1 = vcmp.gt.f32.partialorder %v5181_v24, -inf }
 0x53a   : >> { %3087 = vlog2.f32 %v1856_v61  ;;  %v5338_v21 = vsel %vm1330_vm3, %v1587_v44, -inf  ;;  %v1589_v8 = vadd.f32 %v1560_v60, %v4991_v15  ;;  %vm6557_vm3 = vcmp.gt.f32.partialorder %v5037_v43, -inf }
 0x53b   : >> { %3089 = vlog2.f32 %v2743_v32  ;;  %v1588_v32 = vadd.f32 %v1558_v29, %v4981_v42 }
 0x53c   : >> { %3091 = vlog2.f32 %v1496_v41 }
 0x53d   : >> { %2043 = vperm.xlu0 %2943, %v5327_v27   ;;  %3093 = vlog2.f32 %v2746_v26 }
 0x53e   : >> { %3095 = vlog2.f32 %v1506_v47 }
 0x53f   : >> { %3097 = vlog2.f32 %v5300_v40  ;;  %v5371_v40 = vsel %vm1332_vm13, %v1589_v8, -inf  ;;  %vm6559_vm13 = vcmp.gt.f32.partialorder %v5073_v62, -inf }
 0x543   : >> { %v3086_v56 = vpop.eup %3085 }
 0x544   : >> { %v3088_v58 = vpop.eup %3087  ;;  %v1932_v59 = vmul.f32 0.6931472, %v3086_v56  ;;  %v5331_v54 = vpop.f32.mrb[14].mxu1 }
 0x545   : >> { %v1930_v20 = vmul.f32 0.6931472, %v3088_v58  ;;  %v5333_v13 = vpop.f32.mrb[15].mxu1  ;;  %v3090_v61 = vpop.eup %3089 }
 0x546   : >> { %v1960_v41 = vadd.f32 %v1932_v59, %v5172_v37  ;;  %v1562_v3 = vmul.f32 0.6931472, %v3090_v61  ;;  %v5355_v37 = vsel %vm1331_vm6, %v1588_v32, -inf  ;;  %v3092_v16 = vpop.eup %3091  ;;  %vm6558_vm6 = vcmp.gt.f32.partialorder %v5061_v52, -inf }
 0x547   : >> { %1989 = vxpose.xlu1.b32.start [1/16] (narrow) %v5338_v21, 8  ;;  %v1959_v50 = vadd.f32 %v1930_v20, %v5160_v45  ;;  %v3094_v17 = vpop.eup %3093  ;;  %v1564_v44 = vmul.f32 0.6931472, %v3092_v16 }
 0x548   : >> { %v5342_v34 = vpop.f32.mrb[16].mxu1  ;;  %v5346_v26 = vsel %vm1703_vm15, %v1960_v41, -inf  ;;  %v1590_v29 = vadd.f32 %v1562_v3, %v5001_v6  ;;  %v1566_v56 = vmul.f32 0.6931472, %v3094_v17  ;;  %v3096_v6 = vpop.eup %3095 }
 0x549   : >> { %2058 = vperm.xlu0 %2943, %v5346_v26   ;;  %v5350_v42 = vpop.f32.mrb[17].mxu1  ;;  %v5363_v45 = vsel %vm1702_vm12, %v1959_v50, -inf  ;;  %v1591_v59 = vadd.f32 %v1564_v44, %v5011_v38  ;;  %v3098_v50 = vpop.eup %3097  ;;  %v1568_v38 = vmul.f32 0.6931472, %v3096_v6 }
 0x54a   : >> { %v5381_v20 = vsel %vm1333_vm11, %v1590_v29, -inf  ;;  %v1592_v60 = vadd.f32 %v1566_v56, %v5021_v9  ;;  %v1570_v16 = vmul.f32 0.6931472, %v3098_v50  ;;  %vm6560_vm11 = vcmp.gt.f32.partialorder %v5087_v39, -inf }
 0x54b   : >> { %1990 = vxpose.xlu1.b32.cont [2/16] (narrow) %v5355_v37, 8  ;;  %v5392_v36 = vsel %vm1334_vm9, %v1591_v59, -inf }
 0x54c   : >> { %v2802_v7 = vpop.f32.mrb[20].mxu0  ;;  %v5359_v30 = vpop.f32.mrb[18].mxu1  ;;  %v5398_v9 = vsel %vm1335_vm8, %v1592_v60, -inf }
 0x54d   : >> { %3099 = vlog2.f32 %v2802_v7  ;;  %2053 = vperm.xlu0 %2943, %v5363_v45   ;;  %v1866_v15 = vpop.f32.mrb[21].mxu0  ;;  %v5366_v47 = vpop.f32.mrb[19].mxu1  ;;  %v1593_v7 = vadd.f32 %v1568_v38, %v5033_v10 }
 0x54e   : >> { %3101 = vlog2.f32 %v1866_v15 }
 0x54f   : >> { %1991 = vxpose.xlu1.b32.cont [3/16] (narrow) %v5371_v40, 8  ;;  %3103 = vlog2.f32 %v5302_v25  ;;  %v1609_v10 = vsel %vm1336_vm10, %v1593_v7, -inf  ;;  %v6569_v7 = vld [vmem:[#allocation87_spill] sm:$0xff] }
 0x550   : >> { %v5374_v19 = vpop.f32.mrb[20].mxu1  ;;  %vm6570_vm7 = vcmp.gt.f32.partialorder %v6569_v7, -inf  ;;  %v6602_v7 = vld [vmem:[#allocation16_spill] sm:$0xff] }
 0x551   : >> { %v5376_v58 = vpop.f32.mrb[21].mxu1 }
 0x553   : >> { %1992 = vxpose.xlu1.b32.cont [4/16] (narrow) %v5381_v20, 8 }
 0x554   : >> { %v2805_v14 = vpop.f32.mrb[22].mxu0  ;;  %v5385_v32 = vpop.f32.mrb[22].mxu1 }
 0x555   : >> { %3105 = vlog2.f32 %v2805_v14  ;;  %v1876_v41 = vpop.f32.mrb[23].mxu0  ;;  %v5388_v61 = vpop.f32.mrb[23].mxu1 }
 0x556   : >> { %3107 = vlog2.f32 %v1876_v41 }
 0x557   : >> { %v3100_v3 = vpop.eup %3099  ;;  %1993 = vxpose.xlu1.b32.cont [5/16] (narrow) %v5392_v36, 8  ;;  %3109 = vlog2.f32 %v5306_v63  ;;  %v1594_v63 = vadd.f32 %v1570_v16, %v5045_v33 }
 0x558   : >> { %v1936_v25 = vmul.f32 0.6931472, %v3100_v3  ;;  %v3102_v8 = vpop.eup %3101  ;;  %3111 = vlog2.f32 %v5304_v51  ;;  %v6563_v3 = vld [vmem:[#allocation104_spill] sm:$0xff] }
 0x559   : >> { %v1934_v15 = vmul.f32 0.6931472, %v3102_v8  ;;  %v3104_v48 = vpop.eup %3103  ;;  %3113 = vlog2.f32 %v5311_v2  ;;  %v1610_v33 = vsel %vm6557_vm3, %v1594_v63, -inf  ;;  %v6577_v63 = vld [vmem:[#allocation70_spill] sm:$0xff] }
 0x55a   : >> { %v1962_v0 = vadd.f32 %v1936_v25, %v5267_v4  ;;  %3115 = vlog2.f32 %v5309_v22  ;;  %v6564_v25 = vld [vmem:[#allocation102_spill] sm:$0xff] }
 0x55b   : >> { %1994 = vxpose.xlu1.b32.cont [6/16] (narrow) %v5398_v9, 8  ;;  %v1961_v29 = vadd.f32 %v1934_v15, %v5194_v1  ;;  %v1574_v1 = vmul.f32 0.6931472, %v3104_v48  ;;  %3117 = vlog2.f32 %v5333_v13  ;;  %vm6565_vm8 = vcmp.gt.f32.partialorder %v6564_v25, -inf  ;;  %v6575_v48 = vld [vmem:[#allocation99_spill] sm:$0xff] }
 0x55c   : >> { %v5405_v17 = vsel %vm1705_vm5, %v1962_v0, -inf  ;;  %3119 = vlog2.f32 %v5331_v54  ;;  %v6573_v0 = vld [vmem:[#allocation105_spill] sm:$0xff]  ;;  %vm6576_vm5 = vcmp.gt.f32.partialorder %v6575_v48, -inf }
 0x55d   : >> { %2068 = vperm.xlu0 %2943, %v5405_v17   ;;  %v5415_v11 = vsel %vm6556_vm1, %v1961_v29, -inf  ;;  %v1596_v2 = vadd.f32 %v1574_v1, %v5069_v28  ;;  %3121 = vlog2.f32 %v5342_v34  ;;  %v6579_v1 = vld [vmem:[#allocation106_spill] sm:$0xff] }
 0x55e   : >> { %3123 = vlog2.f32 %v5350_v42  ;;  %v6571_v42 = vld [vmem:[#allocation68_spill] sm:$0xff] }
 0x55f   : >> { %v3106_v44 = vpop.eup %3105  ;;  %1995 = vxpose.xlu1.b32.cont [7/16] (narrow) %v1609_v10, 8  ;;  %v1612_v22 = vsel %vm6558_vm6, %v1596_v2, -inf  ;;  %3125 = vlog2.f32 %v5359_v30  ;;  %v6572_v30 = vld [vmem:[#allocation107_spill] sm:$0xff] }
 0x560   : >> { %v1940_v4 = vmul.f32 0.6931472, %v3106_v44  ;;  %v3108_v56 = vpop.eup %3107  ;;  %3127 = vlog2.f32 %v5366_v47  ;;  %v6578_v44 = vld [vmem:[#allocation72_spill] sm:$0xff] }
 0x561   : >> { %2063 = vperm.xlu0 %2943, %v5415_v11   ;;  %v1938_v51 = vmul.f32 0.6931472, %v3108_v56  ;;  %v3110_v59 = vpop.eup %3109  ;;  %3129 = vlog2.f32 %v5374_v19 }
 0x562   : >> { %v1964_v5 = vadd.f32 %v1940_v4, %v5296_v12  ;;  %v1576_v14 = vmul.f32 0.6931472, %v3110_v59  ;;  %v3112_v60 = vpop.eup %3111  ;;  %3131 = vlog2.f32 %v5376_v58  ;;  %v6583_v59 = vld [vmem:[#allocation78_spill] sm:$0xff] }
 0x563   : >> { %1996 = vxpose.xlu1.b32.cont [8/16] (narrow) %v1610_v33, 8  ;;  %v1963_v24 = vadd.f32 %v1938_v51, %v5286_v49  ;;  %v1578_v18 = vmul.f32 0.6931472, %v3112_v60  ;;  %v3114_v49 = vpop.eup %3113  ;;  %3133 = vlog2.f32 %v5385_v32 }
 0x564   : >> { %v5424_v6 = vsel %vm1707_vm14, %v1964_v5, -inf  ;;  %v1597_v12 = vadd.f32 %v1576_v14, %v5081_v53  ;;  %v3116_v13 = vpop.eup %3115  ;;  %vm6574_vm14 = vcmp.gt.f32.partialorder %v6573_v0, -inf  ;;  %3135 = vlog2.f32 %v5388_v61  ;;  %v6581_v5 = vld [vmem:[#allocation101_spill] sm:$0xff] }
 0x565   : >> { %2078 = vperm.xlu0 %2943, %v5424_v6   ;;  %v1979_v43 = vsel %vm1706_vm4, %v1963_v24, -inf  ;;  %v1598_v28 = vadd.f32 %v1578_v18, %v5096_v35  ;;  %v1582_v53 = vmul.f32 0.6931472, %v3116_v13  ;;  %v3118_v50 = vpop.eup %3117  ;;  %vm6580_vm4 = vcmp.gt.f32.partialorder %v6579_v1, -inf  ;;  %v6584_v24 = vld [vmem:[#allocation76_spill] sm:$0xff] }
 0x566   : >> { %v1613_v55 = vsel %vm6559_vm13, %v1597_v12, -inf  ;;  %v1584_v54 = vmul.f32 0.6931472, %v3118_v50  ;;  %v3120_v38 = vpop.eup %3119  ;;  %vm6582_vm2 = vcmp.gt.f32.partialorder %v6581_v5, -inf  ;;  %v6592_v50 = vld [vmem:[#allocation94_spill] sm:$0xff]  ;;  %v3143_v5 = vld [vmem:[#allocation2 + $0x38] sm:$0xff] }
 0x567   : >> { %1997 = vxpose.xlu1.b32.cont [9/16] (narrow) %v5315_v46, 8  ;;  %v1580_v46 = vmul.f32 0.6931472, %v3114_v49  ;;  %v1614_v41 = vsel %vm6560_vm11, %v1598_v28, -inf  ;;  %v1600_v35 = vadd.f32 %v1582_v53, %v5126_v23  ;;  %v6567_v23 = vld [vmem:[#allocation100_spill] sm:$0xff]  ;;  %v6588_v28 = vld [vmem:[#allocation82_spill] sm:$0xff] }
 0x568   : >> { %vm6568_vm10 = vcmp.gt.f32.partialorder %v6567_v23, -inf  ;;  %v6590_v53 = vld [vmem:[#allocation74_spill] sm:$0xff] }
 0x569   : >> { %2073 = vperm.xlu0 %2943, %v1979_v43   ;;  %v1599_v52 = vadd.f32 %v1580_v46, %v5113_v57  ;;  %v1601_v57 = vadd.f32 %v1584_v54, %v6563_v3  ;;  %v1616_v39 = vsel %vm6565_vm8, %v1600_v35, -inf  ;;  %vm6591_vm12 = vcmp.gt.f32.partialorder %v6590_v53, -inf  ;;  %v6632_v53 = vld [vmem:[#allocation20_spill] sm:$0xff] }
 0x56b   : >> { %1998 = vxpose.xlu1.b32.cont [10/16] (narrow) %v1612_v22, 8  ;;  %v1617_v16 = vsel %vm6568_vm10, %v1601_v57, -inf }
 0x56d   : >> { %2144 = vperm.xlu0 %2943, %v5355_v37   ;;  %v6561_v37 = vld [vmem:[#allocation98_spill] sm:$0xff] }
 0x56e   : >> { %vm6562_vm9 = vcmp.gt.f32.partialorder %v6561_v37, -inf  ;;  %v6594_v37 = vld [vmem:[#allocation14_spill] sm:$0xff] }
 0x56f   : >> { %1999 = vxpose.xlu1.b32.cont [11/16] (narrow) %v1613_v55, 8  ;;  %v1615_v62 = vsel %vm6562_vm9, %v1599_v52, -inf  ;;  %vm2286_vm1 = vcmp.eq.s32.totalorder %v6594_v37, 0 }
 0x571   : >> { %2139 = vperm.xlu0 %2943, %v5338_v21   ;;  %v1586_v21 = vmul.f32 0.6931472, %v3120_v38  ;;  %v6596_v38 = vld [vmem:[#allocation15_spill] sm:$0xff] }
 0x573   : >> { %2000 = vxpose.xlu1.b32.cont [12/16] (narrow) %v1614_v41, 8 }
 0x575   : >> { %2154 = vperm.xlu0 %2943, %v5381_v20   ;;  %v6566_v20 = vld [vmem:[#allocation89_spill] sm:$0xff] }
 0x576   : >> { %v1602_v8 = vadd.f32 %v1586_v21, %v6566_v20  ;;  %v2320_v21 = vstv %s2319_s25  ;;  %v6601_v20 = vld [vmem:[#allocation97_spill] sm:$0xff] }
 0x577   : >> { %2001 = vxpose.xlu1.b32.cont [13/16] (narrow) %v1615_v62, 8  ;;  %vm5515_vm13 = vcmp.eq.s32.totalorder %v2320_v21, 1 }
 0x579   : >> { %2149 = vperm.xlu0 %2943, %v5371_v40   ;;  %v5461_v40 = vsel %vm6570_vm7, %v1602_v8, -inf }
 0x57b   : >> { %2002 = vxpose.xlu1.b32.cont [14/16] (narrow) %v1616_v39, 8 }
 0x57d   : >> { %2164 = vperm.xlu0 %2943, %v5398_v9  }
 0x57f   : >> { %2003 = vxpose.xlu1.b32.cont [15/16] (narrow) %v1617_v16, 8 }
 0x581   : >> { %2159 = vperm.xlu0 %2943, %v5392_v36   ;;  %v3122_v36 = vpop.eup %3121 }
 0x583   : >> { %2004 = vxpose.xlu1.b32.end [16/16] (narrow) %v5461_v40, 8 }
 0x585   : >> { %2174 = vperm.xlu0 %2943, %v1610_v33  }
 0x587   : >> { %2233 = vxpose.xlu1.b32.start [1/16] (narrow) %v5327_v27, 8  ;;  %v1944_v27 = vmul.f32 0.6931472, %v3122_v36 }
 0x589   : >> { %2169 = vperm.xlu0 %2943, %v1609_v10  }
 0x58b   : >> { %2234 = vxpose.xlu1.b32.cont [2/16] (narrow) %v5321_v31, 8  ;;  %v3124_v31 = vpop.eup %3123 }
 0x58c   : >> { %v1942_v34 = vmul.f32 0.6931472, %v3124_v31  ;;  %v3138_v31 = vld [vmem:[#allocation2 + $0x8] sm:$0xff] }
 0x58d   : >> { %2184 = vperm.xlu0 %2943, %v1612_v22   ;;  %v6586_v22 = vld [vmem:[#allocation91_spill] sm:$0xff] }
 0x58e   : >> { %v1965_v9 = vadd.f32 %v1942_v34, %v6572_v30  ;;  %vm6587_vm15 = vcmp.gt.f32.partialorder %v6586_v22, -inf  ;;  %v3140_v30 = vld [vmem:[#allocation2 + $0x10] sm:$0xff] }
 0x58f   : >> { %2235 = vxpose.xlu1.b32.cont [3/16] (narrow) %v5363_v45, 8  ;;  %v3126_v45 = vpop.eup %3125 }
 0x590   : >> { %v3128_v15 = vpop.eup %3127  ;;  %v1948_v47 = vmul.f32 0.6931472, %v3126_v45  ;;  %v1981_v19 = vsel %vm6576_vm5, %v1965_v9, -inf  ;;  %v6609_v9 = vld [vmem:[#allocation23_spill] sm:$0xff] }
 0x591   : >> { %2194 = vperm.xlu0 %2943, %v1614_v41   ;;  %v1946_v29 = vmul.f32 0.6931472, %v3128_v15  ;;  %v3130_v10 = vpop.eup %3129 }
 0x592   : >> { %v1968_v58 = vadd.f32 %v1948_v47, %v6577_v63  ;;  %v1952_v56 = vmul.f32 0.6931472, %v3130_v10  ;;  %v3141_v63 = vld [vmem:[#allocation2 + $0x28] sm:$0xff] }
 0x593   : >> { %2236 = vxpose.xlu1.b32.cont [4/16] (narrow) %v5346_v26, 8  ;;  %v1966_v26 = vadd.f32 %v1944_v27, %v6571_v42  ;;  %v1967_v4 = vadd.f32 %v1946_v29, %v6578_v44  ;;  %v6605_v27 = vld [vmem:[#allocation22_spill] sm:$0xff]  ;;  %v3139_v42 = vld [vmem:[#allocation2 + $0x18] sm:$0xff] }
 0x594   : >> { %v1984_v51 = vsel %vm6580_vm4, %v1968_v58, -inf  ;;  %v6615_v58 = vld [vmem:[#allocation32_spill] sm:$0xff] }
 0x595   : >> { %2189 = vperm.xlu0 %2943, %v1613_v55   ;;  %v1983_v32 = vsel %vm6582_vm2, %v1967_v4, -inf  ;;  %v6589_v55 = vld [vmem:[#allocation80_spill] sm:$0xff] }
 0x597   : >> { %2237 = vxpose.xlu1.b32.cont [5/16] (narrow) %v5415_v11, 8  ;;  %v3132_v11 = vpop.eup %3131 }
 0x598   : >> { %v1950_v33 = vmul.f32 0.6931472, %v3132_v11  ;;  %v3134_v61 = vpop.eup %3133  ;;  %v3142_v11 = vld [vmem:[#allocation2 + $0x20] sm:$0xff] }
 0x599   : >> { %2204 = vperm.xlu0 %2943, %v1616_v39   ;;  %v3136_v14 = vpop.eup %3135  ;;  %v1956_v60 = vmul.f32 0.6931472, %v3134_v61 }
 0x59a   : >> { %v1969_v2 = vadd.f32 %v1950_v33, %v6584_v24  ;;  %v1954_v12 = vmul.f32 0.6931472, %v3136_v14  ;;  %v3144_v24 = vld [vmem:[#allocation2 + $0x30] sm:$0xff] }
 0x59b   : >> { %2238 = vxpose.xlu1.b32.cont [6/16] (narrow) %v5405_v17, 8  ;;  %v1982_v17 = vsel %vm6574_vm14, %v1966_v26, -inf  ;;  %v1972_v46 = vadd.f32 %v1956_v60, %v6588_v28  ;;  %v6607_v26 = vld [vmem:[#allocation27_spill] sm:$0xff] }
 0x59c   : >> { %v1985_v49 = vsel %vm6587_vm15, %v1969_v2, -inf  ;;  %v1971_v13 = vadd.f32 %v1954_v12, %v6589_v55  ;;  %v6624_v2 = vld [vmem:[#allocation46_spill] sm:$0xff]  ;;  %v6629_v55 = vld [vmem:[#allocation19_spill] sm:$0xff] }
 0x59d   : >> { %2199 = vperm.xlu0 %2943, %v1615_v62   ;;  %v1988_v52 = vsel %vm6591_vm12, %v1972_v46, -inf  ;;  %v5505_v54 = vpop.permute.xlu1 %2179  ;;  %v6595_v62 = vld [vmem:[#allocation63_spill] sm:$0xff]  ;;  %v6628_v46 = vld [vmem:[#allocation18_spill] sm:$0xff] }
 0x59e   : >> { %vm2302_vm3 = vcmp.eq.s32.totalorder %v6596_v38, %v6595_v62  ;;  %vm6611_vm14 = vcmp.eq.s32.totalorder %v6602_v7, %v6595_v62  ;;  %vm6612_vm5 = vcmp.eq.s32.totalorder %v6605_v27, %v6595_v62  ;;  %vm6613_vm4 = vcmp.eq.s32.totalorder %v6607_v26, %v6595_v62 }
 0x59f   : >> { %2239 = vxpose.xlu1.b32.cont [7/16] (narrow) %v1979_v43, 8  ;;  %vm5511_vm6 = vmand %vm2286_vm1, %vm2302_vm3  ;;  %vm6614_vm2 = vcmp.eq.s32.totalorder %v6609_v9, %v6595_v62  ;;  %vm6617_vm12 = vcmp.eq.s32.totalorder %v6615_v58, %v6595_v62 }
 0x5a0   : >> { %vm2322_vm11 = vmand %vm5511_vm6, %vm5515_vm13 }
 0x5a1   : >> { %2209 = vperm.xlu0 %2943, %v1617_v16   ;;  %v3137_v16 = vld [vmem:[#allocation2] sm:$0xff] }
 0x5a3   : >> { %2240 = vxpose.xlu1.b32.cont [8/16] (narrow) %v5424_v6, 8  ;;  %v1970_v6 = vadd.f32 %v1952_v56, %v6583_v59  ;;  %v6618_v56 = vld [vmem:[#allocation31_spill] sm:$0xff] }
 0x5a4   : >> { %vm6620_vm1 = vcmp.eq.s32.totalorder %v6618_v56, %v6595_v62 }
 0x5a5   : >> { %2088 = vperm.xlu0 %2943, %v1982_v17   ;;  %v1986_v18 = vsel %vm1713_vm0, %v1970_v6, -inf  ;;  %vm6593_vm0 = vcmp.gt.f32.partialorder %v6592_v50, -inf  ;;  %v6689_v50 = vld [vmem:[#allocation50_spill] sm:$0xff] }
 0x5a6   : >> { %v1987_v35 = vsel %vm6593_vm0, %v1971_v13, -inf  ;;  %v3164_v13 = vld [vmem:[#allocation2 + $0x68] sm:$0xff] }
 0x5a7   : >> { %2241 = vxpose.xlu1.b32.cont [9/16] (narrow) %v1981_v19, 8 }
 0x5a9   : >> { %2083 = vperm.xlu0 %2943, %v1981_v19  }
 0x5ab   : >> { %2242 = vxpose.xlu1.b32.cont [10/16] (narrow) %v1982_v17, 8 }
 0x5ad   : >> { %2098 = vperm.xlu0 %2943, %v1984_v51  }
 0x5af   : >> { %2243 = vxpose.xlu1.b32.cont [11/16] (narrow) %v1983_v32, 8 }
 0x5b1   : >> { %2093 = vperm.xlu0 %2943, %v1983_v32   ;;  %v6621_v32 = vld [vmem:[#allocation47_spill] sm:$0xff] }
 0x5b2   : >> { %vm6623_vm6 = vcmp.eq.s32.totalorder %v6621_v32, %v6595_v62 }
 0x5b3   : >> { %2244 = vxpose.xlu1.b32.cont [12/16] (narrow) %v1984_v51, 8 }
 0x5b5   : >> { %2108 = vperm.xlu0 %2943, %v1986_v18  }
 0x5b7   : >> { %2245 = vxpose.xlu1.b32.cont [13/16] (narrow) %v1985_v49, 8 }
 0x5b8   : >> { %v2049_v41 = vpop.permute.xlu0 %2048 }
 0x5b9   : >> { %2103 = vperm.xlu0 %2943, %v1985_v49   ;;  %v6627_v49 = vld [vmem:[#allocation17_spill] sm:$0xff] }
 0x5bb   : >> { %2246 = vxpose.xlu1.b32.cont [14/16] (narrow) %v1986_v18, 8 }
 0x5bc   : >> { %v2044_v3 = vpop.permute.xlu0 %2043 }
 0x5bd   : >> { %2118 = vperm.xlu0 %2943, %v1988_v52  }
 0x5bf   : >> { %2247 = vxpose.xlu1.b32.cont [15/16] (narrow) %v1987_v35, 8 }
 0x5c1   : >> { %2113 = vperm.xlu0 %2943, %v1987_v35  }
 0x5c3   : >> { %2248 = vxpose.xlu1.b32.end [16/16] (narrow) %v1988_v52, 8 }
 0x5c5   : >> { %2214 = vperm.xlu0 %2943, %v5461_v40   ;;  %v6603_v40 = vld [vmem:[#allocation96_spill] sm:$0xff] }
 0x5c6   : >> { %vm6604_vm9 = vcmp.eq.s32.totalorder %v6602_v7, %v6603_v40  ;;  %vm6606_vm8 = vcmp.eq.s32.totalorder %v6605_v27, %v6603_v40  ;;  %vm6608_vm10 = vcmp.eq.s32.totalorder %v6607_v26, %v6603_v40  ;;  %vm6610_vm7 = vcmp.eq.s32.totalorder %v6609_v9, %v6603_v40 }
 0x5c7   : >> { %v2005_v39 = vpop.trf.xlu1  ;;  %vm6616_vm15 = vcmp.eq.s32.totalorder %v6615_v58, %v6603_v40  ;;  %vm6619_vm0 = vcmp.eq.s32.totalorder %v6618_v56, %v6603_v40  ;;  %vm6622_vm3 = vcmp.eq.s32.totalorder %v6621_v32, %v6603_v40 }
 0x5c8   : >> { %v5520_v8 = vrot.slane %v2005_v39, %v6601_v20  ;;  %v2059_v23 = vpop.permute.xlu0 %2058  ;;  %v6644_v39 = vld [vmem:[#allocation41_spill] sm:$0xff] }
 0x5ca   : >> { %v2025_v36 = vsel %vm6604_vm9, %v5520_v8, %v3137_v16  ;;  %v2026_v34 = vsel %vm6606_vm8, %v5520_v8, %v3138_v31  ;;  %v2028_v45 = vsel %vm6608_vm10, %v5520_v8, %v3139_v42  ;;  %v2027_v15 = vsel %vm6610_vm7, %v5520_v8, %v3140_v30  ;;  %v3145_v30 = vld [vmem:[#allocation3 + $0x40] sm:$0xff] }
 0x5cb   : >> { %v2121_v47 = vsel %vm6611_vm14, %v2044_v3, %v2025_v36  ;;  %v2122_v0 = vsel %vm6612_vm5, %v2049_v41, %v2026_v34  ;;  %v2124_v17 = vsel %vm6613_vm4, %v2059_v23, %v2028_v45  ;;  %v2030_v10 = vsel %vm6616_vm15, %v5520_v8, %v3141_v63  ;;  %v6635_v41 = vld [vmem:[#allocation21_spill] sm:$0xff]  ;;  %v6653_v45 = vld [vmem:[#allocation42_spill] sm:$0xff] }
 0x5cc   : >> { %2420 = vst [vmem:[#allocation2 + $0x8] sm:$0xff] %v2122_v0  ;;  %2422 = vst [vmem:[#allocation2 + $0x18] sm:$0xff] %v2124_v17  ;;  %v2054_v29 = vpop.permute.xlu0 %2053  ;;  %v2338_v48 = vsel %vm2322_vm11, -inf, %v2121_v47  ;;  %v2029_v1 = vsel %vm6619_vm0, %v5520_v8, %v3142_v11  ;;  %v2032_v59 = vsel %vm6622_vm3, %v5520_v8, %v3143_v5  ;;  %vm6625_vm11 = vcmp.eq.s32.totalorder %v6624_v2, %v6603_v40  ;;  %v6641_v3 = vld [vmem:[#allocation37_spill] sm:$0xff]  ;;  %v3146_v0 = vld [vmem:[#allocation3 + $0x8] sm:$0xff] }
 0x5cd   : >> { %v2123_v19 = vsel %vm6614_vm2, %v2054_v29, %v2027_v15  ;;  %2419 = vst [vmem:[#allocation2] sm:$0xff] %v2338_v48  ;;  %v2031_v14 = vsel %vm6625_vm11, %v5520_v8, %v3144_v24  ;;  %vm6626_vm9 = vcmp.eq.s32.totalorder %v6624_v2, %v6595_v62  ;;  %vm2354_vm8 = vcmp.eq.s32.totalorder %v6594_v37, %v6595_v62  ;;  %v6638_v37 = vld [vmem:[#allocation36_spill] sm:$0xff]  ;;  %v6654_v15 = vld [vmem:[#allocation49_spill] sm:$0xff]  ;;  %v6693_v23 = vld [vmem:[#allocation58_spill] sm:$0xff] }
 0x5ce   : >> { %2421 = vst [vmem:[#allocation2 + $0x10] sm:$0xff] %v2123_v19  ;;  %vm6221_vm10 = vcmp.eq.s32.totalorder %v6596_v38, 0  ;;  %vm2355_vm7 = vcmp.eq.s32.totalorder %v6627_v49, %v6595_v62  ;;  %vm2356_vm14 = vcmp.eq.s32.totalorder %v6628_v46, %v6595_v62  ;;  %vm2357_vm5 = vcmp.eq.s32.totalorder %v6629_v55, %v6595_v62  ;;  %v6657_v48 = vld [vmem:[#allocation52_spill] sm:$0xff]  ;;  %v3147_v19 = vld [vmem:[#allocation3] sm:$0xff] }
 0x5cf   : >> { %vm5593_vm4 = vmand %vm2354_vm8, %vm6221_vm10  ;;  %vm2358_vm2 = vcmp.eq.s32.totalorder %v6632_v53, %v6595_v62  ;;  %v3151_v5 = vld [vmem:[#allocation3 + $0x20] sm:$0xff] }
 0x5d0   : >> { %vm5601_vm15 = vmand %vm2355_vm7, %vm6221_vm10  ;;  %v6697_v31 = vld [vmem:[#allocation54_spill] sm:$0xff] }
 0x5d1   : >> { %vm5609_vm0 = vmand %vm2356_vm14, %vm6221_vm10 }
 0x5d2   : >> { %vm5617_vm3 = vmand %vm2357_vm5, %vm6221_vm10 }
 0x5d3   : >> { %vm5625_vm11 = vmand %vm2358_vm2, %vm6221_vm10  ;;  %vm6658_vm2 = vcmp.eq.s32.totalorder %v6602_v7, %v6595_v62 }
 0x5dc   : >> { %v2069_v44 = vpop.permute.xlu0 %2068 }
 0x5dd   : >> { %v2126_v4 = vsel %vm6617_vm12, %v2069_v44, %v2030_v10  ;;  %vm2359_vm12 = vcmp.eq.s32.totalorder %v6635_v41, %v6595_v62  ;;  %v3149_v44 = vld [vmem:[#allocation3 + $0x10] sm:$0xff]  ;;  %v3154_v41 = vld [vmem:[#allocation3 + $0x48] sm:$0xff] }
 0x5de   : >> { %2424 = vst [vmem:[#allocation2 + $0x28] sm:$0xff] %v2126_v4  ;;  %vm5633_vm8 = vmand %vm2359_vm12, %vm6221_vm10  ;;  %vm6655_vm12 = vcmp.eq.s32.totalorder %v6654_v15, %v6595_v62 }
 0x5df   : >> { %v2225_v47 = vsel %vm6655_vm12, %v5505_v54, %v3145_v30  ;;  %v3148_v54 = vld [vmem:[#allocation3 + $0x18] sm:$0xff]  ;;  %vm6659_vm12 = vcmp.eq.s32.totalorder %v6607_v26, %v6595_v62  ;;  %v6698_v30 = vld [vmem:[#allocation55_spill] sm:$0xff] }
 0x5e0   : >> { %v2064_v51 = vpop.permute.xlu0 %2063 }
 0x5e1   : >> { %v2125_v33 = vsel %vm6620_vm1, %v2064_v51, %v2029_v1  ;;  %vm2360_vm1 = vcmp.eq.s32.totalorder %v6638_v37, %v6595_v62  ;;  %v3150_v51 = vld [vmem:[#allocation3 + $0x28] sm:$0xff] }
 0x5e2   : >> { %2423 = vst [vmem:[#allocation2 + $0x20] sm:$0xff] %v2125_v33  ;;  %vm5639_vm7 = vmand %vm2360_vm1, %vm6221_vm10  ;;  %vm6656_vm1 = vcmp.eq.s32.totalorder %v6605_v27, %v6595_v62  ;;  %v6691_v37 = vld [vmem:[#allocation51_spill] sm:$0xff] }
 0x5e4   : >> { %v2079_v6 = vpop.permute.xlu0 %2078 }
 0x5e5   : >> { %v2128_v61 = vsel %vm6623_vm6, %v2079_v6, %v2032_v59  ;;  %vm2361_vm6 = vcmp.eq.s32.totalorder %v6641_v3, %v6595_v62  ;;  %v3152_v6 = vld [vmem:[#allocation3 + $0x38] sm:$0xff] }
 0x5e6   : >> { %2426 = vst [vmem:[#allocation2 + $0x38] sm:$0xff] %v2128_v61  ;;  %vm5645_vm14 = vmand %vm2361_vm6, %vm6221_vm10  ;;  %v3153_v61 = vld [vmem:[#allocation3 + $0x30] sm:$0xff]  ;;  %vm6664_vm6 = vcmp.eq.s32.totalorder %v6624_v2, %v6595_v62 }
 0x5e8   : >> { %v2074_v60 = vpop.permute.xlu0 %2073 }
 0x5e9   : >> { %v2127_v43 = vsel %vm6626_vm9, %v2074_v60, %v2031_v14  ;;  %vm2362_vm9 = vcmp.eq.s32.totalorder %v6644_v39, %v6595_v62  ;;  %v3155_v39 = vld [vmem:[#allocation3 + $0x58] sm:$0xff] }
 0x5ea   : >> { %2425 = vst [vmem:[#allocation2 + $0x30] sm:$0xff] %v2127_v43  ;;  %vm5651_vm5 = vmand %vm2362_vm9, %vm6221_vm10 }
 0x5ec   : >> { %v2145_v18 = vpop.permute.xlu0 %2144 }
 0x5ed   : >> { %v2218_v17 = vsel %vm6656_vm1, %v2145_v18, %v3146_v0  ;;  %vm6660_vm1 = vcmp.eq.s32.totalorder %v6609_v9, %v6595_v62 }
 0x5f0   : >> { %v2140_v12 = vpop.permute.xlu0 %2139 }
 0x5f1   : >> { %v2217_v63 = vsel %vm6658_vm2, %v2140_v12, %v3147_v19  ;;  %vm6661_vm2 = vcmp.eq.s32.totalorder %v6615_v58, %v6595_v62  ;;  %v3157_v19 = vld [vmem:[#allocation3 + $0x68] sm:$0xff] }
 0x5f4   : >> { %v2155_v22 = vpop.permute.xlu0 %2154 }
 0x5f5   : >> { %v2220_v10 = vsel %vm6659_vm12, %v2155_v22, %v3148_v54  ;;  %vm6662_vm12 = vcmp.eq.s32.totalorder %v6618_v56, %v6595_v62 }
 0x5f8   : >> { %v2150_v28 = vpop.permute.xlu0 %2149 }
 0x5f9   : >> { %v2219_v4 = vsel %vm6660_vm1, %v2150_v28, %v3149_v44  ;;  %vm6663_vm1 = vcmp.eq.s32.totalorder %v6621_v32, %v6595_v62  ;;  %v6706_v44 = vld [vmem:[#allocation56_spill] sm:$0xff] }
 0x5fc   : >> { %v2165_v35 = vpop.permute.xlu0 %2164 }
 0x5fd   : >> { %v2222_v33 = vsel %vm6661_vm2, %v2165_v35, %v3150_v51  ;;  %vm6665_vm2 = vcmp.eq.s32.totalorder %v6653_v45, %v6595_v62  ;;  %v3156_v45 = vld [vmem:[#allocation3 + $0x50] sm:$0xff]  ;;  %v3158_v51 = vld [vmem:[#allocation3 + $0x60] sm:$0xff] }
 0x5fe   : >> { %vm5723_vm9 = vmand %vm6665_vm2, %vm6221_vm10  ;;  %vm6671_vm2 = vcmp.eq.s32.totalorder %v6607_v26, %v6603_v40  ;;  %vm6672_vm10 = vcmp.eq.s32.totalorder %v6618_v56, %v6603_v40 }
 0x600   : >> { %v2160_v36 = vpop.permute.xlu0 %2159 }
 0x601   : >> { %v2221_v59 = vsel %vm6662_vm12, %v2160_v36, %v3151_v5  ;;  %vm6668_vm12 = vcmp.eq.s32.totalorder %v6602_v7, %v6603_v40 }
 0x604   : >> { %v2175_v42 = vpop.permute.xlu0 %2174 }
 0x607   : >> { %v2249_v29 = vpop.trf.xlu1 }
 0x608   : >> { %v5700_v11 = vrot.slane %v2249_v29, %v6601_v20  ;;  %v2170_v1 = vpop.permute.xlu0 %2169  ;;  %v2224_v20 = vsel %vm6663_vm1, %v2175_v42, %v3152_v6  ;;  %vm6669_vm1 = vcmp.eq.s32.totalorder %v6605_v27, %v6603_v40 }
 0x609   : >> { %v2223_v24 = vsel %vm6664_vm6, %v2170_v1, %v3153_v61  ;;  %vm6670_vm6 = vcmp.eq.s32.totalorder %v6609_v9, %v6603_v40  ;;  %v3159_v61 = vld [vmem:[#allocation3 + $0x70] sm:$0xff] }
 0x60a   : >> { %v2269_v60 = vsel %vm6668_vm12, %v5700_v11, %v2217_v63  ;;  %v2270_v43 = vsel %vm6669_vm1, %v5700_v11, %v2218_v17  ;;  %v2271_v18 = vsel %vm6670_vm6, %v5700_v11, %v2219_v4  ;;  %v2272_v12 = vsel %vm6671_vm2, %v5700_v11, %v2220_v10  ;;  %v6701_v17 = vld [vmem:[#allocation53_spill] sm:$0xff]  ;;  %v6702_v63 = vld [vmem:[#allocation60_spill] sm:$0xff] }
 0x60b   : >> { %v2273_v7 = vsel %vm6672_vm10, %v5700_v11, %v2221_v59  ;;  %vm6673_vm1 = vcmp.eq.s32.totalorder %v6615_v58, %v6603_v40  ;;  %vm6674_vm6 = vcmp.eq.s32.totalorder %v6621_v32, %v6603_v40  ;;  %vm6675_vm2 = vcmp.eq.s32.totalorder %v6654_v15, %v6603_v40  ;;  %vm2395_vm10 = vmand %vm5651_vm5, %vm5515_vm13 }
 0x60c   : >> { %v2274_v27 = vsel %vm6673_vm1, %v5700_v11, %v2222_v33  ;;  %v2276_v26 = vsel %vm6674_vm6, %v5700_v11, %v2224_v20  ;;  %v2277_v9 = vsel %vm6675_vm2, %v5700_v11, %v2225_v47  ;;  %vm6676_vm12 = vcmp.eq.s32.totalorder %v6624_v2, %v6603_v40  ;;  %vm6677_vm1 = vmand %vm5593_vm4, %vm5515_vm13  ;;  %v2185_v2 = vpop.permute.xlu0 %2184  ;;  %v6707_v33 = vld [vmem:[#allocation59_spill] sm:$0xff] }
 0x60d   : >> { %v2275_v58 = vsel %vm6676_vm12, %v5700_v11, %v2223_v24  ;;  %v2403_v56 = vsel %vm6677_vm1, -inf, %v2269_v60  ;;  %vm6678_vm6 = vmand %vm5601_vm15, %vm5515_vm13  ;;  %v2411_v52 = vsel %vm2395_vm10, -inf, %v2277_v9  ;;  %vm6694_vm10 = vcmp.eq.s32.totalorder %v6693_v23, %v6595_v62  ;;  %v6711_v24 = vld [vmem:[#allocation61_spill] sm:$0xff] }
 0x60e   : >> { %v2404_v32 = vsel %vm6678_vm6, -inf, %v2270_v43  ;;  %vm6679_vm2 = vmand %vm5609_vm0, %vm5515_vm13  ;;  %2435 = vst [vmem:[#allocation3] sm:$0xff] %v2403_v56  ;;  %v3160_v43 = vld [vmem:[#allocation2 + $0x48] sm:$0xff] }
 0x60f   : >> { %v2405_v22 = vsel %vm6679_vm2, -inf, %v2271_v18  ;;  %vm2396_vm12 = vmand %vm5723_vm9, %vm5515_vm13  ;;  %2436 = vst [vmem:[#allocation3 + $0x8] sm:$0xff] %v2404_v32  ;;  %vm2364_vm2 = vcmp.eq.s32.totalorder %v6691_v37, %v6595_v62  ;;  %vm6696_vm9 = vcmp.eq.s32.totalorder %v6693_v23, %v6603_v40  ;;  %v3162_v32 = vld [vmem:[#allocation2 + $0x58] sm:$0xff] }
 0x610   : >> { %vm6680_vm4 = vmand %vm5617_vm3, %vm5515_vm13  ;;  %2437 = vst [vmem:[#allocation3 + $0x10] sm:$0xff] %v2405_v22  ;;  %vm6684_vm3 = vcmp.eq.s32.totalorder %v6596_v38, 0  ;;  %v2195_v57 = vpop.permute.xlu0 %2194 }
 0x611   : >> { %v2406_v49 = vsel %vm6680_vm4, -inf, %v2272_v12  ;;  %vm6681_vm15 = vmand %vm5625_vm11, %vm5515_vm13  ;;  %vm6685_vm11 = vcmp.eq.s32.totalorder %v6657_v48, %v6595_v62  ;;  %2443 = vst [vmem:[#allocation3 + $0x40] sm:$0xff] %v2411_v52  ;;  %v2228_v16 = vsel %vm6694_vm10, %v2195_v57, %v3155_v39  ;;  %vm6705_vm10 = vcmp.eq.s32.totalorder %v6702_v63, %v6603_v40  ;;  %v6726_v57 = vld [vmem:[#allocation62_spill] sm:$0xff] }
 0x612   : >> { %v2407_v28 = vsel %vm6681_vm15, -inf, %v2273_v7  ;;  %vm6682_vm0 = vmand %vm5633_vm8, %vm5515_vm13  ;;  %2438 = vst [vmem:[#allocation3 + $0x18] sm:$0xff] %v2406_v49  ;;  %v2280_v36 = vsel %vm6696_vm9, %v5700_v11, %v2228_v16  ;;  %vm6708_vm9 = vcmp.eq.s32.totalorder %v6707_v33, %v6595_v62 }
 0x613   : >> { %v2408_v46 = vsel %vm6682_vm0, -inf, %v2274_v27  ;;  %vm6683_vm1 = vmand %vm5639_vm7, %vm5515_vm13  ;;  %2439 = vst [vmem:[#allocation3 + $0x20] sm:$0xff] %v2407_v28  ;;  %vm6690_vm7 = vcmp.eq.s32.totalorder %v6689_v50, %v6595_v62  ;;  %v3163_v28 = vld [vmem:[#allocation2 + $0x50] sm:$0xff] }
 0x614   : >> { %v2409_v55 = vsel %vm6683_vm1, -inf, %v2275_v58  ;;  %vm5815_vm6 = vmand %vm6685_vm11, %vm6684_vm3  ;;  %2440 = vst [vmem:[#allocation3 + $0x28] sm:$0xff] %v2408_v46  ;;  %v2226_v35 = vsel %vm6690_vm7, %v2185_v2, %v3154_v41  ;;  %v2190_v42 = vpop.permute.xlu0 %2189  ;;  %vm6699_vm1 = vcmp.eq.s32.totalorder %v6698_v30, %v6595_v62 }
 0x615   : >> { %vm6688_vm8 = vmand %vm5645_vm14, %vm5515_vm13  ;;  %2441 = vst [vmem:[#allocation3 + $0x30] sm:$0xff] %v2409_v55  ;;  %vm6692_vm14 = vcmp.eq.s32.totalorder %v6689_v50, %v6603_v40  ;;  %v2227_v47 = vsel %vm6699_vm1, %v2190_v42, %v3156_v45  ;;  %vm6710_vm1 = vcmp.eq.s32.totalorder %v6707_v33, %v6603_v40 }
 0x616   : >> { %v2410_v53 = vsel %vm6688_vm8, -inf, %v2276_v26  ;;  %v2278_v21 = vsel %vm6692_vm14, %v5700_v11, %v2226_v35  ;;  %vm2398_vm5 = vmand %vm5815_vm6, %vm5515_vm13  ;;  %vm6700_vm6 = vcmp.eq.s32.totalorder %v6698_v30, %v6603_v40  ;;  %vm2366_vm8 = vcmp.eq.s32.totalorder %v6701_v17, %v6595_v62  ;;  %v3161_v26 = vld [vmem:[#allocation2 + $0x40] sm:$0xff] }
 0x617   : >> { %2442 = vst [vmem:[#allocation3 + $0x38] sm:$0xff] %v2410_v53  ;;  %v2412_v3 = vsel %vm2396_vm12, -inf, %v2278_v21  ;;  %vm6695_vm4 = vmmov %vm6684_vm3  ;;  %vm2367_vm12 = vcmp.eq.s32.totalorder %v6697_v31, %v6595_v62  ;;  %v2414_v34 = vsel %vm2398_vm5, -inf, %v2280_v36  ;;  %v2279_v0 = vsel %vm6700_vm6, %v5700_v11, %v2227_v47  ;;  %v3167_v36 = vld [vmem:[#allocation2 + $0x70] sm:$0xff]  ;;  %v3168_v47 = vld [vmem:[#allocation3 + $0x78] sm:$0xff] }
 0x618   : >> { %2444 = vst [vmem:[#allocation3 + $0x48] sm:$0xff] %v2412_v3  ;;  %vm2381_vm15 = vmand %vm2364_vm2, %vm6695_vm4  ;;  %v2205_v48 = vpop.permute.xlu0 %2204  ;;  %vm6703_vm2 = vcmp.eq.s32.totalorder %v6702_v63, %v6595_v62  ;;  %vm2368_vm4 = vcmp.eq.s32.totalorder %v6706_v44, %v6595_v62  ;;  %vm6713_vm6 = vcmp.eq.s32.totalorder %v6711_v24, %v6603_v40  ;;  %v3166_v3 = vld [vmem:[#allocation2 + $0x78] sm:$0xff] }
 0x619   : >> { %2446 = vst [vmem:[#allocation3 + $0x58] sm:$0xff] %v2414_v34  ;;  %vm2397_vm0 = vmand %vm2381_vm15, %vm5515_vm13  ;;  %v2230_v54 = vsel %vm6703_vm2, %v2205_v48, %v3157_v19  ;;  %vm6716_vm2 = vcmp.eq.s32.totalorder %v6654_v15, %v6603_v40  ;;  %v2039_v31 = vsel %vm6713_vm6, %v5520_v8, %v3167_v36  ;;  %v6729_v34 = vld [vmem:[#allocation57_spill] sm:$0xff] }
 0x61a   : >> { %vm2384_vm11 = vmand %vm2367_vm12, %vm6684_vm3  ;;  %v2413_v29 = vsel %vm2397_vm0, -inf, %v2279_v0  ;;  %v2282_v10 = vsel %vm6705_vm10, %v5700_v11, %v2230_v54  ;;  %v2033_v9 = vsel %vm6716_vm2, %v5520_v8, %v3161_v26  ;;  %vm6719_vm10 = vcmp.eq.s32.totalorder %v6693_v23, %v6595_v62 }
 0x61b   : >> { %2445 = vst [vmem:[#allocation3 + $0x50] sm:$0xff] %v2413_v29  ;;  %vm2400_vm7 = vmand %vm2384_vm11, %vm5515_vm13  ;;  %vm6712_vm11 = vcmp.eq.s32.totalorder %v6711_v24, %v6595_v62  ;;  %vm6731_vm2 = vcmp.eq.s32.totalorder %v6596_v38, 0 }
 0x61c   : >> { %vm6704_vm14 = vmmov %vm6684_vm3  ;;  %v2416_v4 = vsel %vm2400_vm7, -inf, %v2282_v10  ;;  %v2200_v1 = vpop.permute.xlu0 %2199  ;;  %vm6715_vm7 = vcmp.eq.s32.totalorder %v6689_v50, %v6595_v62 }
 0x61d   : >> { %vm2383_vm5 = vmand %vm2366_vm8, %vm6704_vm14  ;;  %2448 = vst [vmem:[#allocation3 + $0x68] sm:$0xff] %v2416_v4  ;;  %v2229_v5 = vsel %vm6708_vm9, %v2200_v1, %v3158_v51  ;;  %vm6714_vm8 = vcmp.eq.s32.totalorder %v6689_v50, %v6603_v40  ;;  %vm6717_vm14 = vcmp.eq.s32.totalorder %v6654_v15, %v6595_v62  ;;  %vm6722_vm9 = vcmp.eq.s32.totalorder %v6702_v63, %v6603_v40  ;;  %v3165_v50 = vld [vmem:[#allocation2 + $0x60] sm:$0xff] }
 0x61e   : >> { %vm2399_vm15 = vmand %vm2383_vm5, %vm5515_vm13  ;;  %v2281_v59 = vsel %vm6710_vm1, %v5700_v11, %v2229_v5  ;;  %v2034_v18 = vsel %vm6714_vm8, %v5520_v8, %v3160_v43  ;;  %vm6718_vm5 = vcmp.eq.s32.totalorder %v6693_v23, %v6603_v40  ;;  %v2038_v53 = vsel %vm6722_vm9, %v5520_v8, %v3164_v13 }
 0x61f   : >> { %vm6709_vm12 = vmmov %vm6684_vm3  ;;  %v2415_v6 = vsel %vm2399_vm15, -inf, %v2281_v59  ;;  %v2036_v22 = vsel %vm6718_vm5, %v5520_v8, %v3162_v32  ;;  %vm6721_vm15 = vcmp.eq.s32.totalorder %v6698_v30, %v6595_v62  ;;  %vm2369_vm8 = vcmp.eq.s32.totalorder %v6729_v34, %v6595_v62 }
 0x620   : >> { %vm2385_vm0 = vmand %vm2368_vm4, %vm6709_vm12  ;;  %2447 = vst [vmem:[#allocation3 + $0x60] sm:$0xff] %v2415_v6  ;;  %v2210_v20 = vpop.permute.xlu0 %2209  ;;  %vm6720_vm4 = vcmp.eq.s32.totalorder %v6698_v30, %v6603_v40  ;;  %vm6723_vm12 = vcmp.eq.s32.totalorder %v6702_v63, %v6595_v62 }
 0x621   : >> { %vm2401_vm3 = vmand %vm2385_vm0, %vm5515_vm13  ;;  %v2231_v14 = vsel %vm6712_vm11, %v2210_v20, %v3159_v61  ;;  %v2035_v15 = vsel %vm6720_vm4, %v5520_v8, %v3163_v28  ;;  %vm6728_vm11 = vcmp.eq.s32.totalorder %v6726_v57, %v6595_v62 }
 0x622   : >> { %v2283_v60 = vsel %vm6713_vm6, %v5700_v11, %v2231_v14  ;;  %vm6724_vm0 = vmmov %vm6710_vm1  ;;  %vm6725_vm1 = vcmp.eq.s32.totalorder %v6707_v33, %v6595_v62 }
 0x623   : >> { %v2417_v12 = vsel %vm2401_vm3, -inf, %v2283_v60  ;;  %v2037_v35 = vsel %vm6724_vm0, %v5520_v8, %v3165_v50  ;;  %vm6727_vm3 = vcmp.eq.s32.totalorder %v6726_v57, %v6603_v40 }
 0x624   : >> { %2449 = vst [vmem:[#allocation3 + $0x70] sm:$0xff] %v2417_v12  ;;  %v2089_v7 = vpop.permute.xlu0 %2088  ;;  %v2040_v39 = vsel %vm6727_vm3, %v5520_v8, %v3166_v3  ;;  %vm6733_vm4 = vmmov %vm6727_vm3 }
 0x625   : >> { %v2130_v27 = vsel %vm6715_vm7, %v2089_v7, %v2034_v18  ;;  %vm6730_vm7 = vcmp.eq.s32.totalorder %v6711_v24, %v6595_v62 }
 0x626   : >> { %2428 = vst [vmem:[#allocation2 + $0x48] sm:$0xff] %v2130_v27 }
 0x628   : >> { %v2084_v58 = vpop.permute.xlu0 %2083 }
 0x629   : >> { %v2129_v56 = vsel %vm6717_vm14, %v2084_v58, %v2033_v9  ;;  %vm2386_vm14 = vmand %vm2369_vm8, %vm6731_vm2 }
 0x62a   : >> { %2427 = vst [vmem:[#allocation2 + $0x40] sm:$0xff] %v2129_v56  ;;  %vm2402_vm5 = vmand %vm2386_vm14, %vm5515_vm13 }
 0x62c   : >> { %v2099_v2 = vpop.permute.xlu0 %2098 }
 0x62d   : >> { %v2132_v49 = vsel %vm6719_vm10, %v2099_v2, %v2036_v22  ;;  %vm6732_vm10 = vmmov %vm6728_vm11 }
 0x62e   : >> { %2430 = vst [vmem:[#allocation2 + $0x58] sm:$0xff] %v2132_v49 }
 0x630   : >> { %v2094_v46 = vpop.permute.xlu0 %2093 }
 0x631   : >> { %v2131_v55 = vsel %vm6721_vm15, %v2094_v46, %v2035_v15 }
 0x632   : >> { %2429 = vst [vmem:[#allocation2 + $0x50] sm:$0xff] %v2131_v55 }
 0x634   : >> { %v2109_v52 = vpop.permute.xlu0 %2108 }
 0x635   : >> { %v2134_v41 = vsel %vm6723_vm12, %v2109_v52, %v2038_v53 }
 0x636   : >> { %2432 = vst [vmem:[#allocation2 + $0x68] sm:$0xff] %v2134_v41 }
 0x638   : >> { %v2104_v37 = vpop.permute.xlu0 %2103 }
 0x639   : >> { %v2133_v21 = vsel %vm6725_vm1, %v2104_v37, %v2037_v35 }
 0x63a   : >> { %2431 = vst [vmem:[#allocation2 + $0x60] sm:$0xff] %v2133_v21 }
 0x63c   : >> { %v2119_v23 = vpop.permute.xlu0 %2118 }
 0x63d   : >> { %v2136_v16 = vsel %vm6728_vm11, %v2119_v23, %v2040_v39 }
 0x63e   : >> { %2434 = vst [vmem:[#allocation2 + $0x78] sm:$0xff] %v2136_v16 }
 0x640   : >> { %v2114_v42 = vpop.permute.xlu0 %2113 }
 0x641   : >> { %v2135_v45 = vsel %vm6730_vm7, %v2114_v42, %v2039_v31 }
 0x642   : >> { %2433 = vst [vmem:[#allocation2 + $0x70] sm:$0xff] %v2135_v45  ;;  %373 = sbr.rel (!%p370_p1) target bundleno = 145 (0x91), region = 79 }
 0x644   : >> { %v2215_v30 = vpop.permute.xlu0 %2214 }
 0x645   : >> { %v2232_v8 = vsel %vm6732_vm10, %v2215_v30, %v3168_v47 }
 0x646   : >> { %v2284_v0 = vsel %vm6733_vm4, %v5700_v11, %v2232_v8 }
 0x647   : >> { %v2418_v17 = vsel %vm2402_vm5, -inf, %v2284_v0 }
 0x648   : >> { %2450 = vst [vmem:[#allocation3 + $0x78] sm:$0xff] %v2418_v17 }
 0x649 PF: > { %v2451_v25 = vld [vmem:[#allocation2] sm:$0x1]  ;;  %s2550_s26 = sshll.u32 %s3344_s0, 4  ;;  %s2466_s6 = sshll.u32 %s138_s11, 4  ;;  %s2467_s6 = int_to_ptr.vmem [resolvable:$true] %s2466_s6 }
 0x64a   : > { %2452 = vst [vmem:[%s138_s11] sm:$0x1] %v2451_v25  ;;  %s5984_s5 = scalar_lea.hbm %s6026_s2, %s2550_s26  ;;  %s2454_s8 = scalar_lea.sflag [#allocation9], %s3427_s7 }
 0x64b   : > { %s3209_s10 = scalar_lea.vmem %s2467_s6, 16  ;;  %p6734_p11 = scmp.ne.s32.totalorder %s6224_s30, 0 }
 0x64c   : > { %p3210_p2 = scmp.ne.s32.totalorder %s2467_s6, %s3209_s10  ;;  %s3295_s14 = smov [#allocation10]  }
 0x64d   : > { %s3213_s9 = sshll.u32 %s3295_s14, 4  ;;  %s3214_s9 = int_to_ptr.vmem [resolvable:$false] %s3213_s9 }
 0x64e   : > { %p3211_p13 = pnand %p3210_p2, %p6734_p11  ;;  %s3215_s0 = scalar_lea.vmem %s3214_s9, 32 }
 0x64f   : > { %p3216_p5 = scmp.lt.s32.totalorder %s2467_s6, %s3214_s9  ;;  %p3217_p7 = scmp.lt.s32.totalorder %s3215_s0, %s3209_s10 }
 0x650   : > { %p3212_p3 = pneg %p3211_p13 }
 0x651   : > { %p3218_p8 = por %p3217_p7, %p3216_p5 }
 0x653   : > { %p3219_p10 = pnand %p3218_p8, %p3212_p3 }
 0x655   : > { %3222 = shalt.err (!%p3219_p10)
}
 0x656   : > { %s3223_s7 = scalar_lea.hbm %s5984_s5, 16  ;;  %s3227_s12 = scalar_lea.hbm %s6026_s2, 32 }
 0x657   : > { %p3224_p12 = scmp.ne.s32.totalorder %s5984_s5, %s3223_s7  ;;  %p3228_p9 = scmp.lt.u32.totalorder %s5984_s5, %s6026_s2 }
 0x658   : > { %p3229_p0 = scmp.lt.u32.totalorder %s3227_s12, %s3223_s7  ;;  %p3231_p2 = scmp.lt.u32.totalorder %s3223_s7, %s5984_s5 }
 0x659   : > { %p3225_p4 = pnand %p3224_p12, %p6734_p11 }
 0x65a   : > { %p3230_p1 = por %p3229_p0, %p3228_p9 }
 0x65b   : > { %p3226_p6 = pneg %p3225_p4 }
 0x65c   : > { %p3232_p13 = por %p3231_p2, %p3230_p1 }
 0x65e   : > { %p3233_p3 = pnand %p3232_p13, %p3226_p6 }
 0x660   : > { %3236 = shalt.err (!%p3233_p3)
}
 0x661   : > { %2884 = dma.vmem_to_hbm [thread:$0]  (%p6734_p11), %s2467_s6, 16, %s5984_s5, %s2454_s8  }
 0x662 PF: > { %s2478_s16 = sand.u32 1, %s3269_s19   ;;  %p6735_p5 = scmp.ne.s32.totalorder %s6225_s3, 0 }
 0x663   : > { %p6736_p7 = scmp.ge.s32.totalorder %s3281_s22, 2  ;;  %s2479_s17 = scalar_lea.sflag [#allocation9], %s2478_s16 }
 0x665   : > { %p2891_p8 = pnand %p6736_p7, %p6735_p5 }
 0x667   : > { %3264 = dma.done.wait (!%p2891_p8), %s2479_s17, 16  }
 0x668   : > { %3266 = vsyncadd (!%p2891_p8), %s2479_s17, 4294967280  ;;  %p19_p10 = scmp.ge.s32.totalorder %s3348_s24, 4   ;;  %s6737_s19 = smov %s3273_s20 }
 0x669   : > { %s6738_s20 = smov %s3277_s21  ;;  %s6739_s21 = smov %s3360_s27 }
 0x66a   : > { %s6740_s22 = smov %s3348_s24  ;;  %21 = sbr.rel (!%p19_p10) target bundleno = 17 (0x11), region = 90 }
 0x671   :  { %2483 = vsyncpa [#allocation8], 1 }
 0x672   :  { %2485 = vsyncpa [#allocation8 + $0x1], 1 }
 0x673   :  { %2486 = vsyncpa [#allocation9], 1 }
 0x674   :  { %2488 = vsyncpa [#allocation9 + $0x1], 1 }

</bundles_post_ra>
